<compile_context>
chip_gen: v7x
topology: tpu7x:2x2x1
jax: 0.10.0
libtpu: 0.0.40
codegen_flags: <defaults>
</compile_context>

<pallas_src>
import numpy as np
import jax
import jax.numpy as jnp
from jax.experimental import pallas as pl
from jax.experimental.pallas import tpu as pltpu

VMEM = pltpu.MemorySpace.VMEM
CLAMP = 2.5

_ENC_ORDER = ("wf", "bf", "wgg", "bgg", "wgb", "bgb", "wmu", "bmu", "wlv", "blv")
_IMG_FLOW_ORDER = ("w1x2", "w1t2", "b12", "w22s", "w22t", "b22s", "b22t",
                   "w1y1", "w1t1", "b11", "w21s", "w21t", "b21s", "b21t",
                   "paa", "pab", "pba", "pbb")
_VAL_FLOW_ORDER = ("w1x2", "w1t2", "w1za2", "w1zb2", "b12",
                   "w22s", "w22t", "b22s", "b22t",
                   "w1y1", "w1t1", "w1za1", "w1zb1", "b11",
                   "w21s", "w21t", "b21s", "b21t",
                   "paa", "pab", "pba", "pbb")


def _dot(a, w):
    """bf16 MXU matmul with f32 accumulation (no-op casts if already bf16)."""
    if a.dtype != jnp.bfloat16:
        a = a.astype(jnp.bfloat16)
    if w.dtype != jnp.bfloat16:
        w = w.astype(jnp.bfloat16)
    return jnp.dot(a, w, preferred_element_type=jnp.float32)


def _coupling_node(x1, x2, conds, p, k, clamp):
    """One GLOW coupling block + folded random permutation for node k.

    conds: list of (bf16 value, name_of_sub2_weight, name_of_sub1_weight)
    implementing the (x_part, cond...) concat as a sum of split dots.
    The flow state stays split as (x1, x2); scale/translate weights are
    column-split so no sub-vreg lane slicing happens per node.
    """
    # --- half A: transform x1, conditioned on (x2, cond) -------------------
    pre2 = _dot(x2, p["w1x2"][k]) + p["b12"][k]
    for c, n2, _ in conds:
        pre2 = pre2 + _dot(c, p[n2][k])
    h2 = jnp.maximum(pre2, 0.0)
    sc2 = clamp * jnp.tanh((_dot(h2, p["w22s"][k]) + p["b22s"][k]) / clamp)
    t2 = _dot(h2, p["w22t"][k]) + p["b22t"][k]
    y1 = x1 * jnp.exp(sc2) + t2

    # --- half B: transform x2, conditioned on (y1, cond) -------------------
    pre1 = _dot(y1, p["w1y1"][k]) + p["b11"][k]
    for c, _, n1 in conds:
        pre1 = pre1 + _dot(c, p[n1][k])
    h1 = jnp.maximum(pre1, 0.0)
    sc1 = clamp * jnp.tanh((_dot(h1, p["w21s"][k]) + p["b21s"][k]) / clamp)
    t1 = _dot(h1, p["w21t"][k]) + p["b21t"][k]
    y2 = x2 * jnp.exp(sc1) + t1

    # --- PermuteRandom as 4 one-hot matmuls (keeps halves split, f32 state) -
    nx1 = (jnp.dot(y1, p["paa"][k], preferred_element_type=jnp.float32)
           + jnp.dot(y2, p["pba"][k], preferred_element_type=jnp.float32))
    nx2 = (jnp.dot(y1, p["pab"][k], preferred_element_type=jnp.float32)
           + jnp.dot(y2, p["pbb"][k], preferred_element_type=jnp.float32))
    return nx1, nx2, sc2, sc1


def _make_visionflow_kernel(dim_latent, dim_value, nn_img, nn_val, clamp):
    l1z = dim_latent // 2
    l1v = dim_value // 2

    def kernel(*refs):
        it = iter(refs)
        img_ref, text_ref, x_ref, eps_ref = (next(it) for _ in range(4))
        enc = {n: next(it) for n in _ENC_ORDER}
        ifp = {n: next(it) for n in _IMG_FLOW_ORDER}
        vfp = {n: next(it) for n in _VAL_FLOW_ORDER}
        (y_ref, ldpy_ref, mu_ref, lv_ref,
         z0_ref, z1_ref, ldpz_ref) = (next(it) for _ in range(7))

        text = text_ref[...]
        text_bf = text.astype(jnp.bfloat16)

        # ---- encoder (FiLM-modulated linear stand-in) + reparameterize ----
        # TODO(synk): original ReverseFiLM_Encoder uses conv layers; replaced
        # by a flatten + linear feature extractor (definition not provided).
        feat = jnp.maximum(_dot(img_ref[...], enc["wf"][...]) + enc["bf"][...], 0.0)
        gamma = _dot(text_bf, enc["wgg"][...]) + enc["bgg"][...]
        beta = _dot(text_bf, enc["wgb"][...]) + enc["bgb"][...]
        h = feat * (1.0 + gamma) + beta
        mu = _dot(h, enc["wmu"][...]) + enc["bmu"][...]
        lv = _dot(h, enc["wlv"][...]) + enc["blv"][...]
        mu_ref[...] = mu
        lv_ref[...] = lv
        z0 = eps_ref[...] * jnp.exp(lv) + mu          # z = eps*exp(logvar)+mu
        z0_ref[...] = z0

        # ---- img_flow: GLOW coupling nodes conditioned on text ------------
        a, b = z0[:, :l1z], z0[:, l1z:]               # one split per flow
        acc1 = jnp.zeros_like(a)
        acc2 = jnp.zeros_like(b)
        conds = [(text_bf, "w1t2", "w1t1")]
        for k in range(nn_img):
            a, b, sc2, sc1 = _coupling_node(a, b, conds, ifp, k, clamp)
            acc1 = acc1 + sc2
            acc2 = acc2 + sc1
        z1a, z1b = a, b
        z1_ref[...] = jnp.concatenate([z1a, z1b], axis=1)     # written once
        ldpz_ref[...] = (jnp.sum(acc1, axis=1, keepdims=True)
                         + jnp.sum(acc2, axis=1, keepdims=True))

        # ---- value_flow: conditioned on (text, z1); concat eliminated -----
        xv = x_ref[...]
        a, b = xv[:, :l1v], xv[:, l1v:]
        acc1 = jnp.zeros_like(a)
        acc2 = jnp.zeros_like(b)
        conds = [(text_bf, "w1t2", "w1t1"),
                 (z1a.astype(jnp.bfloat16), "w1za2", "w1za1"),
                 (z1b.astype(jnp.bfloat16), "w1zb2", "w1zb1")]
        for k in range(nn_val):
            a, b, sc2, sc1 = _coupling_node(a, b, conds, vfp, k, clamp)
            acc1 = acc1 + sc2
            acc2 = acc2 + sc1
        y_ref[...] = jnp.concatenate([a, b], axis=1)          # written once
        ldpy_ref[...] = (jnp.sum(acc1, axis=1, keepdims=True)
                         + jnp.sum(acc2, axis=1, keepdims=True))

    return kernel


# ------------------------------- wrapper ------------------------------------

def vision_flow_forward(x, img, text, eps, params):
    B = img.shape[0]
    img_flat = img.reshape(B, -1)                    # NCHW -> (B, C*H*W)
    dim_value = x.shape[1]
    dim_latent = eps.shape[1]
    nn_img = params["img_flow"]["w1x2"].shape[0]
    nn_val = params["value_flow"]["w1x2"].shape[0]

    inputs = ([img_flat, text, x, eps]
              + [params["encoder"][n] for n in _ENC_ORDER]
              + [params["img_flow"][n] for n in _IMG_FLOW_ORDER]
              + [params["value_flow"][n] for n in _VAL_FLOW_ORDER])

    out_shape = (
        jax.ShapeDtypeStruct((B, dim_value), jnp.float32),    # y
        jax.ShapeDtypeStruct((B, 1), jnp.float32),            # log_det_py
        jax.ShapeDtypeStruct((B, dim_latent), jnp.float32),   # z_mu
        jax.ShapeDtypeStruct((B, dim_latent), jnp.float32),   # z_logvar
        jax.ShapeDtypeStruct((B, dim_latent), jnp.float32),   # z0
        jax.ShapeDtypeStruct((B, dim_latent), jnp.float32),   # z1
        jax.ShapeDtypeStruct((B, 1), jnp.float32),            # log_det_pz
    )

    outs = pl.pallas_call(
        _make_visionflow_kernel(dim_latent, dim_value, nn_img, nn_val, CLAMP),
        out_shape=out_shape,
        in_specs=[pl.BlockSpec(memory_space=VMEM) for _ in range(len(inputs))],
        out_specs=tuple(pl.BlockSpec(memory_space=VMEM) for _ in range(7)),
    )(*inputs)

    y, ldpy, z_mu, z_logvar, z0, z1, ldpz = outs
    return y, ldpy[:, 0], z_mu, z_logvar, z0, z1, ldpz[:, 0]


# ------------------------- deterministic parameters -------------------------

def init_encoder(key, dim_img, img_size, dim_text, dim_latent, hidden=32):
    k1, k2, k3, k4, k5 = jax.random.split(key, 5)
    din = dim_img * img_size * img_size
    bf16 = jnp.bfloat16
    return {
        "wf":  (0.02 * jax.random.normal(k1, (din, hidden), jnp.float32)).astype(bf16),
        "bf":  jnp.zeros((1, hidden), jnp.float32),
        "wgg": (0.1 * jax.random.normal(k2, (dim_text, hidden), jnp.float32)).astype(bf16),
        "bgg": jnp.zeros((1, hidden), jnp.float32),
        "wgb": (0.1 * jax.random.normal(k3, (dim_text, hidden), jnp.float32)).astype(bf16),
        "bgb": jnp.zeros((1, hidden), jnp.float32),
        "wmu": (0.1 * jax.random.normal(k4, (hidden, dim_latent), jnp.float32)).astype(bf16),
        "bmu": jnp.zeros((1, dim_latent), jnp.float32),
        "wlv": (0.1 * jax.random.normal(k5, (hidden, dim_latent), jnp.float32)).astype(bf16),
        "blv": jnp.zeros((1, dim_latent), jnp.float32),
    }


def init_flow(key, dim, cond_dims, cond_names, num_nodes, hidden=64, perm_seed=0):
    """Per-node GLOW coupling params, stacked along a leading node axis.

    First-layer weights are row-split (x part + one part per cond input),
    second-layer weights are column-split into scale/translate, and the
    PermuteRandom permutation is folded into 4 one-hot matrices.
    """
    len1 = dim // 2
    len2 = dim - len1
    ctot = sum(cond_dims)
    rng = np.random.RandomState(perm_seed)
    bf16 = jnp.bfloat16

    names = (["w1x2"] + [n2 for (n2, _) in cond_names]
             + ["b12", "w22s", "w22t", "b22s", "b22t",
                "w1y1"] + [n1 for (_, n1) in cond_names]
             + ["b11", "w21s", "w21t", "b21s", "b21t",
                "paa", "pab", "pba", "pbb"])
    cols = {n: [] for n in names}

    for _ in range(num_nodes):
        key, k1, k2, k3, k4 = jax.random.split(key, 5)
        w1_2 = 0.1 * jax.random.normal(k1, (len2 + ctot, hidden), jnp.float32)
        w2_2 = 0.1 * jax.random.normal(k2, (hidden, 2 * len1), jnp.float32)
        w1_1 = 0.1 * jax.random.normal(k3, (len1 + ctot, hidden), jnp.float32)
        w2_1 = 0.1 * jax.random.normal(k4, (hidden, 2 * len2), jnp.float32)
        perm = rng.permutation(dim)
        P = jnp.asarray(np.eye(dim, dtype=np.float32)[:, perm])   # x_perm = x @ P

        cols["w1x2"].append(w1_2[:len2].astype(bf16))
        off = len2
        for (n2, _), cd in zip(cond_names, cond_dims):
            cols[n2].append(w1_2[off:off + cd].astype(bf16)); off += cd
        cols["b12"].append(jnp.zeros((1, hidden), jnp.float32))
        cols["w22s"].append(w2_2[:, :len1].astype(bf16))
        cols["w22t"].append(w2_2[:, len1:].astype(bf16))
        cols["b22s"].append(jnp.zeros((1, len1), jnp.float32))
        cols["b22t"].append(jnp.zeros((1, len1), jnp.float32))

        cols["w1y1"].append(w1_1[:len1].astype(bf16))
        off = len1
        for (_, n1), cd in zip(cond_names, cond_dims):
            cols[n1].append(w1_1[off:off + cd].astype(bf16)); off += cd
        cols["b11"].append(jnp.zeros((1, hidden), jnp.float32))
        cols["w21s"].append(w2_1[:, :len2].astype(bf16))
        cols["w21t"].append(w2_1[:, len2:].astype(bf16))
        cols["b21s"].append(jnp.zeros((1, len2), jnp.float32))
        cols["b21t"].append(jnp.zeros((1, len2), jnp.float32))

        # permutation kept f32 so the carried flow state is never truncated
        cols["paa"].append(P[:len1, :len1])
        cols["pab"].append(P[:len1, len1:])
        cols["pba"].append(P[len1:, :len1])
        cols["pbb"].append(P[len1:, len1:])

    return {n: jnp.stack(v, axis=0) for n, v in cols.items()}


# --------------------------------- main --------------------------------------

if __name__ == "__main__":
    B = 4
    dim_value, dim_text = 4, 8
    dim_img, img_size = 3, 16
    dim_latent = 16
    num_nodes_img, num_nodes_value = 2, 2

    key = jax.random.PRNGKey(0)
    k_enc, k_iflow, k_vflow, kx, kimg, ktxt, keps = jax.random.split(key, 7)

    l1z = dim_latent // 2
    l2z = dim_latent - l1z
    params = {
        "encoder": init_encoder(k_enc, dim_img, img_size, dim_text, dim_latent),
        "img_flow": init_flow(k_iflow, dim_latent, [dim_text],
                              [("w1t2", "w1t1")], num_nodes_img, perm_seed=1),
        "value_flow": init_flow(k_vflow, dim_value, [dim_text, l1z, l2z],
                                [("w1t2", "w1t1"), ("w1za2", "w1za1"),
                                 ("w1zb2", "w1zb1")],
                                num_nodes_value, perm_seed=2),
    }

    x = jax.random.normal(kx, (B, dim_value), jnp.float32)
    img = jax.random.normal(kimg, (B, dim_img, img_size, img_size), jnp.float32)
    text = jax.random.normal(ktxt, (B, dim_text), jnp.float32)
    # deterministic stand-in for torch.randn_like in reparameterize
    eps = jax.random.normal(keps, (B, dim_latent), jnp.float32)

    fwd = jax.jit(lambda x, img, text, eps:
                  vision_flow_forward(x, img, text, eps, params))
    outs = fwd(x, img, text, eps)
    jax.block_until_ready(outs)

    y, log_det_py, z_mu, z_logvar, z0, z1, log_det_pz = outs
    assert y.shape == (B, dim_value)
    assert z_mu.shape == (B, dim_latent) and z_logvar.shape == (B, dim_latent)
    assert z0.shape == (B, dim_latent) and z1.shape == (B, dim_latent)
    assert log_det_py.shape == (B,) and log_det_pz.shape == (B,)
    assert all(bool(jnp.all(jnp.isfinite(o))) for o in outs)
    print("KERNEL_OK")
</pallas_src>

<mosaic_0001>
module attributes {stable_mosaic.version = 11 : i64} {
  func.func @kernel(%arg0: memref<4x768xf32, #tpu.memory_space<vmem>>, %arg1: memref<4x8xf32, #tpu.memory_space<vmem>>, %arg2: memref<4x4xf32, #tpu.memory_space<vmem>>, %arg3: memref<4x16xf32, #tpu.memory_space<vmem>>, %arg4: memref<768x32xbf16, #tpu.memory_space<vmem>>, %arg5: memref<1x32xf32, #tpu.memory_space<vmem>>, %arg6: memref<8x32xbf16, #tpu.memory_space<vmem>>, %arg7: memref<1x32xf32, #tpu.memory_space<vmem>>, %arg8: memref<8x32xbf16, #tpu.memory_space<vmem>>, %arg9: memref<1x32xf32, #tpu.memory_space<vmem>>, %arg10: memref<32x16xbf16, #tpu.memory_space<vmem>>, %arg11: memref<1x16xf32, #tpu.memory_space<vmem>>, %arg12: memref<32x16xbf16, #tpu.memory_space<vmem>>, %arg13: memref<1x16xf32, #tpu.memory_space<vmem>>, %arg14: memref<2x8x64xbf16, #tpu.memory_space<vmem>>, %arg15: memref<2x8x64xbf16, #tpu.memory_space<vmem>>, %arg16: memref<2x1x64xf32, #tpu.memory_space<vmem>>, %arg17: memref<2x64x8xbf16, #tpu.memory_space<vmem>>, %arg18: memref<2x64x8xbf16, #tpu.memory_space<vmem>>, %arg19: memref<2x1x8xf32, #tpu.memory_space<vmem>>, %arg20: memref<2x1x8xf32, #tpu.memory_space<vmem>>, %arg21: memref<2x8x64xbf16, #tpu.memory_space<vmem>>, %arg22: memref<2x8x64xbf16, #tpu.memory_space<vmem>>, %arg23: memref<2x1x64xf32, #tpu.memory_space<vmem>>, %arg24: memref<2x64x8xbf16, #tpu.memory_space<vmem>>, %arg25: memref<2x64x8xbf16, #tpu.memory_space<vmem>>, %arg26: memref<2x1x8xf32, #tpu.memory_space<vmem>>, %arg27: memref<2x1x8xf32, #tpu.memory_space<vmem>>, %arg28: memref<2x8x8xf32, #tpu.memory_space<vmem>>, %arg29: memref<2x8x8xf32, #tpu.memory_space<vmem>>, %arg30: memref<2x8x8xf32, #tpu.memory_space<vmem>>, %arg31: memref<2x8x8xf32, #tpu.memory_space<vmem>>, %arg32: memref<2x2x64xbf16, #tpu.memory_space<vmem>>, %arg33: memref<2x8x64xbf16, #tpu.memory_space<vmem>>, %arg34: memref<2x8x64xbf16, #tpu.memory_space<vmem>>, %arg35: memref<2x8x64xbf16, #tpu.memory_space<vmem>>, %arg36: memref<2x1x64xf32, #tpu.memory_space<vmem>>, %arg37: memref<2x64x2xbf16, #tpu.memory_space<vmem>>, %arg38: memref<2x64x2xbf16, #tpu.memory_space<vmem>>, %arg39: memref<2x1x2xf32, #tpu.memory_space<vmem>>, %arg40: memref<2x1x2xf32, #tpu.memory_space<vmem>>, %arg41: memref<2x2x64xbf16, #tpu.memory_space<vmem>>, %arg42: memref<2x8x64xbf16, #tpu.memory_space<vmem>>, %arg43: memref<2x8x64xbf16, #tpu.memory_space<vmem>>, %arg44: memref<2x8x64xbf16, #tpu.memory_space<vmem>>, %arg45: memref<2x1x64xf32, #tpu.memory_space<vmem>>, %arg46: memref<2x64x2xbf16, #tpu.memory_space<vmem>>, %arg47: memref<2x64x2xbf16, #tpu.memory_space<vmem>>, %arg48: memref<2x1x2xf32, #tpu.memory_space<vmem>>, %arg49: memref<2x1x2xf32, #tpu.memory_space<vmem>>, %arg50: memref<2x2x2xf32, #tpu.memory_space<vmem>>, %arg51: memref<2x2x2xf32, #tpu.memory_space<vmem>>, %arg52: memref<2x2x2xf32, #tpu.memory_space<vmem>>, %arg53: memref<2x2x2xf32, #tpu.memory_space<vmem>>, %arg54: memref<4x4xf32, #tpu.memory_space<vmem>>, %arg55: memref<4x1xf32, #tpu.memory_space<vmem>>, %arg56: memref<4x16xf32, #tpu.memory_space<vmem>>, %arg57: memref<4x16xf32, #tpu.memory_space<vmem>>, %arg58: memref<4x16xf32, #tpu.memory_space<vmem>>, %arg59: memref<4x16xf32, #tpu.memory_space<vmem>>, %arg60: memref<4x1xf32, #tpu.memory_space<vmem>>) attributes {dimension_semantics = [], scalar_prefetch = 0 : i64, scratch_operands = 0 : i64, tpu.core_type = #tpu.core_type<tc>} {
    %c0 = arith.constant 0 : index
    %c0_0 = arith.constant 0 : index
    %0 = vector.load %arg1[%c0, %c0_0] : memref<4x8xf32, #tpu.memory_space<vmem>>, vector<4x8xf32>
    %1 = arith.truncf %0 : vector<4x8xf32> to vector<4x8xbf16>
    %c0_1 = arith.constant 0 : index
    %c0_2 = arith.constant 0 : index
    %2 = vector.load %arg0[%c0_1, %c0_2] : memref<4x768xf32, #tpu.memory_space<vmem>>, vector<4x768xf32>
    %c0_3 = arith.constant 0 : index
    %c0_4 = arith.constant 0 : index
    %3 = vector.load %arg4[%c0_3, %c0_4] : memref<768x32xbf16, #tpu.memory_space<vmem>>, vector<768x32xbf16>
    %4 = arith.truncf %2 : vector<4x768xf32> to vector<4x768xbf16>
    %cst = arith.constant dense<0.000000e+00> : vector<4x32xf32>
    %5 = tpu.matmul %4, %3, %cst {dimension_numbers = #tpu.dot_dimension_numbers<[1], [0], [0], [1], [0, 0, 1, 1], [], []>} : vector<4x768xbf16>, vector<768x32xbf16>, vector<4x32xf32> -> vector<4x32xf32>
    %c0_5 = arith.constant 0 : index
    %c0_6 = arith.constant 0 : index
    %6 = vector.load %arg5[%c0_5, %c0_6] : memref<1x32xf32, #tpu.memory_space<vmem>>, vector<1x32xf32>
    %7 = vector.broadcast %6 : vector<1x32xf32> to vector<4x32xf32>
    %8 = arith.addf %5, %7 : vector<4x32xf32>
    %cst_7 = arith.constant 0.000000e+00 : f32
    %9 = vector.broadcast %cst_7 : f32 to vector<4x32xf32>
    %10 = arith.maximumf %8, %9 : vector<4x32xf32>
    %c0_8 = arith.constant 0 : index
    %c0_9 = arith.constant 0 : index
    %11 = vector.load %arg6[%c0_8, %c0_9] : memref<8x32xbf16, #tpu.memory_space<vmem>>, vector<8x32xbf16>
    %cst_10 = arith.constant dense<0.000000e+00> : vector<4x32xf32>
    %12 = tpu.matmul %1, %11, %cst_10 {dimension_numbers = #tpu.dot_dimension_numbers<[1], [0], [0], [1], [0, 0, 1, 1], [], []>} : vector<4x8xbf16>, vector<8x32xbf16>, vector<4x32xf32> -> vector<4x32xf32>
    %c0_11 = arith.constant 0 : index
    %c0_12 = arith.constant 0 : index
    %13 = vector.load %arg7[%c0_11, %c0_12] : memref<1x32xf32, #tpu.memory_space<vmem>>, vector<1x32xf32>
    %14 = vector.broadcast %13 : vector<1x32xf32> to vector<4x32xf32>
    %15 = arith.addf %12, %14 : vector<4x32xf32>
    %c0_13 = arith.constant 0 : index
    %c0_14 = arith.constant 0 : index
    %16 = vector.load %arg8[%c0_13, %c0_14] : memref<8x32xbf16, #tpu.memory_space<vmem>>, vector<8x32xbf16>
    %cst_15 = arith.constant dense<0.000000e+00> : vector<4x32xf32>
    %17 = tpu.matmul %1, %16, %cst_15 {dimension_numbers = #tpu.dot_dimension_numbers<[1], [0], [0], [1], [0, 0, 1, 1], [], []>} : vector<4x8xbf16>, vector<8x32xbf16>, vector<4x32xf32> -> vector<4x32xf32>
    %c0_16 = arith.constant 0 : index
    %c0_17 = arith.constant 0 : index
    %18 = vector.load %arg9[%c0_16, %c0_17] : memref<1x32xf32, #tpu.memory_space<vmem>>, vector<1x32xf32>
    %19 = vector.broadcast %18 : vector<1x32xf32> to vector<4x32xf32>
    %20 = arith.addf %17, %19 : vector<4x32xf32>
    %cst_18 = arith.constant 1.000000e+00 : f32
    %21 = vector.broadcast %cst_18 : f32 to vector<4x32xf32>
    %22 = arith.addf %21, %15 : vector<4x32xf32>
    %23 = arith.mulf %10, %22 : vector<4x32xf32>
    %24 = arith.addf %23, %20 : vector<4x32xf32>
    %c0_19 = arith.constant 0 : index
    %c0_20 = arith.constant 0 : index
    %25 = vector.load %arg10[%c0_19, %c0_20] : memref<32x16xbf16, #tpu.memory_space<vmem>>, vector<32x16xbf16>
    %26 = arith.truncf %24 : vector<4x32xf32> to vector<4x32xbf16>
    %cst_21 = arith.constant dense<0.000000e+00> : vector<4x16xf32>
    %27 = tpu.matmul %26, %25, %cst_21 {dimension_numbers = #tpu.dot_dimension_numbers<[1], [0], [0], [1], [0, 0, 1, 1], [], []>} : vector<4x32xbf16>, vector<32x16xbf16>, vector<4x16xf32> -> vector<4x16xf32>
    %c0_22 = arith.constant 0 : index
    %c0_23 = arith.constant 0 : index
    %28 = vector.load %arg11[%c0_22, %c0_23] : memref<1x16xf32, #tpu.memory_space<vmem>>, vector<1x16xf32>
    %29 = vector.broadcast %28 : vector<1x16xf32> to vector<4x16xf32>
    %30 = arith.addf %27, %29 : vector<4x16xf32>
    %c0_24 = arith.constant 0 : index
    %c0_25 = arith.constant 0 : index
    %31 = vector.load %arg12[%c0_24, %c0_25] : memref<32x16xbf16, #tpu.memory_space<vmem>>, vector<32x16xbf16>
    %32 = arith.truncf %24 : vector<4x32xf32> to vector<4x32xbf16>
    %cst_26 = arith.constant dense<0.000000e+00> : vector<4x16xf32>
    %33 = tpu.matmul %32, %31, %cst_26 {dimension_numbers = #tpu.dot_dimension_numbers<[1], [0], [0], [1], [0, 0, 1, 1], [], []>} : vector<4x32xbf16>, vector<32x16xbf16>, vector<4x16xf32> -> vector<4x16xf32>
    %c0_27 = arith.constant 0 : index
    %c0_28 = arith.constant 0 : index
    %34 = vector.load %arg13[%c0_27, %c0_28] : memref<1x16xf32, #tpu.memory_space<vmem>>, vector<1x16xf32>
    %35 = vector.broadcast %34 : vector<1x16xf32> to vector<4x16xf32>
    %36 = arith.addf %33, %35 : vector<4x16xf32>
    %c0_29 = arith.constant 0 : index
    %c0_30 = arith.constant 0 : index
    %37 = vector.load %arg56[%c0_29, %c0_30] : memref<4x16xf32, #tpu.memory_space<vmem>>, vector<4x16xf32>
    tpu.vector_store %arg56[%c0_29, %c0_30], %30 {strides = array<i32>} : memref<4x16xf32, #tpu.memory_space<vmem>>, vector<4x16xf32>,
    %c0_31 = arith.constant 0 : index
    %c0_32 = arith.constant 0 : index
    %38 = vector.load %arg57[%c0_31, %c0_32] : memref<4x16xf32, #tpu.memory_space<vmem>>, vector<4x16xf32>
    tpu.vector_store %arg57[%c0_31, %c0_32], %36 {strides = array<i32>} : memref<4x16xf32, #tpu.memory_space<vmem>>, vector<4x16xf32>,
    %c0_33 = arith.constant 0 : index
    %c0_34 = arith.constant 0 : index
    %39 = vector.load %arg3[%c0_33, %c0_34] : memref<4x16xf32, #tpu.memory_space<vmem>>, vector<4x16xf32>
    %40 = math.exp %36 : vector<4x16xf32>
    %41 = arith.mulf %39, %40 : vector<4x16xf32>
    %42 = arith.addf %41, %30 : vector<4x16xf32>
    %c0_35 = arith.constant 0 : index
    %c0_36 = arith.constant 0 : index
    %43 = vector.load %arg58[%c0_35, %c0_36] : memref<4x16xf32, #tpu.memory_space<vmem>>, vector<4x16xf32>
    tpu.vector_store %arg58[%c0_35, %c0_36], %42 {strides = array<i32>} : memref<4x16xf32, #tpu.memory_space<vmem>>, vector<4x16xf32>,
    %44 = vector.extract_strided_slice %42 {offsets = [0, 0], sizes = [4, 8], strides = [1, 1]} : vector<4x16xf32> to vector<4x8xf32>
    %45 = vector.extract_strided_slice %42 {offsets = [0, 8], sizes = [4, 8], strides = [1, 1]} : vector<4x16xf32> to vector<4x8xf32>
    %cst_37 = arith.constant 0.000000e+00 : f32
    %46 = vector.broadcast %cst_37 : f32 to vector<4x8xf32>
    %cst_38 = arith.constant 0.000000e+00 : f32
    %47 = vector.broadcast %cst_38 : f32 to vector<4x8xf32>
    %c0_39 = arith.constant 0 : index
    %c0_40 = arith.constant 0 : index
    %c0_41 = arith.constant 0 : index
    %48 = vector.load %arg14[%c0_39, %c0_40, %c0_41] : memref<2x8x64xbf16, #tpu.memory_space<vmem>>, vector<1x8x64xbf16>
    %49 = vector.shape_cast %48 : vector<1x8x64xbf16> to vector<8x64xbf16>
    %50 = arith.truncf %45 : vector<4x8xf32> to vector<4x8xbf16>
    %cst_42 = arith.constant dense<0.000000e+00> : vector<4x64xf32>
    %51 = tpu.matmul %50, %49, %cst_42 {dimension_numbers = #tpu.dot_dimension_numbers<[1], [0], [0], [1], [0, 0, 1, 1], [], []>} : vector<4x8xbf16>, vector<8x64xbf16>, vector<4x64xf32> -> vector<4x64xf32>
    %c0_43 = arith.constant 0 : index
    %c0_44 = arith.constant 0 : index
    %c0_45 = arith.constant 0 : index
    %52 = vector.load %arg16[%c0_43, %c0_44, %c0_45] : memref<2x1x64xf32, #tpu.memory_space<vmem>>, vector<1x1x64xf32>
    %53 = vector.shape_cast %52 : vector<1x1x64xf32> to vector<1x64xf32>
    %54 = vector.broadcast %53 : vector<1x64xf32> to vector<4x64xf32>
    %55 = arith.addf %51, %54 : vector<4x64xf32>
    %c0_46 = arith.constant 0 : index
    %c0_47 = arith.constant 0 : index
    %c0_48 = arith.constant 0 : index
    %56 = vector.load %arg15[%c0_46, %c0_47, %c0_48] : memref<2x8x64xbf16, #tpu.memory_space<vmem>>, vector<1x8x64xbf16>
    %57 = vector.shape_cast %56 : vector<1x8x64xbf16> to vector<8x64xbf16>
    %cst_49 = arith.constant dense<0.000000e+00> : vector<4x64xf32>
    %58 = tpu.matmul %1, %57, %cst_49 {dimension_numbers = #tpu.dot_dimension_numbers<[1], [0], [0], [1], [0, 0, 1, 1], [], []>} : vector<4x8xbf16>, vector<8x64xbf16>, vector<4x64xf32> -> vector<4x64xf32>
    %59 = arith.addf %55, %58 : vector<4x64xf32>
    %cst_50 = arith.constant 0.000000e+00 : f32
    %60 = vector.broadcast %cst_50 : f32 to vector<4x64xf32>
    %61 = arith.maximumf %59, %60 : vector<4x64xf32>
    %c0_51 = arith.constant 0 : index
    %c0_52 = arith.constant 0 : index
    %c0_53 = arith.constant 0 : index
    %62 = vector.load %arg17[%c0_51, %c0_52, %c0_53] : memref<2x64x8xbf16, #tpu.memory_space<vmem>>, vector<1x64x8xbf16>
    %63 = vector.shape_cast %62 : vector<1x64x8xbf16> to vector<64x8xbf16>
    %64 = arith.truncf %61 : vector<4x64xf32> to vector<4x64xbf16>
    %cst_54 = arith.constant dense<0.000000e+00> : vector<4x8xf32>
    %65 = tpu.matmul %64, %63, %cst_54 {dimension_numbers = #tpu.dot_dimension_numbers<[1], [0], [0], [1], [0, 0, 1, 1], [], []>} : vector<4x64xbf16>, vector<64x8xbf16>, vector<4x8xf32> -> vector<4x8xf32>
    %c0_55 = arith.constant 0 : index
    %c0_56 = arith.constant 0 : index
    %c0_57 = arith.constant 0 : index
    %66 = vector.load %arg19[%c0_55, %c0_56, %c0_57] : memref<2x1x8xf32, #tpu.memory_space<vmem>>, vector<1x1x8xf32>
    %67 = vector.shape_cast %66 : vector<1x1x8xf32> to vector<1x8xf32>
    %68 = vector.broadcast %67 : vector<1x8xf32> to vector<4x8xf32>
    %69 = arith.addf %65, %68 : vector<4x8xf32>
    %cst_58 = arith.constant 2.500000e+00 : f32
    %70 = vector.broadcast %cst_58 : f32 to vector<4x8xf32>
    %71 = arith.divf %69, %70 : vector<4x8xf32>
    %72 = math.tanh %71 : vector<4x8xf32>
    %cst_59 = arith.constant 2.500000e+00 : f32
    %73 = vector.broadcast %cst_59 : f32 to vector<4x8xf32>
    %74 = arith.mulf %73, %72 : vector<4x8xf32>
    %c0_60 = arith.constant 0 : index
    %c0_61 = arith.constant 0 : index
    %c0_62 = arith.constant 0 : index
    %75 = vector.load %arg18[%c0_60, %c0_61, %c0_62] : memref<2x64x8xbf16, #tpu.memory_space<vmem>>, vector<1x64x8xbf16>
    %76 = vector.shape_cast %75 : vector<1x64x8xbf16> to vector<64x8xbf16>
    %77 = arith.truncf %61 : vector<4x64xf32> to vector<4x64xbf16>
    %cst_63 = arith.constant dense<0.000000e+00> : vector<4x8xf32>
    %78 = tpu.matmul %77, %76, %cst_63 {dimension_numbers = #tpu.dot_dimension_numbers<[1], [0], [0], [1], [0, 0, 1, 1], [], []>} : vector<4x64xbf16>, vector<64x8xbf16>, vector<4x8xf32> -> vector<4x8xf32>
    %c0_64 = arith.constant 0 : index
    %c0_65 = arith.constant 0 : index
    %c0_66 = arith.constant 0 : index
    %79 = vector.load %arg20[%c0_64, %c0_65, %c0_66] : memref<2x1x8xf32, #tpu.memory_space<vmem>>, vector<1x1x8xf32>
    %80 = vector.shape_cast %79 : vector<1x1x8xf32> to vector<1x8xf32>
    %81 = vector.broadcast %80 : vector<1x8xf32> to vector<4x8xf32>
    %82 = arith.addf %78, %81 : vector<4x8xf32>
    %83 = math.exp %74 : vector<4x8xf32>
    %84 = arith.mulf %44, %83 : vector<4x8xf32>
    %85 = arith.addf %84, %82 : vector<4x8xf32>
    %c0_67 = arith.constant 0 : index
    %c0_68 = arith.constant 0 : index
    %c0_69 = arith.constant 0 : index
    %86 = vector.load %arg21[%c0_67, %c0_68, %c0_69] : memref<2x8x64xbf16, #tpu.memory_space<vmem>>, vector<1x8x64xbf16>
    %87 = vector.shape_cast %86 : vector<1x8x64xbf16> to vector<8x64xbf16>
    %88 = arith.truncf %85 : vector<4x8xf32> to vector<4x8xbf16>
    %cst_70 = arith.constant dense<0.000000e+00> : vector<4x64xf32>
    %89 = tpu.matmul %88, %87, %cst_70 {dimension_numbers = #tpu.dot_dimension_numbers<[1], [0], [0], [1], [0, 0, 1, 1], [], []>} : vector<4x8xbf16>, vector<8x64xbf16>, vector<4x64xf32> -> vector<4x64xf32>
    %c0_71 = arith.constant 0 : index
    %c0_72 = arith.constant 0 : index
    %c0_73 = arith.constant 0 : index
    %90 = vector.load %arg23[%c0_71, %c0_72, %c0_73] : memref<2x1x64xf32, #tpu.memory_space<vmem>>, vector<1x1x64xf32>
    %91 = vector.shape_cast %90 : vector<1x1x64xf32> to vector<1x64xf32>
    %92 = vector.broadcast %91 : vector<1x64xf32> to vector<4x64xf32>
    %93 = arith.addf %89, %92 : vector<4x64xf32>
    %c0_74 = arith.constant 0 : index
    %c0_75 = arith.constant 0 : index
    %c0_76 = arith.constant 0 : index
    %94 = vector.load %arg22[%c0_74, %c0_75, %c0_76] : memref<2x8x64xbf16, #tpu.memory_space<vmem>>, vector<1x8x64xbf16>
    %95 = vector.shape_cast %94 : vector<1x8x64xbf16> to vector<8x64xbf16>
    %cst_77 = arith.constant dense<0.000000e+00> : vector<4x64xf32>
    %96 = tpu.matmul %1, %95, %cst_77 {dimension_numbers = #tpu.dot_dimension_numbers<[1], [0], [0], [1], [0, 0, 1, 1], [], []>} : vector<4x8xbf16>, vector<8x64xbf16>, vector<4x64xf32> -> vector<4x64xf32>
    %97 = arith.addf %93, %96 : vector<4x64xf32>
    %cst_78 = arith.constant 0.000000e+00 : f32
    %98 = vector.broadcast %cst_78 : f32 to vector<4x64xf32>
    %99 = arith.maximumf %97, %98 : vector<4x64xf32>
    %c0_79 = arith.constant 0 : index
    %c0_80 = arith.constant 0 : index
    %c0_81 = arith.constant 0 : index
    %100 = vector.load %arg24[%c0_79, %c0_80, %c0_81] : memref<2x64x8xbf16, #tpu.memory_space<vmem>>, vector<1x64x8xbf16>
    %101 = vector.shape_cast %100 : vector<1x64x8xbf16> to vector<64x8xbf16>
    %102 = arith.truncf %99 : vector<4x64xf32> to vector<4x64xbf16>
    %cst_82 = arith.constant dense<0.000000e+00> : vector<4x8xf32>
    %103 = tpu.matmul %102, %101, %cst_82 {dimension_numbers = #tpu.dot_dimension_numbers<[1], [0], [0], [1], [0, 0, 1, 1], [], []>} : vector<4x64xbf16>, vector<64x8xbf16>, vector<4x8xf32> -> vector<4x8xf32>
    %c0_83 = arith.constant 0 : index
    %c0_84 = arith.constant 0 : index
    %c0_85 = arith.constant 0 : index
    %104 = vector.load %arg26[%c0_83, %c0_84, %c0_85] : memref<2x1x8xf32, #tpu.memory_space<vmem>>, vector<1x1x8xf32>
    %105 = vector.shape_cast %104 : vector<1x1x8xf32> to vector<1x8xf32>
    %106 = vector.broadcast %105 : vector<1x8xf32> to vector<4x8xf32>
    %107 = arith.addf %103, %106 : vector<4x8xf32>
    %cst_86 = arith.constant 2.500000e+00 : f32
    %108 = vector.broadcast %cst_86 : f32 to vector<4x8xf32>
    %109 = arith.divf %107, %108 : vector<4x8xf32>
    %110 = math.tanh %109 : vector<4x8xf32>
    %cst_87 = arith.constant 2.500000e+00 : f32
    %111 = vector.broadcast %cst_87 : f32 to vector<4x8xf32>
    %112 = arith.mulf %111, %110 : vector<4x8xf32>
    %c0_88 = arith.constant 0 : index
    %c0_89 = arith.constant 0 : index
    %c0_90 = arith.constant 0 : index
    %113 = vector.load %arg25[%c0_88, %c0_89, %c0_90] : memref<2x64x8xbf16, #tpu.memory_space<vmem>>, vector<1x64x8xbf16>
    %114 = vector.shape_cast %113 : vector<1x64x8xbf16> to vector<64x8xbf16>
    %115 = arith.truncf %99 : vector<4x64xf32> to vector<4x64xbf16>
    %cst_91 = arith.constant dense<0.000000e+00> : vector<4x8xf32>
    %116 = tpu.matmul %115, %114, %cst_91 {dimension_numbers = #tpu.dot_dimension_numbers<[1], [0], [0], [1], [0, 0, 1, 1], [], []>} : vector<4x64xbf16>, vector<64x8xbf16>, vector<4x8xf32> -> vector<4x8xf32>
    %c0_92 = arith.constant 0 : index
    %c0_93 = arith.constant 0 : index
    %c0_94 = arith.constant 0 : index
    %117 = vector.load %arg27[%c0_92, %c0_93, %c0_94] : memref<2x1x8xf32, #tpu.memory_space<vmem>>, vector<1x1x8xf32>
    %118 = vector.shape_cast %117 : vector<1x1x8xf32> to vector<1x8xf32>
    %119 = vector.broadcast %118 : vector<1x8xf32> to vector<4x8xf32>
    %120 = arith.addf %116, %119 : vector<4x8xf32>
    %121 = math.exp %112 : vector<4x8xf32>
    %122 = arith.mulf %45, %121 : vector<4x8xf32>
    %123 = arith.addf %122, %120 : vector<4x8xf32>
    %c0_95 = arith.constant 0 : index
    %c0_96 = arith.constant 0 : index
    %c0_97 = arith.constant 0 : index
    %124 = vector.load %arg28[%c0_95, %c0_96, %c0_97] : memref<2x8x8xf32, #tpu.memory_space<vmem>>, vector<1x8x8xf32>
    %125 = vector.shape_cast %124 : vector<1x8x8xf32> to vector<8x8xf32>
    %cst_98 = arith.constant dense<0.000000e+00> : vector<4x8xf32>
    %126 = tpu.matmul %85, %125, %cst_98 {dimension_numbers = #tpu.dot_dimension_numbers<[1], [0], [0], [1], [0, 0, 1, 1], [], []>} : vector<4x8xf32>, vector<8x8xf32>, vector<4x8xf32> -> vector<4x8xf32>
    %c0_99 = arith.constant 0 : index
    %c0_100 = arith.constant 0 : index
    %c0_101 = arith.constant 0 : index
    %127 = vector.load %arg30[%c0_99, %c0_100, %c0_101] : memref<2x8x8xf32, #tpu.memory_space<vmem>>, vector<1x8x8xf32>
    %128 = vector.shape_cast %127 : vector<1x8x8xf32> to vector<8x8xf32>
    %cst_102 = arith.constant dense<0.000000e+00> : vector<4x8xf32>
    %129 = tpu.matmul %123, %128, %cst_102 {dimension_numbers = #tpu.dot_dimension_numbers<[1], [0], [0], [1], [0, 0, 1, 1], [], []>} : vector<4x8xf32>, vector<8x8xf32>, vector<4x8xf32> -> vector<4x8xf32>
    %130 = arith.addf %126, %129 : vector<4x8xf32>
    %c0_103 = arith.constant 0 : index
    %c0_104 = arith.constant 0 : index
    %c0_105 = arith.constant 0 : index
    %131 = vector.load %arg29[%c0_103, %c0_104, %c0_105] : memref<2x8x8xf32, #tpu.memory_space<vmem>>, vector<1x8x8xf32>
    %132 = vector.shape_cast %131 : vector<1x8x8xf32> to vector<8x8xf32>
    %cst_106 = arith.constant dense<0.000000e+00> : vector<4x8xf32>
    %133 = tpu.matmul %85, %132, %cst_106 {dimension_numbers = #tpu.dot_dimension_numbers<[1], [0], [0], [1], [0, 0, 1, 1], [], []>} : vector<4x8xf32>, vector<8x8xf32>, vector<4x8xf32> -> vector<4x8xf32>
    %c0_107 = arith.constant 0 : index
    %c0_108 = arith.constant 0 : index
    %c0_109 = arith.constant 0 : index
    %134 = vector.load %arg31[%c0_107, %c0_108, %c0_109] : memref<2x8x8xf32, #tpu.memory_space<vmem>>, vector<1x8x8xf32>
    %135 = vector.shape_cast %134 : vector<1x8x8xf32> to vector<8x8xf32>
    %cst_110 = arith.constant dense<0.000000e+00> : vector<4x8xf32>
    %136 = tpu.matmul %123, %135, %cst_110 {dimension_numbers = #tpu.dot_dimension_numbers<[1], [0], [0], [1], [0, 0, 1, 1], [], []>} : vector<4x8xf32>, vector<8x8xf32>, vector<4x8xf32> -> vector<4x8xf32>
    %137 = arith.addf %133, %136 : vector<4x8xf32>
    %138 = arith.addf %46, %74 : vector<4x8xf32>
    %139 = arith.addf %47, %112 : vector<4x8xf32>
    %c1 = arith.constant 1 : index
    %c0_111 = arith.constant 0 : index
    %c0_112 = arith.constant 0 : index
    %140 = vector.load %arg14[%c1, %c0_111, %c0_112] : memref<2x8x64xbf16, #tpu.memory_space<vmem>>, vector<1x8x64xbf16>
    %141 = vector.shape_cast %140 : vector<1x8x64xbf16> to vector<8x64xbf16>
    %142 = arith.truncf %137 : vector<4x8xf32> to vector<4x8xbf16>
    %cst_113 = arith.constant dense<0.000000e+00> : vector<4x64xf32>
    %143 = tpu.matmul %142, %141, %cst_113 {dimension_numbers = #tpu.dot_dimension_numbers<[1], [0], [0], [1], [0, 0, 1, 1], [], []>} : vector<4x8xbf16>, vector<8x64xbf16>, vector<4x64xf32> -> vector<4x64xf32>
    %c1_114 = arith.constant 1 : index
    %c0_115 = arith.constant 0 : index
    %c0_116 = arith.constant 0 : index
    %144 = vector.load %arg16[%c1_114, %c0_115, %c0_116] : memref<2x1x64xf32, #tpu.memory_space<vmem>>, vector<1x1x64xf32>
    %145 = vector.shape_cast %144 : vector<1x1x64xf32> to vector<1x64xf32>
    %146 = vector.broadcast %145 : vector<1x64xf32> to vector<4x64xf32>
    %147 = arith.addf %143, %146 : vector<4x64xf32>
    %c1_117 = arith.constant 1 : index
    %c0_118 = arith.constant 0 : index
    %c0_119 = arith.constant 0 : index
    %148 = vector.load %arg15[%c1_117, %c0_118, %c0_119] : memref<2x8x64xbf16, #tpu.memory_space<vmem>>, vector<1x8x64xbf16>
    %149 = vector.shape_cast %148 : vector<1x8x64xbf16> to vector<8x64xbf16>
    %cst_120 = arith.constant dense<0.000000e+00> : vector<4x64xf32>
    %150 = tpu.matmul %1, %149, %cst_120 {dimension_numbers = #tpu.dot_dimension_numbers<[1], [0], [0], [1], [0, 0, 1, 1], [], []>} : vector<4x8xbf16>, vector<8x64xbf16>, vector<4x64xf32> -> vector<4x64xf32>
    %151 = arith.addf %147, %150 : vector<4x64xf32>
    %cst_121 = arith.constant 0.000000e+00 : f32
    %152 = vector.broadcast %cst_121 : f32 to vector<4x64xf32>
    %153 = arith.maximumf %151, %152 : vector<4x64xf32>
    %c1_122 = arith.constant 1 : index
    %c0_123 = arith.constant 0 : index
    %c0_124 = arith.constant 0 : index
    %154 = vector.load %arg17[%c1_122, %c0_123, %c0_124] : memref<2x64x8xbf16, #tpu.memory_space<vmem>>, vector<1x64x8xbf16>
    %155 = vector.shape_cast %154 : vector<1x64x8xbf16> to vector<64x8xbf16>
    %156 = arith.truncf %153 : vector<4x64xf32> to vector<4x64xbf16>
    %cst_125 = arith.constant dense<0.000000e+00> : vector<4x8xf32>
    %157 = tpu.matmul %156, %155, %cst_125 {dimension_numbers = #tpu.dot_dimension_numbers<[1], [0], [0], [1], [0, 0, 1, 1], [], []>} : vector<4x64xbf16>, vector<64x8xbf16>, vector<4x8xf32> -> vector<4x8xf32>
    %c1_126 = arith.constant 1 : index
    %c0_127 = arith.constant 0 : index
    %c0_128 = arith.constant 0 : index
    %158 = vector.load %arg19[%c1_126, %c0_127, %c0_128] : memref<2x1x8xf32, #tpu.memory_space<vmem>>, vector<1x1x8xf32>
    %159 = vector.shape_cast %158 : vector<1x1x8xf32> to vector<1x8xf32>
    %160 = vector.broadcast %159 : vector<1x8xf32> to vector<4x8xf32>
    %161 = arith.addf %157, %160 : vector<4x8xf32>
    %cst_129 = arith.constant 2.500000e+00 : f32
    %162 = vector.broadcast %cst_129 : f32 to vector<4x8xf32>
    %163 = arith.divf %161, %162 : vector<4x8xf32>
    %164 = math.tanh %163 : vector<4x8xf32>
    %cst_130 = arith.constant 2.500000e+00 : f32
    %165 = vector.broadcast %cst_130 : f32 to vector<4x8xf32>
    %166 = arith.mulf %165, %164 : vector<4x8xf32>
    %c1_131 = arith.constant 1 : index
    %c0_132 = arith.constant 0 : index
    %c0_133 = arith.constant 0 : index
    %167 = vector.load %arg18[%c1_131, %c0_132, %c0_133] : memref<2x64x8xbf16, #tpu.memory_space<vmem>>, vector<1x64x8xbf16>
    %168 = vector.shape_cast %167 : vector<1x64x8xbf16> to vector<64x8xbf16>
    %169 = arith.truncf %153 : vector<4x64xf32> to vector<4x64xbf16>
    %cst_134 = arith.constant dense<0.000000e+00> : vector<4x8xf32>
    %170 = tpu.matmul %169, %168, %cst_134 {dimension_numbers = #tpu.dot_dimension_numbers<[1], [0], [0], [1], [0, 0, 1, 1], [], []>} : vector<4x64xbf16>, vector<64x8xbf16>, vector<4x8xf32> -> vector<4x8xf32>
    %c1_135 = arith.constant 1 : index
    %c0_136 = arith.constant 0 : index
    %c0_137 = arith.constant 0 : index
    %171 = vector.load %arg20[%c1_135, %c0_136, %c0_137] : memref<2x1x8xf32, #tpu.memory_space<vmem>>, vector<1x1x8xf32>
    %172 = vector.shape_cast %171 : vector<1x1x8xf32> to vector<1x8xf32>
    %173 = vector.broadcast %172 : vector<1x8xf32> to vector<4x8xf32>
    %174 = arith.addf %170, %173 : vector<4x8xf32>
    %175 = math.exp %166 : vector<4x8xf32>
    %176 = arith.mulf %130, %175 : vector<4x8xf32>
    %177 = arith.addf %176, %174 : vector<4x8xf32>
    %c1_138 = arith.constant 1 : index
    %c0_139 = arith.constant 0 : index
    %c0_140 = arith.constant 0 : index
    %178 = vector.load %arg21[%c1_138, %c0_139, %c0_140] : memref<2x8x64xbf16, #tpu.memory_space<vmem>>, vector<1x8x64xbf16>
    %179 = vector.shape_cast %178 : vector<1x8x64xbf16> to vector<8x64xbf16>
    %180 = arith.truncf %177 : vector<4x8xf32> to vector<4x8xbf16>
    %cst_141 = arith.constant dense<0.000000e+00> : vector<4x64xf32>
    %181 = tpu.matmul %180, %179, %cst_141 {dimension_numbers = #tpu.dot_dimension_numbers<[1], [0], [0], [1], [0, 0, 1, 1], [], []>} : vector<4x8xbf16>, vector<8x64xbf16>, vector<4x64xf32> -> vector<4x64xf32>
    %c1_142 = arith.constant 1 : index
    %c0_143 = arith.constant 0 : index
    %c0_144 = arith.constant 0 : index
    %182 = vector.load %arg23[%c1_142, %c0_143, %c0_144] : memref<2x1x64xf32, #tpu.memory_space<vmem>>, vector<1x1x64xf32>
    %183 = vector.shape_cast %182 : vector<1x1x64xf32> to vector<1x64xf32>
    %184 = vector.broadcast %183 : vector<1x64xf32> to vector<4x64xf32>
    %185 = arith.addf %181, %184 : vector<4x64xf32>
    %c1_145 = arith.constant 1 : index
    %c0_146 = arith.constant 0 : index
    %c0_147 = arith.constant 0 : index
    %186 = vector.load %arg22[%c1_145, %c0_146, %c0_147] : memref<2x8x64xbf16, #tpu.memory_space<vmem>>, vector<1x8x64xbf16>
    %187 = vector.shape_cast %186 : vector<1x8x64xbf16> to vector<8x64xbf16>
    %cst_148 = arith.constant dense<0.000000e+00> : vector<4x64xf32>
    %188 = tpu.matmul %1, %187, %cst_148 {dimension_numbers = #tpu.dot_dimension_numbers<[1], [0], [0], [1], [0, 0, 1, 1], [], []>} : vector<4x8xbf16>, vector<8x64xbf16>, vector<4x64xf32> -> vector<4x64xf32>
    %189 = arith.addf %185, %188 : vector<4x64xf32>
    %cst_149 = arith.constant 0.000000e+00 : f32
    %190 = vector.broadcast %cst_149 : f32 to vector<4x64xf32>
    %191 = arith.maximumf %189, %190 : vector<4x64xf32>
    %c1_150 = arith.constant 1 : index
    %c0_151 = arith.constant 0 : index
    %c0_152 = arith.constant 0 : index
    %192 = vector.load %arg24[%c1_150, %c0_151, %c0_152] : memref<2x64x8xbf16, #tpu.memory_space<vmem>>, vector<1x64x8xbf16>
    %193 = vector.shape_cast %192 : vector<1x64x8xbf16> to vector<64x8xbf16>
    %194 = arith.truncf %191 : vector<4x64xf32> to vector<4x64xbf16>
    %cst_153 = arith.constant dense<0.000000e+00> : vector<4x8xf32>
    %195 = tpu.matmul %194, %193, %cst_153 {dimension_numbers = #tpu.dot_dimension_numbers<[1], [0], [0], [1], [0, 0, 1, 1], [], []>} : vector<4x64xbf16>, vector<64x8xbf16>, vector<4x8xf32> -> vector<4x8xf32>
    %c1_154 = arith.constant 1 : index
    %c0_155 = arith.constant 0 : index
    %c0_156 = arith.constant 0 : index
    %196 = vector.load %arg26[%c1_154, %c0_155, %c0_156] : memref<2x1x8xf32, #tpu.memory_space<vmem>>, vector<1x1x8xf32>
    %197 = vector.shape_cast %196 : vector<1x1x8xf32> to vector<1x8xf32>
    %198 = vector.broadcast %197 : vector<1x8xf32> to vector<4x8xf32>
    %199 = arith.addf %195, %198 : vector<4x8xf32>
    %cst_157 = arith.constant 2.500000e+00 : f32
    %200 = vector.broadcast %cst_157 : f32 to vector<4x8xf32>
    %201 = arith.divf %199, %200 : vector<4x8xf32>
    %202 = math.tanh %201 : vector<4x8xf32>
    %cst_158 = arith.constant 2.500000e+00 : f32
    %203 = vector.broadcast %cst_158 : f32 to vector<4x8xf32>
    %204 = arith.mulf %203, %202 : vector<4x8xf32>
    %c1_159 = arith.constant 1 : index
    %c0_160 = arith.constant 0 : index
    %c0_161 = arith.constant 0 : index
    %205 = vector.load %arg25[%c1_159, %c0_160, %c0_161] : memref<2x64x8xbf16, #tpu.memory_space<vmem>>, vector<1x64x8xbf16>
    %206 = vector.shape_cast %205 : vector<1x64x8xbf16> to vector<64x8xbf16>
    %207 = arith.truncf %191 : vector<4x64xf32> to vector<4x64xbf16>
    %cst_162 = arith.constant dense<0.000000e+00> : vector<4x8xf32>
    %208 = tpu.matmul %207, %206, %cst_162 {dimension_numbers = #tpu.dot_dimension_numbers<[1], [0], [0], [1], [0, 0, 1, 1], [], []>} : vector<4x64xbf16>, vector<64x8xbf16>, vector<4x8xf32> -> vector<4x8xf32>
    %c1_163 = arith.constant 1 : index
    %c0_164 = arith.constant 0 : index
    %c0_165 = arith.constant 0 : index
    %209 = vector.load %arg27[%c1_163, %c0_164, %c0_165] : memref<2x1x8xf32, #tpu.memory_space<vmem>>, vector<1x1x8xf32>
    %210 = vector.shape_cast %209 : vector<1x1x8xf32> to vector<1x8xf32>
    %211 = vector.broadcast %210 : vector<1x8xf32> to vector<4x8xf32>
    %212 = arith.addf %208, %211 : vector<4x8xf32>
    %213 = math.exp %204 : vector<4x8xf32>
    %214 = arith.mulf %137, %213 : vector<4x8xf32>
    %215 = arith.addf %214, %212 : vector<4x8xf32>
    %c1_166 = arith.constant 1 : index
    %c0_167 = arith.constant 0 : index
    %c0_168 = arith.constant 0 : index
    %216 = vector.load %arg28[%c1_166, %c0_167, %c0_168] : memref<2x8x8xf32, #tpu.memory_space<vmem>>, vector<1x8x8xf32>
    %217 = vector.shape_cast %216 : vector<1x8x8xf32> to vector<8x8xf32>
    %cst_169 = arith.constant dense<0.000000e+00> : vector<4x8xf32>
    %218 = tpu.matmul %177, %217, %cst_169 {dimension_numbers = #tpu.dot_dimension_numbers<[1], [0], [0], [1], [0, 0, 1, 1], [], []>} : vector<4x8xf32>, vector<8x8xf32>, vector<4x8xf32> -> vector<4x8xf32>
    %c1_170 = arith.constant 1 : index
    %c0_171 = arith.constant 0 : index
    %c0_172 = arith.constant 0 : index
    %219 = vector.load %arg30[%c1_170, %c0_171, %c0_172] : memref<2x8x8xf32, #tpu.memory_space<vmem>>, vector<1x8x8xf32>
    %220 = vector.shape_cast %219 : vector<1x8x8xf32> to vector<8x8xf32>
    %cst_173 = arith.constant dense<0.000000e+00> : vector<4x8xf32>
    %221 = tpu.matmul %215, %220, %cst_173 {dimension_numbers = #tpu.dot_dimension_numbers<[1], [0], [0], [1], [0, 0, 1, 1], [], []>} : vector<4x8xf32>, vector<8x8xf32>, vector<4x8xf32> -> vector<4x8xf32>
    %222 = arith.addf %218, %221 : vector<4x8xf32>
    %c1_174 = arith.constant 1 : index
    %c0_175 = arith.constant 0 : index
    %c0_176 = arith.constant 0 : index
    %223 = vector.load %arg29[%c1_174, %c0_175, %c0_176] : memref<2x8x8xf32, #tpu.memory_space<vmem>>, vector<1x8x8xf32>
    %224 = vector.shape_cast %223 : vector<1x8x8xf32> to vector<8x8xf32>
    %cst_177 = arith.constant dense<0.000000e+00> : vector<4x8xf32>
    %225 = tpu.matmul %177, %224, %cst_177 {dimension_numbers = #tpu.dot_dimension_numbers<[1], [0], [0], [1], [0, 0, 1, 1], [], []>} : vector<4x8xf32>, vector<8x8xf32>, vector<4x8xf32> -> vector<4x8xf32>
    %c1_178 = arith.constant 1 : index
    %c0_179 = arith.constant 0 : index
    %c0_180 = arith.constant 0 : index
    %226 = vector.load %arg31[%c1_178, %c0_179, %c0_180] : memref<2x8x8xf32, #tpu.memory_space<vmem>>, vector<1x8x8xf32>
    %227 = vector.shape_cast %226 : vector<1x8x8xf32> to vector<8x8xf32>
    %cst_181 = arith.constant dense<0.000000e+00> : vector<4x8xf32>
    %228 = tpu.matmul %215, %227, %cst_181 {dimension_numbers = #tpu.dot_dimension_numbers<[1], [0], [0], [1], [0, 0, 1, 1], [], []>} : vector<4x8xf32>, vector<8x8xf32>, vector<4x8xf32> -> vector<4x8xf32>
    %229 = arith.addf %225, %228 : vector<4x8xf32>
    %230 = arith.addf %138, %166 : vector<4x8xf32>
    %231 = arith.addf %139, %204 : vector<4x8xf32>
    %232 = tpu.concatenate %222, %229 in 1 : vector<4x8xf32>, vector<4x8xf32> -> vector<4x16xf32>
    %c0_182 = arith.constant 0 : index
    %c0_183 = arith.constant 0 : index
    %233 = vector.load %arg59[%c0_182, %c0_183] : memref<4x16xf32, #tpu.memory_space<vmem>>, vector<4x16xf32>
    tpu.vector_store %arg59[%c0_182, %c0_183], %232 {strides = array<i32>} : memref<4x16xf32, #tpu.memory_space<vmem>>, vector<4x16xf32>,
    %cst_184 = arith.constant dense<0.000000e+00> : vector<4xf32>
    %234 = vector.multi_reduction <add>, %230, %cst_184 [1] : vector<4x8xf32> to vector<4xf32>
    %235 = vector.shape_cast %234 : vector<4xf32> to vector<4x1xf32>
    %cst_185 = arith.constant dense<0.000000e+00> : vector<4xf32>
    %236 = vector.multi_reduction <add>, %231, %cst_185 [1] : vector<4x8xf32> to vector<4xf32>
    %237 = vector.shape_cast %236 : vector<4xf32> to vector<4x1xf32>
    %238 = arith.addf %235, %237 : vector<4x1xf32>
    %c0_186 = arith.constant 0 : index
    %c0_187 = arith.constant 0 : index
    %239 = vector.load %arg60[%c0_186, %c0_187] : memref<4x1xf32, #tpu.memory_space<vmem>>, vector<4x1xf32>
    tpu.vector_store %arg60[%c0_186, %c0_187], %238 {strides = array<i32>} : memref<4x1xf32, #tpu.memory_space<vmem>>, vector<4x1xf32>,
    %c0_188 = arith.constant 0 : index
    %c0_189 = arith.constant 0 : index
    %240 = vector.load %arg2[%c0_188, %c0_189] : memref<4x4xf32, #tpu.memory_space<vmem>>, vector<4x4xf32>
    %241 = vector.extract_strided_slice %240 {offsets = [0, 0], sizes = [4, 2], strides = [1, 1]} : vector<4x4xf32> to vector<4x2xf32>
    %242 = vector.extract_strided_slice %240 {offsets = [0, 2], sizes = [4, 2], strides = [1, 1]} : vector<4x4xf32> to vector<4x2xf32>
    %cst_190 = arith.constant 0.000000e+00 : f32
    %243 = vector.broadcast %cst_190 : f32 to vector<4x2xf32>
    %cst_191 = arith.constant 0.000000e+00 : f32
    %244 = vector.broadcast %cst_191 : f32 to vector<4x2xf32>
    %245 = arith.truncf %222 : vector<4x8xf32> to vector<4x8xbf16>
    %246 = arith.truncf %229 : vector<4x8xf32> to vector<4x8xbf16>
    %c0_192 = arith.constant 0 : index
    %c0_193 = arith.constant 0 : index
    %c0_194 = arith.constant 0 : index
    %247 = vector.load %arg32[%c0_192, %c0_193, %c0_194] : memref<2x2x64xbf16, #tpu.memory_space<vmem>>, vector<1x2x64xbf16>
    %248 = vector.shape_cast %247 : vector<1x2x64xbf16> to vector<2x64xbf16>
    %249 = arith.truncf %242 : vector<4x2xf32> to vector<4x2xbf16>
    %cst_195 = arith.constant dense<0.000000e+00> : vector<4x64xf32>
    %250 = tpu.matmul %249, %248, %cst_195 {dimension_numbers = #tpu.dot_dimension_numbers<[1], [0], [0], [1], [0, 0, 1, 1], [], []>} : vector<4x2xbf16>, vector<2x64xbf16>, vector<4x64xf32> -> vector<4x64xf32>
    %c0_196 = arith.constant 0 : index
    %c0_197 = arith.constant 0 : index
    %c0_198 = arith.constant 0 : index
    %251 = vector.load %arg36[%c0_196, %c0_197, %c0_198] : memref<2x1x64xf32, #tpu.memory_space<vmem>>, vector<1x1x64xf32>
    %252 = vector.shape_cast %251 : vector<1x1x64xf32> to vector<1x64xf32>
    %253 = vector.broadcast %252 : vector<1x64xf32> to vector<4x64xf32>
    %254 = arith.addf %250, %253 : vector<4x64xf32>
    %c0_199 = arith.constant 0 : index
    %c0_200 = arith.constant 0 : index
    %c0_201 = arith.constant 0 : index
    %255 = vector.load %arg33[%c0_199, %c0_200, %c0_201] : memref<2x8x64xbf16, #tpu.memory_space<vmem>>, vector<1x8x64xbf16>
    %256 = vector.shape_cast %255 : vector<1x8x64xbf16> to vector<8x64xbf16>
    %cst_202 = arith.constant dense<0.000000e+00> : vector<4x64xf32>
    %257 = tpu.matmul %1, %256, %cst_202 {dimension_numbers = #tpu.dot_dimension_numbers<[1], [0], [0], [1], [0, 0, 1, 1], [], []>} : vector<4x8xbf16>, vector<8x64xbf16>, vector<4x64xf32> -> vector<4x64xf32>
    %258 = arith.addf %254, %257 : vector<4x64xf32>
    %c0_203 = arith.constant 0 : index
    %c0_204 = arith.constant 0 : index
    %c0_205 = arith.constant 0 : index
    %259 = vector.load %arg34[%c0_203, %c0_204, %c0_205] : memref<2x8x64xbf16, #tpu.memory_space<vmem>>, vector<1x8x64xbf16>
    %260 = vector.shape_cast %259 : vector<1x8x64xbf16> to vector<8x64xbf16>
    %cst_206 = arith.constant dense<0.000000e+00> : vector<4x64xf32>
    %261 = tpu.matmul %245, %260, %cst_206 {dimension_numbers = #tpu.dot_dimension_numbers<[1], [0], [0], [1], [0, 0, 1, 1], [], []>} : vector<4x8xbf16>, vector<8x64xbf16>, vector<4x64xf32> -> vector<4x64xf32>
    %262 = arith.addf %258, %261 : vector<4x64xf32>
    %c0_207 = arith.constant 0 : index
    %c0_208 = arith.constant 0 : index
    %c0_209 = arith.constant 0 : index
    %263 = vector.load %arg35[%c0_207, %c0_208, %c0_209] : memref<2x8x64xbf16, #tpu.memory_space<vmem>>, vector<1x8x64xbf16>
    %264 = vector.shape_cast %263 : vector<1x8x64xbf16> to vector<8x64xbf16>
    %cst_210 = arith.constant dense<0.000000e+00> : vector<4x64xf32>
    %265 = tpu.matmul %246, %264, %cst_210 {dimension_numbers = #tpu.dot_dimension_numbers<[1], [0], [0], [1], [0, 0, 1, 1], [], []>} : vector<4x8xbf16>, vector<8x64xbf16>, vector<4x64xf32> -> vector<4x64xf32>
    %266 = arith.addf %262, %265 : vector<4x64xf32>
    %cst_211 = arith.constant 0.000000e+00 : f32
    %267 = vector.broadcast %cst_211 : f32 to vector<4x64xf32>
    %268 = arith.maximumf %266, %267 : vector<4x64xf32>
    %c0_212 = arith.constant 0 : index
    %c0_213 = arith.constant 0 : index
    %c0_214 = arith.constant 0 : index
    %269 = vector.load %arg37[%c0_212, %c0_213, %c0_214] : memref<2x64x2xbf16, #tpu.memory_space<vmem>>, vector<1x64x2xbf16>
    %270 = vector.shape_cast %269 : vector<1x64x2xbf16> to vector<64x2xbf16>
    %271 = arith.truncf %268 : vector<4x64xf32> to vector<4x64xbf16>
    %cst_215 = arith.constant dense<0.000000e+00> : vector<4x2xf32>
    %272 = tpu.matmul %271, %270, %cst_215 {dimension_numbers = #tpu.dot_dimension_numbers<[1], [0], [0], [1], [0, 0, 1, 1], [], []>} : vector<4x64xbf16>, vector<64x2xbf16>, vector<4x2xf32> -> vector<4x2xf32>
    %c0_216 = arith.constant 0 : index
    %c0_217 = arith.constant 0 : index
    %c0_218 = arith.constant 0 : index
    %273 = vector.load %arg39[%c0_216, %c0_217, %c0_218] : memref<2x1x2xf32, #tpu.memory_space<vmem>>, vector<1x1x2xf32>
    %274 = vector.shape_cast %273 : vector<1x1x2xf32> to vector<1x2xf32>
    %275 = vector.broadcast %274 : vector<1x2xf32> to vector<4x2xf32>
    %276 = arith.addf %272, %275 : vector<4x2xf32>
    %cst_219 = arith.constant 2.500000e+00 : f32
    %277 = vector.broadcast %cst_219 : f32 to vector<4x2xf32>
    %278 = arith.divf %276, %277 : vector<4x2xf32>
    %279 = math.tanh %278 : vector<4x2xf32>
    %cst_220 = arith.constant 2.500000e+00 : f32
    %280 = vector.broadcast %cst_220 : f32 to vector<4x2xf32>
    %281 = arith.mulf %280, %279 : vector<4x2xf32>
    %c0_221 = arith.constant 0 : index
    %c0_222 = arith.constant 0 : index
    %c0_223 = arith.constant 0 : index
    %282 = vector.load %arg38[%c0_221, %c0_222, %c0_223] : memref<2x64x2xbf16, #tpu.memory_space<vmem>>, vector<1x64x2xbf16>
    %283 = vector.shape_cast %282 : vector<1x64x2xbf16> to vector<64x2xbf16>
    %284 = arith.truncf %268 : vector<4x64xf32> to vector<4x64xbf16>
    %cst_224 = arith.constant dense<0.000000e+00> : vector<4x2xf32>
    %285 = tpu.matmul %284, %283, %cst_224 {dimension_numbers = #tpu.dot_dimension_numbers<[1], [0], [0], [1], [0, 0, 1, 1], [], []>} : vector<4x64xbf16>, vector<64x2xbf16>, vector<4x2xf32> -> vector<4x2xf32>
    %c0_225 = arith.constant 0 : index
    %c0_226 = arith.constant 0 : index
    %c0_227 = arith.constant 0 : index
    %286 = vector.load %arg40[%c0_225, %c0_226, %c0_227] : memref<2x1x2xf32, #tpu.memory_space<vmem>>, vector<1x1x2xf32>
    %287 = vector.shape_cast %286 : vector<1x1x2xf32> to vector<1x2xf32>
    %288 = vector.broadcast %287 : vector<1x2xf32> to vector<4x2xf32>
    %289 = arith.addf %285, %288 : vector<4x2xf32>
    %290 = math.exp %281 : vector<4x2xf32>
    %291 = arith.mulf %241, %290 : vector<4x2xf32>
    %292 = arith.addf %291, %289 : vector<4x2xf32>
    %c0_228 = arith.constant 0 : index
    %c0_229 = arith.constant 0 : index
    %c0_230 = arith.constant 0 : index
    %293 = vector.load %arg41[%c0_228, %c0_229, %c0_230] : memref<2x2x64xbf16, #tpu.memory_space<vmem>>, vector<1x2x64xbf16>
    %294 = vector.shape_cast %293 : vector<1x2x64xbf16> to vector<2x64xbf16>
    %295 = arith.truncf %292 : vector<4x2xf32> to vector<4x2xbf16>
    %cst_231 = arith.constant dense<0.000000e+00> : vector<4x64xf32>
    %296 = tpu.matmul %295, %294, %cst_231 {dimension_numbers = #tpu.dot_dimension_numbers<[1], [0], [0], [1], [0, 0, 1, 1], [], []>} : vector<4x2xbf16>, vector<2x64xbf16>, vector<4x64xf32> -> vector<4x64xf32>
    %c0_232 = arith.constant 0 : index
    %c0_233 = arith.constant 0 : index
    %c0_234 = arith.constant 0 : index
    %297 = vector.load %arg45[%c0_232, %c0_233, %c0_234] : memref<2x1x64xf32, #tpu.memory_space<vmem>>, vector<1x1x64xf32>
    %298 = vector.shape_cast %297 : vector<1x1x64xf32> to vector<1x64xf32>
    %299 = vector.broadcast %298 : vector<1x64xf32> to vector<4x64xf32>
    %300 = arith.addf %296, %299 : vector<4x64xf32>
    %c0_235 = arith.constant 0 : index
    %c0_236 = arith.constant 0 : index
    %c0_237 = arith.constant 0 : index
    %301 = vector.load %arg42[%c0_235, %c0_236, %c0_237] : memref<2x8x64xbf16, #tpu.memory_space<vmem>>, vector<1x8x64xbf16>
    %302 = vector.shape_cast %301 : vector<1x8x64xbf16> to vector<8x64xbf16>
    %cst_238 = arith.constant dense<0.000000e+00> : vector<4x64xf32>
    %303 = tpu.matmul %1, %302, %cst_238 {dimension_numbers = #tpu.dot_dimension_numbers<[1], [0], [0], [1], [0, 0, 1, 1], [], []>} : vector<4x8xbf16>, vector<8x64xbf16>, vector<4x64xf32> -> vector<4x64xf32>
    %304 = arith.addf %300, %303 : vector<4x64xf32>
    %c0_239 = arith.constant 0 : index
    %c0_240 = arith.constant 0 : index
    %c0_241 = arith.constant 0 : index
    %305 = vector.load %arg43[%c0_239, %c0_240, %c0_241] : memref<2x8x64xbf16, #tpu.memory_space<vmem>>, vector<1x8x64xbf16>
    %306 = vector.shape_cast %305 : vector<1x8x64xbf16> to vector<8x64xbf16>
    %cst_242 = arith.constant dense<0.000000e+00> : vector<4x64xf32>
    %307 = tpu.matmul %245, %306, %cst_242 {dimension_numbers = #tpu.dot_dimension_numbers<[1], [0], [0], [1], [0, 0, 1, 1], [], []>} : vector<4x8xbf16>, vector<8x64xbf16>, vector<4x64xf32> -> vector<4x64xf32>
    %308 = arith.addf %304, %307 : vector<4x64xf32>
    %c0_243 = arith.constant 0 : index
    %c0_244 = arith.constant 0 : index
    %c0_245 = arith.constant 0 : index
    %309 = vector.load %arg44[%c0_243, %c0_244, %c0_245] : memref<2x8x64xbf16, #tpu.memory_space<vmem>>, vector<1x8x64xbf16>
    %310 = vector.shape_cast %309 : vector<1x8x64xbf16> to vector<8x64xbf16>
    %cst_246 = arith.constant dense<0.000000e+00> : vector<4x64xf32>
    %311 = tpu.matmul %246, %310, %cst_246 {dimension_numbers = #tpu.dot_dimension_numbers<[1], [0], [0], [1], [0, 0, 1, 1], [], []>} : vector<4x8xbf16>, vector<8x64xbf16>, vector<4x64xf32> -> vector<4x64xf32>
    %312 = arith.addf %308, %311 : vector<4x64xf32>
    %cst_247 = arith.constant 0.000000e+00 : f32
    %313 = vector.broadcast %cst_247 : f32 to vector<4x64xf32>
    %314 = arith.maximumf %312, %313 : vector<4x64xf32>
    %c0_248 = arith.constant 0 : index
    %c0_249 = arith.constant 0 : index
    %c0_250 = arith.constant 0 : index
    %315 = vector.load %arg46[%c0_248, %c0_249, %c0_250] : memref<2x64x2xbf16, #tpu.memory_space<vmem>>, vector<1x64x2xbf16>
    %316 = vector.shape_cast %315 : vector<1x64x2xbf16> to vector<64x2xbf16>
    %317 = arith.truncf %314 : vector<4x64xf32> to vector<4x64xbf16>
    %cst_251 = arith.constant dense<0.000000e+00> : vector<4x2xf32>
    %318 = tpu.matmul %317, %316, %cst_251 {dimension_numbers = #tpu.dot_dimension_numbers<[1], [0], [0], [1], [0, 0, 1, 1], [], []>} : vector<4x64xbf16>, vector<64x2xbf16>, vector<4x2xf32> -> vector<4x2xf32>
    %c0_252 = arith.constant 0 : index
    %c0_253 = arith.constant 0 : index
    %c0_254 = arith.constant 0 : index
    %319 = vector.load %arg48[%c0_252, %c0_253, %c0_254] : memref<2x1x2xf32, #tpu.memory_space<vmem>>, vector<1x1x2xf32>
    %320 = vector.shape_cast %319 : vector<1x1x2xf32> to vector<1x2xf32>
    %321 = vector.broadcast %320 : vector<1x2xf32> to vector<4x2xf32>
    %322 = arith.addf %318, %321 : vector<4x2xf32>
    %cst_255 = arith.constant 2.500000e+00 : f32
    %323 = vector.broadcast %cst_255 : f32 to vector<4x2xf32>
    %324 = arith.divf %322, %323 : vector<4x2xf32>
    %325 = math.tanh %324 : vector<4x2xf32>
    %cst_256 = arith.constant 2.500000e+00 : f32
    %326 = vector.broadcast %cst_256 : f32 to vector<4x2xf32>
    %327 = arith.mulf %326, %325 : vector<4x2xf32>
    %c0_257 = arith.constant 0 : index
    %c0_258 = arith.constant 0 : index
    %c0_259 = arith.constant 0 : index
    %328 = vector.load %arg47[%c0_257, %c0_258, %c0_259] : memref<2x64x2xbf16, #tpu.memory_space<vmem>>, vector<1x64x2xbf16>
    %329 = vector.shape_cast %328 : vector<1x64x2xbf16> to vector<64x2xbf16>
    %330 = arith.truncf %314 : vector<4x64xf32> to vector<4x64xbf16>
    %cst_260 = arith.constant dense<0.000000e+00> : vector<4x2xf32>
    %331 = tpu.matmul %330, %329, %cst_260 {dimension_numbers = #tpu.dot_dimension_numbers<[1], [0], [0], [1], [0, 0, 1, 1], [], []>} : vector<4x64xbf16>, vector<64x2xbf16>, vector<4x2xf32> -> vector<4x2xf32>
    %c0_261 = arith.constant 0 : index
    %c0_262 = arith.constant 0 : index
    %c0_263 = arith.constant 0 : index
    %332 = vector.load %arg49[%c0_261, %c0_262, %c0_263] : memref<2x1x2xf32, #tpu.memory_space<vmem>>, vector<1x1x2xf32>
    %333 = vector.shape_cast %332 : vector<1x1x2xf32> to vector<1x2xf32>
    %334 = vector.broadcast %333 : vector<1x2xf32> to vector<4x2xf32>
    %335 = arith.addf %331, %334 : vector<4x2xf32>
    %336 = math.exp %327 : vector<4x2xf32>
    %337 = arith.mulf %242, %336 : vector<4x2xf32>
    %338 = arith.addf %337, %335 : vector<4x2xf32>
    %c0_264 = arith.constant 0 : index
    %c0_265 = arith.constant 0 : index
    %c0_266 = arith.constant 0 : index
    %339 = vector.load %arg50[%c0_264, %c0_265, %c0_266] : memref<2x2x2xf32, #tpu.memory_space<vmem>>, vector<1x2x2xf32>
    %340 = vector.shape_cast %339 : vector<1x2x2xf32> to vector<2x2xf32>
    %cst_267 = arith.constant dense<0.000000e+00> : vector<4x2xf32>
    %341 = tpu.matmul %292, %340, %cst_267 {dimension_numbers = #tpu.dot_dimension_numbers<[1], [0], [0], [1], [0, 0, 1, 1], [], []>} : vector<4x2xf32>, vector<2x2xf32>, vector<4x2xf32> -> vector<4x2xf32>
    %c0_268 = arith.constant 0 : index
    %c0_269 = arith.constant 0 : index
    %c0_270 = arith.constant 0 : index
    %342 = vector.load %arg52[%c0_268, %c0_269, %c0_270] : memref<2x2x2xf32, #tpu.memory_space<vmem>>, vector<1x2x2xf32>
    %343 = vector.shape_cast %342 : vector<1x2x2xf32> to vector<2x2xf32>
    %cst_271 = arith.constant dense<0.000000e+00> : vector<4x2xf32>
    %344 = tpu.matmul %338, %343, %cst_271 {dimension_numbers = #tpu.dot_dimension_numbers<[1], [0], [0], [1], [0, 0, 1, 1], [], []>} : vector<4x2xf32>, vector<2x2xf32>, vector<4x2xf32> -> vector<4x2xf32>
    %345 = arith.addf %341, %344 : vector<4x2xf32>
    %c0_272 = arith.constant 0 : index
    %c0_273 = arith.constant 0 : index
    %c0_274 = arith.constant 0 : index
    %346 = vector.load %arg51[%c0_272, %c0_273, %c0_274] : memref<2x2x2xf32, #tpu.memory_space<vmem>>, vector<1x2x2xf32>
    %347 = vector.shape_cast %346 : vector<1x2x2xf32> to vector<2x2xf32>
    %cst_275 = arith.constant dense<0.000000e+00> : vector<4x2xf32>
    %348 = tpu.matmul %292, %347, %cst_275 {dimension_numbers = #tpu.dot_dimension_numbers<[1], [0], [0], [1], [0, 0, 1, 1], [], []>} : vector<4x2xf32>, vector<2x2xf32>, vector<4x2xf32> -> vector<4x2xf32>
    %c0_276 = arith.constant 0 : index
    %c0_277 = arith.constant 0 : index
    %c0_278 = arith.constant 0 : index
    %349 = vector.load %arg53[%c0_276, %c0_277, %c0_278] : memref<2x2x2xf32, #tpu.memory_space<vmem>>, vector<1x2x2xf32>
    %350 = vector.shape_cast %349 : vector<1x2x2xf32> to vector<2x2xf32>
    %cst_279 = arith.constant dense<0.000000e+00> : vector<4x2xf32>
    %351 = tpu.matmul %338, %350, %cst_279 {dimension_numbers = #tpu.dot_dimension_numbers<[1], [0], [0], [1], [0, 0, 1, 1], [], []>} : vector<4x2xf32>, vector<2x2xf32>, vector<4x2xf32> -> vector<4x2xf32>
    %352 = arith.addf %348, %351 : vector<4x2xf32>
    %353 = arith.addf %243, %281 : vector<4x2xf32>
    %354 = arith.addf %244, %327 : vector<4x2xf32>
    %c1_280 = arith.constant 1 : index
    %c0_281 = arith.constant 0 : index
    %c0_282 = arith.constant 0 : index
    %355 = vector.load %arg32[%c1_280, %c0_281, %c0_282] : memref<2x2x64xbf16, #tpu.memory_space<vmem>>, vector<1x2x64xbf16>
    %356 = vector.shape_cast %355 : vector<1x2x64xbf16> to vector<2x64xbf16>
    %357 = arith.truncf %352 : vector<4x2xf32> to vector<4x2xbf16>
    %cst_283 = arith.constant dense<0.000000e+00> : vector<4x64xf32>
    %358 = tpu.matmul %357, %356, %cst_283 {dimension_numbers = #tpu.dot_dimension_numbers<[1], [0], [0], [1], [0, 0, 1, 1], [], []>} : vector<4x2xbf16>, vector<2x64xbf16>, vector<4x64xf32> -> vector<4x64xf32>
    %c1_284 = arith.constant 1 : index
    %c0_285 = arith.constant 0 : index
    %c0_286 = arith.constant 0 : index
    %359 = vector.load %arg36[%c1_284, %c0_285, %c0_286] : memref<2x1x64xf32, #tpu.memory_space<vmem>>, vector<1x1x64xf32>
    %360 = vector.shape_cast %359 : vector<1x1x64xf32> to vector<1x64xf32>
    %361 = vector.broadcast %360 : vector<1x64xf32> to vector<4x64xf32>
    %362 = arith.addf %358, %361 : vector<4x64xf32>
    %c1_287 = arith.constant 1 : index
    %c0_288 = arith.constant 0 : index
    %c0_289 = arith.constant 0 : index
    %363 = vector.load %arg33[%c1_287, %c0_288, %c0_289] : memref<2x8x64xbf16, #tpu.memory_space<vmem>>, vector<1x8x64xbf16>
    %364 = vector.shape_cast %363 : vector<1x8x64xbf16> to vector<8x64xbf16>
    %cst_290 = arith.constant dense<0.000000e+00> : vector<4x64xf32>
    %365 = tpu.matmul %1, %364, %cst_290 {dimension_numbers = #tpu.dot_dimension_numbers<[1], [0], [0], [1], [0, 0, 1, 1], [], []>} : vector<4x8xbf16>, vector<8x64xbf16>, vector<4x64xf32> -> vector<4x64xf32>
    %366 = arith.addf %362, %365 : vector<4x64xf32>
    %c1_291 = arith.constant 1 : index
    %c0_292 = arith.constant 0 : index
    %c0_293 = arith.constant 0 : index
    %367 = vector.load %arg34[%c1_291, %c0_292, %c0_293] : memref<2x8x64xbf16, #tpu.memory_space<vmem>>, vector<1x8x64xbf16>
    %368 = vector.shape_cast %367 : vector<1x8x64xbf16> to vector<8x64xbf16>
    %cst_294 = arith.constant dense<0.000000e+00> : vector<4x64xf32>
    %369 = tpu.matmul %245, %368, %cst_294 {dimension_numbers = #tpu.dot_dimension_numbers<[1], [0], [0], [1], [0, 0, 1, 1], [], []>} : vector<4x8xbf16>, vector<8x64xbf16>, vector<4x64xf32> -> vector<4x64xf32>
    %370 = arith.addf %366, %369 : vector<4x64xf32>
    %c1_295 = arith.constant 1 : index
    %c0_296 = arith.constant 0 : index
    %c0_297 = arith.constant 0 : index
    %371 = vector.load %arg35[%c1_295, %c0_296, %c0_297] : memref<2x8x64xbf16, #tpu.memory_space<vmem>>, vector<1x8x64xbf16>
    %372 = vector.shape_cast %371 : vector<1x8x64xbf16> to vector<8x64xbf16>
    %cst_298 = arith.constant dense<0.000000e+00> : vector<4x64xf32>
    %373 = tpu.matmul %246, %372, %cst_298 {dimension_numbers = #tpu.dot_dimension_numbers<[1], [0], [0], [1], [0, 0, 1, 1], [], []>} : vector<4x8xbf16>, vector<8x64xbf16>, vector<4x64xf32> -> vector<4x64xf32>
    %374 = arith.addf %370, %373 : vector<4x64xf32>
    %cst_299 = arith.constant 0.000000e+00 : f32
    %375 = vector.broadcast %cst_299 : f32 to vector<4x64xf32>
    %376 = arith.maximumf %374, %375 : vector<4x64xf32>
    %c1_300 = arith.constant 1 : index
    %c0_301 = arith.constant 0 : index
    %c0_302 = arith.constant 0 : index
    %377 = vector.load %arg37[%c1_300, %c0_301, %c0_302] : memref<2x64x2xbf16, #tpu.memory_space<vmem>>, vector<1x64x2xbf16>
    %378 = vector.shape_cast %377 : vector<1x64x2xbf16> to vector<64x2xbf16>
    %379 = arith.truncf %376 : vector<4x64xf32> to vector<4x64xbf16>
    %cst_303 = arith.constant dense<0.000000e+00> : vector<4x2xf32>
    %380 = tpu.matmul %379, %378, %cst_303 {dimension_numbers = #tpu.dot_dimension_numbers<[1], [0], [0], [1], [0, 0, 1, 1], [], []>} : vector<4x64xbf16>, vector<64x2xbf16>, vector<4x2xf32> -> vector<4x2xf32>
    %c1_304 = arith.constant 1 : index
    %c0_305 = arith.constant 0 : index
    %c0_306 = arith.constant 0 : index
    %381 = vector.load %arg39[%c1_304, %c0_305, %c0_306] : memref<2x1x2xf32, #tpu.memory_space<vmem>>, vector<1x1x2xf32>
    %382 = vector.shape_cast %381 : vector<1x1x2xf32> to vector<1x2xf32>
    %383 = vector.broadcast %382 : vector<1x2xf32> to vector<4x2xf32>
    %384 = arith.addf %380, %383 : vector<4x2xf32>
    %cst_307 = arith.constant 2.500000e+00 : f32
    %385 = vector.broadcast %cst_307 : f32 to vector<4x2xf32>
    %386 = arith.divf %384, %385 : vector<4x2xf32>
    %387 = math.tanh %386 : vector<4x2xf32>
    %cst_308 = arith.constant 2.500000e+00 : f32
    %388 = vector.broadcast %cst_308 : f32 to vector<4x2xf32>
    %389 = arith.mulf %388, %387 : vector<4x2xf32>
    %c1_309 = arith.constant 1 : index
    %c0_310 = arith.constant 0 : index
    %c0_311 = arith.constant 0 : index
    %390 = vector.load %arg38[%c1_309, %c0_310, %c0_311] : memref<2x64x2xbf16, #tpu.memory_space<vmem>>, vector<1x64x2xbf16>
    %391 = vector.shape_cast %390 : vector<1x64x2xbf16> to vector<64x2xbf16>
    %392 = arith.truncf %376 : vector<4x64xf32> to vector<4x64xbf16>
    %cst_312 = arith.constant dense<0.000000e+00> : vector<4x2xf32>
    %393 = tpu.matmul %392, %391, %cst_312 {dimension_numbers = #tpu.dot_dimension_numbers<[1], [0], [0], [1], [0, 0, 1, 1], [], []>} : vector<4x64xbf16>, vector<64x2xbf16>, vector<4x2xf32> -> vector<4x2xf32>
    %c1_313 = arith.constant 1 : index
    %c0_314 = arith.constant 0 : index
    %c0_315 = arith.constant 0 : index
    %394 = vector.load %arg40[%c1_313, %c0_314, %c0_315] : memref<2x1x2xf32, #tpu.memory_space<vmem>>, vector<1x1x2xf32>
    %395 = vector.shape_cast %394 : vector<1x1x2xf32> to vector<1x2xf32>
    %396 = vector.broadcast %395 : vector<1x2xf32> to vector<4x2xf32>
    %397 = arith.addf %393, %396 : vector<4x2xf32>
    %398 = math.exp %389 : vector<4x2xf32>
    %399 = arith.mulf %345, %398 : vector<4x2xf32>
    %400 = arith.addf %399, %397 : vector<4x2xf32>
    %c1_316 = arith.constant 1 : index
    %c0_317 = arith.constant 0 : index
    %c0_318 = arith.constant 0 : index
    %401 = vector.load %arg41[%c1_316, %c0_317, %c0_318] : memref<2x2x64xbf16, #tpu.memory_space<vmem>>, vector<1x2x64xbf16>
    %402 = vector.shape_cast %401 : vector<1x2x64xbf16> to vector<2x64xbf16>
    %403 = arith.truncf %400 : vector<4x2xf32> to vector<4x2xbf16>
    %cst_319 = arith.constant dense<0.000000e+00> : vector<4x64xf32>
    %404 = tpu.matmul %403, %402, %cst_319 {dimension_numbers = #tpu.dot_dimension_numbers<[1], [0], [0], [1], [0, 0, 1, 1], [], []>} : vector<4x2xbf16>, vector<2x64xbf16>, vector<4x64xf32> -> vector<4x64xf32>
    %c1_320 = arith.constant 1 : index
    %c0_321 = arith.constant 0 : index
    %c0_322 = arith.constant 0 : index
    %405 = vector.load %arg45[%c1_320, %c0_321, %c0_322] : memref<2x1x64xf32, #tpu.memory_space<vmem>>, vector<1x1x64xf32>
    %406 = vector.shape_cast %405 : vector<1x1x64xf32> to vector<1x64xf32>
    %407 = vector.broadcast %406 : vector<1x64xf32> to vector<4x64xf32>
    %408 = arith.addf %404, %407 : vector<4x64xf32>
    %c1_323 = arith.constant 1 : index
    %c0_324 = arith.constant 0 : index
    %c0_325 = arith.constant 0 : index
    %409 = vector.load %arg42[%c1_323, %c0_324, %c0_325] : memref<2x8x64xbf16, #tpu.memory_space<vmem>>, vector<1x8x64xbf16>
    %410 = vector.shape_cast %409 : vector<1x8x64xbf16> to vector<8x64xbf16>
    %cst_326 = arith.constant dense<0.000000e+00> : vector<4x64xf32>
    %411 = tpu.matmul %1, %410, %cst_326 {dimension_numbers = #tpu.dot_dimension_numbers<[1], [0], [0], [1], [0, 0, 1, 1], [], []>} : vector<4x8xbf16>, vector<8x64xbf16>, vector<4x64xf32> -> vector<4x64xf32>
    %412 = arith.addf %408, %411 : vector<4x64xf32>
    %c1_327 = arith.constant 1 : index
    %c0_328 = arith.constant 0 : index
    %c0_329 = arith.constant 0 : index
    %413 = vector.load %arg43[%c1_327, %c0_328, %c0_329] : memref<2x8x64xbf16, #tpu.memory_space<vmem>>, vector<1x8x64xbf16>
    %414 = vector.shape_cast %413 : vector<1x8x64xbf16> to vector<8x64xbf16>
    %cst_330 = arith.constant dense<0.000000e+00> : vector<4x64xf32>
    %415 = tpu.matmul %245, %414, %cst_330 {dimension_numbers = #tpu.dot_dimension_numbers<[1], [0], [0], [1], [0, 0, 1, 1], [], []>} : vector<4x8xbf16>, vector<8x64xbf16>, vector<4x64xf32> -> vector<4x64xf32>
    %416 = arith.addf %412, %415 : vector<4x64xf32>
    %c1_331 = arith.constant 1 : index
    %c0_332 = arith.constant 0 : index
    %c0_333 = arith.constant 0 : index
    %417 = vector.load %arg44[%c1_331, %c0_332, %c0_333] : memref<2x8x64xbf16, #tpu.memory_space<vmem>>, vector<1x8x64xbf16>
    %418 = vector.shape_cast %417 : vector<1x8x64xbf16> to vector<8x64xbf16>
    %cst_334 = arith.constant dense<0.000000e+00> : vector<4x64xf32>
    %419 = tpu.matmul %246, %418, %cst_334 {dimension_numbers = #tpu.dot_dimension_numbers<[1], [0], [0], [1], [0, 0, 1, 1], [], []>} : vector<4x8xbf16>, vector<8x64xbf16>, vector<4x64xf32> -> vector<4x64xf32>
    %420 = arith.addf %416, %419 : vector<4x64xf32>
    %cst_335 = arith.constant 0.000000e+00 : f32
    %421 = vector.broadcast %cst_335 : f32 to vector<4x64xf32>
    %422 = arith.maximumf %420, %421 : vector<4x64xf32>
    %c1_336 = arith.constant 1 : index
    %c0_337 = arith.constant 0 : index
    %c0_338 = arith.constant 0 : index
    %423 = vector.load %arg46[%c1_336, %c0_337, %c0_338] : memref<2x64x2xbf16, #tpu.memory_space<vmem>>, vector<1x64x2xbf16>
    %424 = vector.shape_cast %423 : vector<1x64x2xbf16> to vector<64x2xbf16>
    %425 = arith.truncf %422 : vector<4x64xf32> to vector<4x64xbf16>
    %cst_339 = arith.constant dense<0.000000e+00> : vector<4x2xf32>
    %426 = tpu.matmul %425, %424, %cst_339 {dimension_numbers = #tpu.dot_dimension_numbers<[1], [0], [0], [1], [0, 0, 1, 1], [], []>} : vector<4x64xbf16>, vector<64x2xbf16>, vector<4x2xf32> -> vector<4x2xf32>
    %c1_340 = arith.constant 1 : index
    %c0_341 = arith.constant 0 : index
    %c0_342 = arith.constant 0 : index
    %427 = vector.load %arg48[%c1_340, %c0_341, %c0_342] : memref<2x1x2xf32, #tpu.memory_space<vmem>>, vector<1x1x2xf32>
    %428 = vector.shape_cast %427 : vector<1x1x2xf32> to vector<1x2xf32>
    %429 = vector.broadcast %428 : vector<1x2xf32> to vector<4x2xf32>
    %430 = arith.addf %426, %429 : vector<4x2xf32>
    %cst_343 = arith.constant 2.500000e+00 : f32
    %431 = vector.broadcast %cst_343 : f32 to vector<4x2xf32>
    %432 = arith.divf %430, %431 : vector<4x2xf32>
    %433 = math.tanh %432 : vector<4x2xf32>
    %cst_344 = arith.constant 2.500000e+00 : f32
    %434 = vector.broadcast %cst_344 : f32 to vector<4x2xf32>
    %435 = arith.mulf %434, %433 : vector<4x2xf32>
    %c1_345 = arith.constant 1 : index
    %c0_346 = arith.constant 0 : index
    %c0_347 = arith.constant 0 : index
    %436 = vector.load %arg47[%c1_345, %c0_346, %c0_347] : memref<2x64x2xbf16, #tpu.memory_space<vmem>>, vector<1x64x2xbf16>
    %437 = vector.shape_cast %436 : vector<1x64x2xbf16> to vector<64x2xbf16>
    %438 = arith.truncf %422 : vector<4x64xf32> to vector<4x64xbf16>
    %cst_348 = arith.constant dense<0.000000e+00> : vector<4x2xf32>
    %439 = tpu.matmul %438, %437, %cst_348 {dimension_numbers = #tpu.dot_dimension_numbers<[1], [0], [0], [1], [0, 0, 1, 1], [], []>} : vector<4x64xbf16>, vector<64x2xbf16>, vector<4x2xf32> -> vector<4x2xf32>
    %c1_349 = arith.constant 1 : index
    %c0_350 = arith.constant 0 : index
    %c0_351 = arith.constant 0 : index
    %440 = vector.load %arg49[%c1_349, %c0_350, %c0_351] : memref<2x1x2xf32, #tpu.memory_space<vmem>>, vector<1x1x2xf32>
    %441 = vector.shape_cast %440 : vector<1x1x2xf32> to vector<1x2xf32>
    %442 = vector.broadcast %441 : vector<1x2xf32> to vector<4x2xf32>
    %443 = arith.addf %439, %442 : vector<4x2xf32>
    %444 = math.exp %435 : vector<4x2xf32>
    %445 = arith.mulf %352, %444 : vector<4x2xf32>
    %446 = arith.addf %445, %443 : vector<4x2xf32>
    %c1_352 = arith.constant 1 : index
    %c0_353 = arith.constant 0 : index
    %c0_354 = arith.constant 0 : index
    %447 = vector.load %arg50[%c1_352, %c0_353, %c0_354] : memref<2x2x2xf32, #tpu.memory_space<vmem>>, vector<1x2x2xf32>
    %448 = vector.shape_cast %447 : vector<1x2x2xf32> to vector<2x2xf32>
    %cst_355 = arith.constant dense<0.000000e+00> : vector<4x2xf32>
    %449 = tpu.matmul %400, %448, %cst_355 {dimension_numbers = #tpu.dot_dimension_numbers<[1], [0], [0], [1], [0, 0, 1, 1], [], []>} : vector<4x2xf32>, vector<2x2xf32>, vector<4x2xf32> -> vector<4x2xf32>
    %c1_356 = arith.constant 1 : index
    %c0_357 = arith.constant 0 : index
    %c0_358 = arith.constant 0 : index
    %450 = vector.load %arg52[%c1_356, %c0_357, %c0_358] : memref<2x2x2xf32, #tpu.memory_space<vmem>>, vector<1x2x2xf32>
    %451 = vector.shape_cast %450 : vector<1x2x2xf32> to vector<2x2xf32>
    %cst_359 = arith.constant dense<0.000000e+00> : vector<4x2xf32>
    %452 = tpu.matmul %446, %451, %cst_359 {dimension_numbers = #tpu.dot_dimension_numbers<[1], [0], [0], [1], [0, 0, 1, 1], [], []>} : vector<4x2xf32>, vector<2x2xf32>, vector<4x2xf32> -> vector<4x2xf32>
    %453 = arith.addf %449, %452 : vector<4x2xf32>
    %c1_360 = arith.constant 1 : index
    %c0_361 = arith.constant 0 : index
    %c0_362 = arith.constant 0 : index
    %454 = vector.load %arg51[%c1_360, %c0_361, %c0_362] : memref<2x2x2xf32, #tpu.memory_space<vmem>>, vector<1x2x2xf32>
    %455 = vector.shape_cast %454 : vector<1x2x2xf32> to vector<2x2xf32>
    %cst_363 = arith.constant dense<0.000000e+00> : vector<4x2xf32>
    %456 = tpu.matmul %400, %455, %cst_363 {dimension_numbers = #tpu.dot_dimension_numbers<[1], [0], [0], [1], [0, 0, 1, 1], [], []>} : vector<4x2xf32>, vector<2x2xf32>, vector<4x2xf32> -> vector<4x2xf32>
    %c1_364 = arith.constant 1 : index
    %c0_365 = arith.constant 0 : index
    %c0_366 = arith.constant 0 : index
    %457 = vector.load %arg53[%c1_364, %c0_365, %c0_366] : memref<2x2x2xf32, #tpu.memory_space<vmem>>, vector<1x2x2xf32>
    %458 = vector.shape_cast %457 : vector<1x2x2xf32> to vector<2x2xf32>
    %cst_367 = arith.constant dense<0.000000e+00> : vector<4x2xf32>
    %459 = tpu.matmul %446, %458, %cst_367 {dimension_numbers = #tpu.dot_dimension_numbers<[1], [0], [0], [1], [0, 0, 1, 1], [], []>} : vector<4x2xf32>, vector<2x2xf32>, vector<4x2xf32> -> vector<4x2xf32>
    %460 = arith.addf %456, %459 : vector<4x2xf32>
    %461 = arith.addf %353, %389 : vector<4x2xf32>
    %462 = arith.addf %354, %435 : vector<4x2xf32>
    %463 = tpu.concatenate %453, %460 in 1 : vector<4x2xf32>, vector<4x2xf32> -> vector<4x4xf32>
    %c0_368 = arith.constant 0 : index
    %c0_369 = arith.constant 0 : index
    %464 = vector.load %arg54[%c0_368, %c0_369] : memref<4x4xf32, #tpu.memory_space<vmem>>, vector<4x4xf32>
    tpu.vector_store %arg54[%c0_368, %c0_369], %463 {strides = array<i32>} : memref<4x4xf32, #tpu.memory_space<vmem>>, vector<4x4xf32>,
    %cst_370 = arith.constant dense<0.000000e+00> : vector<4xf32>
    %465 = vector.multi_reduction <add>, %461, %cst_370 [1] : vector<4x2xf32> to vector<4xf32>
    %466 = vector.shape_cast %465 : vector<4xf32> to vector<4x1xf32>
    %cst_371 = arith.constant dense<0.000000e+00> : vector<4xf32>
    %467 = vector.multi_reduction <add>, %462, %cst_371 [1] : vector<4x2xf32> to vector<4xf32>
    %468 = vector.shape_cast %467 : vector<4xf32> to vector<4x1xf32>
    %469 = arith.addf %466, %468 : vector<4x1xf32>
    %c0_372 = arith.constant 0 : index
    %c0_373 = arith.constant 0 : index
    %470 = vector.load %arg55[%c0_372, %c0_373] : memref<4x1xf32, #tpu.memory_space<vmem>>, vector<4x1xf32>
    tpu.vector_store %arg55[%c0_372, %c0_373], %469 {strides = array<i32>} : memref<4x1xf32, #tpu.memory_space<vmem>>, vector<4x1xf32>,
    return
  }
}

</mosaic_0001>

<bundles_post_ra>
// kernel: _lambda_.1
= control target key start
LH: loop header
LB: loop body
LE: loop exit
PB: predicated region body
PF: predicated region fallthrough
CT: control target
= control target key end

     0   :  { %s7463_s6 = smov 1   ;;  %s7464_s10 = smov 2   ;;  %s8659_s0 = inlined_call_operand.smem [shape: u32[61], index: -1, kind: input, shape index: {}] }
   0x1   :  { %s7577_s5 = sld [smem:[%s8659_s0]]   ;;  %s7465_s14 = smov 3  }
   0x2   :  { %s7582_s9 = sld [smem:[%s8659_s0 + %s7463_s6]]   ;;  %s7466_s18 = smov 4  }
   0x3   :  { %s7587_s13 = sld [smem:[%s8659_s0 + %s7464_s10]]   ;;  %s7467_s22 = smov 5  }
   0x4   :  { %s7592_s17 = sld [smem:[%s8659_s0 + %s7465_s14]]   ;;  %s7468_s26 = smov 6  }
   0x5   :  { %s7597_s21 = sld [smem:[%s8659_s0 + %s7466_s18]]   ;;  %s7469_s30 = smov 7  }
   0x6   :  { %s7602_s25 = sld [smem:[%s8659_s0 + %s7467_s22]]   ;;  %s7470_s4 = smov 8  }
   0x7   :  { %8697 = sst [smem:[#allocation72_spill]] %s7577_s5  ;;  %s7471_s10 = smov 9  }
   0x8   :  { %8698 = sst [smem:[#allocation73_spill]] %s7582_s9  ;;  %s7472_s15 = smov 10  }
   0x9   :  { %s7607_s29 = sld [smem:[%s8659_s0 + %s7468_s26]]   ;;  %s7473_s20 = smov 11  }
   0xa   :  { %8699 = sst [smem:[#allocation74_spill]] %s7592_s17  ;;  %s7474_s26 = smov 12  }
   0xb   :  { %s7612_s3 = sld [smem:[%s8659_s0 + %s7469_s30]]   ;;  %s7475_s1 = smov 13  }
   0xc   :  { %8700 = sst [smem:[#allocation75_spill]] %s7602_s25  ;;  %s7476_s7 = smov 14  }
   0xd   :  { %s7617_s8 = sld [smem:[%s8659_s0 + %s7470_s4]]   ;;  %s7478_s22 = smov 16  }
   0xe   :  { %s7622_s14 = sld [smem:[%s8659_s0 + %s7471_s10]]   ;;  %s7479_s28 = smov 17  }
   0xf   :  { %8701 = sst [smem:[#allocation76_spill]] %s7607_s29 }
  0x10   :  { %s7627_s19 = sld [smem:[%s8659_s0 + %s7472_s15]]   ;;  %s7477_s15 = smov 15  }
  0x11   :  { %8702 = sst [smem:[#allocation77_spill]] %s7612_s3 }
  0x12   :  { %s7632_s24 = sld [smem:[%s8659_s0 + %s7473_s20]]  }
  0x13   :  { %s7637_s30 = sld [smem:[%s8659_s0 + %s7474_s26]]  }
  0x14   :  { %8703 = sst [smem:[#allocation78_spill]] %s7622_s14 }
  0x15   :  { %s7642_s6 = sld [smem:[%s8659_s0 + %s7475_s1]]  }
  0x16   :  { %8704 = sst [smem:[#allocation79_spill]] %s7627_s19 }
  0x17   :  { %s7647_s12 = sld [smem:[%s8659_s0 + %s7476_s7]]   ;;  %s7480_s7 = smov 18  }
  0x18   :  { %8705 = sst [smem:[#allocation80_spill]] %s7632_s24 }
  0x19   :  { %s7652_s20 = sld [smem:[%s8659_s0 + %s7477_s15]]   ;;  %s7481_s15 = smov 19  }
  0x1a   :  { %s7657_s27 = sld [smem:[%s8659_s0 + %s7478_s22]]   ;;  %s7482_s22 = smov 20  }
  0x1b   :  { %8706 = sst [smem:[#allocation81_spill]] %s7642_s6 }
  0x1c   :  { %s7662_s4 = sld [smem:[%s8659_s0 + %s7479_s28]]   ;;  %s7483_s28 = smov 21  }
  0x1d   :  { %8707 = sst [smem:[#allocation82_spill]] %s7647_s12 }
  0x1e   :  { %s7667_s6 = sld [smem:[%s8659_s0 + %s7480_s7]]   ;;  %s7484_s7 = smov 22  }
  0x1f   :  { %s7672_s24 = sld [smem:[%s8659_s0 + %s7481_s15]]   ;;  %s7485_s15 = smov 23  }
  0x20   :  { %8708 = sst [smem:[#allocation83_spill]] %s7657_s27 }
  0x21   :  { %s7677_s27 = sld [smem:[%s8659_s0 + %s7482_s22]]   ;;  %s7486_s22 = smov 24  }
  0x22   :  { %8709 = sst [smem:[#allocation84_spill]] %s7662_s4 }
  0x23   :  { %s7682_s14 = sld [smem:[%s8659_s0 + %s7483_s28]]   ;;  %s7487_s28 = smov 25  }
  0x24   :  { %s7687_s3 = sld [smem:[%s8659_s0 + %s7484_s7]]   ;;  %s7488_s7 = smov 26  }
  0x25   :  { %8710 = sst [smem:[#allocation85_spill]] %s7672_s24 }
  0x26   :  { %s7692_s24 = sld [smem:[%s8659_s0 + %s7485_s15]]   ;;  %s7489_s15 = smov 27  }
  0x27   :  { %8711 = sst [smem:[#allocation86_spill]] %s7677_s27 }
  0x28   :  { %s7697_s27 = sld [smem:[%s8659_s0 + %s7486_s22]]   ;;  %s7490_s22 = smov 28  }
  0x29   :  { %8712 = sst [smem:[#allocation87_spill]] %s7682_s14 }
  0x2a   :  { %s7702_s25 = sld [smem:[%s8659_s0 + %s7487_s28]]   ;;  %s7491_s28 = smov 29  }
  0x2b   :  { %s7707_s5 = sld [smem:[%s8659_s0 + %s7488_s7]]   ;;  %s7492_s7 = smov 30  }
  0x2c   :  { %8713 = sst [smem:[#allocation88_spill]] %s7692_s24 }
  0x2d   :  { %s7712_s24 = sld [smem:[%s8659_s0 + %s7489_s15]]   ;;  %s7493_s15 = smov 31  }
  0x2e   :  { %8714 = sst [smem:[#allocation89_spill]] %s7697_s27 }
  0x2f   :  { %s7717_s27 = sld [smem:[%s8659_s0 + %s7490_s22]]   ;;  %s7494_s22 = smov 32  }
  0x30   :  { %8715 = sst [smem:[#allocation90_spill]] %s7702_s25 }
  0x31   :  { %8716 = sst [smem:[#allocation91_spill]] %s7707_s5 }
  0x32   :  { %s7722_s25 = sld [smem:[%s8659_s0 + %s7491_s28]]   ;;  %s7495_s28 = smov 33  }
  0x33   :  { %8717 = sst [smem:[#allocation92_spill]] %s7712_s24 }
  0x34   :  { %s7727_s5 = sld [smem:[%s8659_s0 + %s7492_s7]]   ;;  %s7496_s7 = smov 34  }
  0x35   :  { %8718 = sst [smem:[#allocation93_spill]] %s7717_s27 }
  0x36   :  { %s7732_s24 = sld [smem:[%s8659_s0 + %s7493_s15]]   ;;  %s7497_s15 = smov 35  }
  0x37   :  { %s7737_s27 = sld [smem:[%s8659_s0 + %s7494_s22]]   ;;  %s7498_s22 = smov 36  }
  0x38   :  { %s7742_s14 = sld [smem:[%s8659_s0 + %s7495_s28]]   ;;  %s7499_s28 = smov 37  }
  0x39   :  { %s7752_s4 = sld [smem:[%s8659_s0 + %s7497_s15]]   ;;  %s7501_s15 = smov 39  }
  0x3a   :  { %8719 = sst [smem:[#allocation94_spill]] %s7727_s5 }
  0x3b   :  { %s7747_s5 = sld [smem:[%s8659_s0 + %s7496_s7]]   ;;  %s7500_s7 = smov 38  }
  0x3c   :  { %s7762_s12 = sld [smem:[%s8659_s0 + %s7499_s28]]   ;;  %s7503_s28 = smov 41  }
  0x3d   :  { %8720 = sst [smem:[#allocation95_spill]] %s7737_s27 }
  0x3e   :  { %s7757_s27 = sld [smem:[%s8659_s0 + %s7498_s22]]   ;;  %s7502_s22 = smov 40  }
  0x3f   :  { %s7772_s19 = sld [smem:[%s8659_s0 + %s7501_s15]]   ;;  %s7505_s15 = smov 43  }
  0x41   :  { %8721 = sst [smem:[#allocation96_spill]] %s7747_s5 }
  0x42   :  { %8723 = sst [smem:[#allocation98_spill]] %s7762_s12 }
  0x43   :  { %s7767_s5 = sld [smem:[%s8659_s0 + %s7500_s7]]   ;;  %s7504_s7 = smov 42  }
  0x44   :  { %8722 = sst [smem:[#allocation97_spill]] %s7757_s27 }
  0x45   :  { %8725 = sst [smem:[#allocation100_spill]] %s7772_s19 }
  0x46   :  { %s7777_s27 = sld [smem:[%s8659_s0 + %s7502_s22]]   ;;  %s7506_s22 = smov 44  }
  0x47   :  { %s7782_s12 = sld [smem:[%s8659_s0 + %s7503_s28]]   ;;  %s7507_s28 = smov 45  }
  0x48   :  { %s7792_s19 = sld [smem:[%s8659_s0 + %s7505_s15]]   ;;  %s7509_s15 = smov 47  }
  0x49   :  { %8724 = sst [smem:[#allocation99_spill]] %s7767_s5 }
  0x4a   :  { %s7787_s5 = sld [smem:[%s8659_s0 + %s7504_s7]]   ;;  %s7508_s7 = smov 46  }
  0x4b   :  { %s7812_s29 = sld [smem:[%s8659_s0 + %s7509_s15]]   ;;  %s7513_s15 = smov 51  }
  0x4c   :  { %8726 = sst [smem:[#allocation101_spill]] %s7777_s27 }
  0x4d   :  { %8727 = sst [smem:[#allocation102_spill]] %s7782_s12 }
  0x4e   :  { %s7797_s27 = sld [smem:[%s8659_s0 + %s7506_s22]]   ;;  %s7510_s22 = smov 48  }
  0x4f   :  { %s7802_s12 = sld [smem:[%s8659_s0 + %s7507_s28]]   ;;  %s7511_s28 = smov 49  }
  0x50   :  { %8728 = sst [smem:[#allocation103_spill]] %s7787_s5 }
  0x51   :  { %s7807_s5 = sld [smem:[%s8659_s0 + %s7508_s7]]   ;;  %s7512_s7 = smov 50  }
  0x52   :  { %8732 = sst [smem:[#allocation107_spill]] %s7812_s29 }
  0x53   :  { %s7832_s29 = sld [smem:[%s8659_s0 + %s7513_s15]]   ;;  %s7517_s15 = smov 55  }
  0x54   :  { %8729 = sst [smem:[#allocation104_spill]] %s7797_s27 }
  0x55   :  { %8730 = sst [smem:[#allocation105_spill]] %s7802_s12 }
  0x56   :  { %s7817_s27 = sld [smem:[%s8659_s0 + %s7510_s22]]   ;;  %s7514_s22 = smov 52  }
  0x57   :  { %8731 = sst [smem:[#allocation106_spill]] %s7807_s5 }
  0x58   :  { %s7822_s12 = sld [smem:[%s8659_s0 + %s7511_s28]]   ;;  %s7515_s28 = smov 53  }
  0x59   :  { %s7827_s5 = sld [smem:[%s8659_s0 + %s7512_s7]]   ;;  %s7516_s7 = smov 54  }
  0x5a   :  { %8735 = sst [smem:[#allocation110_spill]] %s7832_s29 }
  0x5b   :  { %s7847_s17 = sld [smem:[%s8659_s0 + %s7516_s7]]   ;;  %s7520_s7 = smov 58  }
  0x5c   :  { %8733 = sst [smem:[#allocation108_spill]] %s7817_s27 }
  0x5d   :  { %s7837_s27 = sld [smem:[%s8659_s0 + %s7514_s22]]   ;;  %s7518_s22 = smov 56  }
  0x5e   :  { %8734 = sst [smem:[#allocation109_spill]] %s7822_s12 }
  0x5f   :  { %s7842_s12 = sld [smem:[%s8659_s0 + %s7515_s28]]   ;;  %s7519_s28 = smov 57  }
  0x60   :  { %s7852_s29 = sld [smem:[%s8659_s0 + %s7517_s15]]   ;;  %s7521_s15 = smov 59  }
  0x61   :  { %8737 = sst [smem:[#allocation112_spill]] %s7847_s17 }
  0x62   :  { %s7857_s9 = sld [smem:[%s8659_s0 + %s7518_s22]]   ;;  %s7522_s22 = smov 60  }
  0x63   :  { %s7867_s17 = sld [smem:[%s8659_s0 + %s7520_s7]]  }
  0x65   :  { %8736 = sst [smem:[#allocation111_spill]] %s7842_s12 }
  0x66   :  { %8738 = sst [smem:[#allocation113_spill]] %s7852_s29 }
  0x67   :  { %s7862_s12 = sld [smem:[%s8659_s0 + %s7519_s28]]  }
  0x68   :  { %8739 = sst [smem:[#allocation114_spill]] %s7857_s9 }
  0x69   :  { %s7872_s29 = sld [smem:[%s8659_s0 + %s7521_s15]]  }
  0x6a   :  { %s7877_s9 = sld [smem:[%s8659_s0 + %s7522_s22]]  }
  0x6b   :  { %127 = vsyncpa [#allocation3], 0 }
  0x6c   :  { %128 = vsyncpa [#allocation6], 0 }
  0x6d   :  { %129 = vsyncpa [#allocation9], 0 }
  0x6e   :  { %130 = vsyncpa [#allocation12], 0 }
  0x6f   :  { %131 = vsyncpa [#allocation15], 0 }
  0x70   :  { %132 = vsyncpa [#allocation18], 0 }
  0x71   :  { %133 = vsyncpa [#allocation21], 0 }
  0x72   :  { %134 = vsyncpa [#allocation24], 0 }
  0x73   :  { %135 = vsyncpa [#allocation27], 0 }
  0x74   :  { %136 = vsyncpa [#allocation30], 0 }
  0x75   :  { %137 = vsyncpa [#allocation33], 0 }
  0x76   :  { %138 = vsyncpa [#allocation36], 0 }
  0x77   :  { %139 = vsyncpa [#allocation39], 0 }
  0x78   :  { %140 = vsyncpa [#allocation42], 0 }
  0x79   :  { %141 = vsyncpa [#allocation45], 0 }
  0x7a   :  { %142 = vsyncpa [#allocation4], 0 }
  0x7b   :  { %143 = vsyncpa [#allocation49], 0 }
  0x7c   :  { %144 = vsyncpa [#allocation52], 0  ;;  %s7523_s0 = smov [#allocation5]   ;;  %s7524_s1 = smov [#allocation8]  }
  0x7d   :  { %s163_s28 = sshll.u32 %s7523_s0, 4  ;;  %s182_s2 = sshll.u32 %s7524_s1, 4  ;;  %s164_s28 = int_to_ptr.vmem [resolvable:$true] %s163_s28  ;;  %s7879_s2 = int_to_ptr.vmem [resolvable:$true] %s182_s2 }
  0x7e   :  { %s6679_s7 = scalar_lea.hbm %s7587_s13, 64 }
  0x7f   :  { %p6680_p0 = scmp.ne.s32.totalorder %s7587_s13, %s6679_s7  ;;  %p6683_p1 = scmp.lt.u32.totalorder %s6679_s7, %s7587_s13 }
  0x81   :  { %p6685_p2 = pnand %p6683_p1, %p6680_p0 }
  0x83   :  { %6688 = shalt.err (!%p6685_p2)
}
  0x84   :  { %s6689_s10 = scalar_lea.vmem %s164_s28, 64  ;;  %p6694_p4 = scmp.lt.s32.totalorder %s164_s28, %s164_s28 }
  0x85   :  { %p6690_p3 = scmp.ne.s32.totalorder %s164_s28, %s6689_s10  ;;  %p6695_p5 = scmp.lt.s32.totalorder %s6689_s10, %s6689_s10 }
  0x87   :  { %p6696_p6 = por %p6695_p5, %p6694_p4 }
  0x89   :  { %p6697_p7 = pnand %p6696_p6, %p6690_p3 }
  0x8b   :  { %6700 = shalt.err (!%p6697_p7)
}
  0x8c   :  { %166 = dma.hbm_to_vmem [thread:$0]  %s7587_s13, 64, %s164_s28, [#allocation6]  }
  0x8d   :  { %s6701_s11 = scalar_lea.hbm %s7597_s21, 6144 }
  0x8e   :  { %p6702_p8 = scmp.ne.s32.totalorder %s7597_s21, %s6701_s11  ;;  %p6705_p9 = scmp.lt.u32.totalorder %s6701_s11, %s7597_s21 }
  0x90   :  { %p6707_p10 = pnand %p6705_p9, %p6702_p8 }
  0x92   :  { %6710 = shalt.err (!%p6707_p10)
}
  0x93   :  { %s6711_s15 = scalar_lea.vmem %s7879_s2, 6144  ;;  %p6716_p12 = scmp.lt.s32.totalorder %s7879_s2, %s7879_s2 }
  0x94   :  { %p6712_p11 = scmp.ne.s32.totalorder %s7879_s2, %s6711_s15  ;;  %p6717_p13 = scmp.lt.s32.totalorder %s6711_s15, %s6711_s15 }
  0x96   :  { %p6718_p0 = por %p6717_p13, %p6716_p12 }
  0x98   :  { %p6719_p1 = pnand %p6718_p0, %p6712_p11 }
  0x9a   :  { %6722 = shalt.err (!%p6719_p1)
}
  0x9b   :  { %s7525_s16 = smov 64   ;;  %s7526_s13 = smov 4  }
  0x9c   :  { %188 = dma.hbm_to_vmem [thread:$0]  %s7597_s21, 6144, %s7879_s2, [#allocation9], %s7525_s16, %s7525_s16, %s7526_s13  }
  0x9d   :  { %s7527_s18 = smov [#allocation11]   ;;  %s7528_s23 = smov [#allocation14]  }
  0x9e   :  { %s209_s22 = sshll.u32 %s7527_s18, 4  ;;  %s234_s26 = sshll.u32 %s7528_s23, 4  ;;  %s210_s22 = int_to_ptr.vmem [resolvable:$true] %s209_s22  ;;  %s7897_s26 = int_to_ptr.vmem [resolvable:$true] %s234_s26 }
  0x9f   :  { %s6723_s0 = scalar_lea.hbm %s7617_s8, 64 }
  0xa0   :  { %p6724_p2 = scmp.ne.s32.totalorder %s7617_s8, %s6723_s0  ;;  %p6727_p3 = scmp.lt.u32.totalorder %s6723_s0, %s7617_s8 }
  0xa2   :  { %p6729_p4 = pnand %p6727_p3, %p6724_p2 }
  0xa4   :  { %6732 = shalt.err (!%p6729_p4)
}
  0xa5   :  { %s6733_s28 = scalar_lea.vmem %s210_s22, 64  ;;  %p6738_p6 = scmp.lt.s32.totalorder %s210_s22, %s210_s22 }
  0xa6   :  { %p6734_p5 = scmp.ne.s32.totalorder %s210_s22, %s6733_s28  ;;  %p6739_p7 = scmp.lt.s32.totalorder %s6733_s28, %s6733_s28 }
  0xa8   :  { %p6740_p8 = por %p6739_p7, %p6738_p6 }
  0xaa   :  { %p6741_p9 = pnand %p6740_p8, %p6734_p5 }
  0xac   :  { %6744 = shalt.err (!%p6741_p9)
}
  0xad   :  { %212 = dma.hbm_to_vmem [thread:$0]  %s7617_s8, 64, %s210_s22, [#allocation12]  }
  0xae   :  { %s6745_s21 = scalar_lea.hbm %s7637_s30, 256 }
  0xaf   :  { %p6746_p10 = scmp.ne.s32.totalorder %s7637_s30, %s6745_s21  ;;  %p6749_p11 = scmp.lt.u32.totalorder %s6745_s21, %s7637_s30 }
  0xb1   :  { %p6751_p12 = pnand %p6749_p11, %p6746_p10 }
  0xb3   :  { %6754 = shalt.err (!%p6751_p12)
}
  0xb4   :  { %s6755_s1 = scalar_lea.vmem %s7897_s26, 256  ;;  %p6760_p0 = scmp.lt.s32.totalorder %s7897_s26, %s7897_s26 }
  0xb5   :  { %p6756_p13 = scmp.ne.s32.totalorder %s7897_s26, %s6755_s1  ;;  %p6761_p1 = scmp.lt.s32.totalorder %s6755_s1, %s6755_s1 }
  0xb7   :  { %p6762_p2 = por %p6761_p1, %p6760_p0 }
  0xb9   :  { %p6763_p3 = pnand %p6762_p2, %p6756_p13 }
  0xbb   :  { %6766 = shalt.err (!%p6763_p3)
}
  0xbc   :  { %240 = dma.hbm_to_vmem [thread:$0]  %s7637_s30, 256, %s7897_s26, [#allocation15], %s7525_s16, %s7525_s16, %s7526_s13  }
  0xbd   :  { %s7529_s8 = smov [#allocation17]   ;;  %s7530_s7 = smov [#allocation20]  }
  0xbe   :  { %s260_s2 = sshll.u32 %s7529_s8, 4  ;;  %s286_s10 = sshll.u32 %s7530_s7, 4  ;;  %s261_s2 = int_to_ptr.vmem [resolvable:$true] %s260_s2  ;;  %s7915_s10 = int_to_ptr.vmem [resolvable:$true] %s286_s10 }
  0xbf   :  { %s6767_s11 = scalar_lea.hbm %s7652_s20, 128 }
  0xc0   :  { %p6768_p4 = scmp.ne.s32.totalorder %s7652_s20, %s6767_s11  ;;  %p6771_p5 = scmp.lt.u32.totalorder %s6767_s11, %s7652_s20 }
  0xc2   :  { %p6773_p6 = pnand %p6771_p5, %p6768_p4 }
  0xc4   :  { %6776 = shalt.err (!%p6773_p6)
}
  0xc5   :  { %s6777_s15 = scalar_lea.vmem %s261_s2, 128  ;;  %p6782_p8 = scmp.lt.s32.totalorder %s261_s2, %s261_s2 }
  0xc6   :  { %p6778_p7 = scmp.ne.s32.totalorder %s261_s2, %s6777_s15  ;;  %p6783_p9 = scmp.lt.s32.totalorder %s6777_s15, %s6777_s15 }
  0xc8   :  { %p6784_p10 = por %p6783_p9, %p6782_p8 }
  0xca   :  { %p6785_p11 = pnand %p6784_p10, %p6778_p7 }
  0xcc   :  { %6788 = shalt.err (!%p6785_p11)
}
  0xcd   :  { %266 = dma.hbm_to_vmem [thread:$0]  %s7652_s20, 128, %s261_s2, [#allocation18], %s7525_s16, %s7525_s16, %s7526_s13  }
  0xce   :  { %s6789_s30 = scalar_lea.hbm %s7667_s6, 1024 }
  0xcf   :  { %p6790_p12 = scmp.ne.s32.totalorder %s7667_s6, %s6789_s30  ;;  %p6793_p13 = scmp.lt.u32.totalorder %s6789_s30, %s7667_s6 }
  0xd1   :  { %p6795_p0 = pnand %p6793_p13, %p6790_p12 }
  0xd3   :  { %6798 = shalt.err (!%p6795_p0)
}
  0xd4   :  { %s6799_s18 = scalar_lea.vmem %s7915_s10, 1024  ;;  %p6804_p2 = scmp.lt.s32.totalorder %s7915_s10, %s7915_s10 }
  0xd5   :  { %p6800_p1 = scmp.ne.s32.totalorder %s7915_s10, %s6799_s18  ;;  %p6805_p3 = scmp.lt.s32.totalorder %s6799_s18, %s6799_s18 }
  0xd7   :  { %p6806_p4 = por %p6805_p3, %p6804_p2 }
  0xd9   :  { %p6807_p5 = pnand %p6806_p4, %p6800_p1 }
  0xdb   :  { %6810 = shalt.err (!%p6807_p5)
}
  0xdc   :  { %292 = dma.hbm_to_vmem [thread:$0]  %s7667_s6, 1024, %s7915_s10, [#allocation21], %s7525_s16, %s7525_s16, %s7526_s13  }
  0xdd   :  { %s7531_s20 = smov [#allocation23]   ;;  %s6811_s23 = scalar_lea.hbm %s7687_s3, 128 }
  0xde   :  { %s314_s22 = sshll.u32 %s7531_s20, 4  ;;  %p6812_p6 = scmp.ne.s32.totalorder %s7687_s3, %s6811_s23  ;;  %s315_s22 = int_to_ptr.vmem [resolvable:$true] %s314_s22 }
  0xdf   :  { %p6815_p7 = scmp.lt.u32.totalorder %s6811_s23, %s7687_s3 }
  0xe1   :  { %p6817_p8 = pnand %p6815_p7, %p6812_p6 }
  0xe3   :  { %6820 = shalt.err (!%p6817_p8)
}
  0xe4   :  { %s6821_s26 = scalar_lea.vmem %s315_s22, 128  ;;  %p6826_p10 = scmp.lt.s32.totalorder %s315_s22, %s315_s22 }
  0xe5   :  { %p6822_p9 = scmp.ne.s32.totalorder %s315_s22, %s6821_s26  ;;  %p6827_p11 = scmp.lt.s32.totalorder %s6821_s26, %s6821_s26 }
  0xe7   :  { %p6828_p12 = por %p6827_p11, %p6826_p10 }
  0xe9   :  { %p6829_p13 = pnand %p6828_p12, %p6822_p9 }
  0xeb   :  { %6832 = shalt.err (!%p6829_p13)
}
  0xec   :  { %320 = dma.hbm_to_vmem [thread:$0]  %s7687_s3, 128, %s315_s22, [#allocation24], %s7525_s16, %s7525_s16, %s7526_s13  }
  0xed   :  { %s7532_s6 = smov [#allocation26]   ;;  %s7533_s28 = smov [#allocation29]  }
  0xee   :  { %s348_s0 = sshll.u32 %s7532_s6, 4  ;;  %s372_s21 = sshll.u32 %s7533_s28, 4  ;;  %s349_s0 = int_to_ptr.vmem [resolvable:$true] %s348_s0  ;;  %s373_s21 = int_to_ptr.vmem [resolvable:$true] %s372_s21 }
  0xef   :  { %s6833_s1 = scalar_lea.hbm %s7722_s25, 256 }
  0xf0   :  { %p6834_p0 = scmp.ne.s32.totalorder %s7722_s25, %s6833_s1  ;;  %p6837_p1 = scmp.lt.u32.totalorder %s6833_s1, %s7722_s25 }
  0xf2   :  { %p6839_p2 = pnand %p6837_p1, %p6834_p0 }
  0xf4   :  { %6842 = shalt.err (!%p6839_p2)
}
  0xf5   :  { %s6843_s8 = scalar_lea.vmem %s349_s0, 256  ;;  %p6848_p4 = scmp.lt.s32.totalorder %s349_s0, %s349_s0 }
  0xf6   :  { %p6844_p3 = scmp.ne.s32.totalorder %s349_s0, %s6843_s8  ;;  %p6849_p5 = scmp.lt.s32.totalorder %s6843_s8, %s6843_s8 }
  0xf8   :  { %p6850_p6 = por %p6849_p5, %p6848_p4 }
  0xfa   :  { %p6851_p7 = pnand %p6850_p6, %p6844_p3 }
  0xfc   :  { %6854 = shalt.err (!%p6851_p7)
}
  0xfd   :  { %s7534_s2 = smov 128   ;;  %s7535_s3 = smov 8  }
  0xfe   :  { %354 = dma.hbm_to_vmem [thread:$0]  %s7722_s25, 256, %s349_s0, [#allocation27], %s7534_s2, %s7534_s2, %s7535_s3  }
  0xff   :  { %s6855_s7 = scalar_lea.hbm %s7732_s24, 256 }
 0x100   :  { %p6856_p8 = scmp.ne.s32.totalorder %s7732_s24, %s6855_s7  ;;  %p6859_p9 = scmp.lt.u32.totalorder %s6855_s7, %s7732_s24 }
 0x102   :  { %p6861_p10 = pnand %p6859_p9, %p6856_p8 }
 0x104   :  { %6864 = shalt.err (!%p6861_p10)
}
 0x105   :  { %s6865_s10 = scalar_lea.vmem %s373_s21, 256  ;;  %p6870_p12 = scmp.lt.s32.totalorder %s373_s21, %s373_s21 }
 0x106   :  { %p6866_p11 = scmp.ne.s32.totalorder %s373_s21, %s6865_s10  ;;  %p6871_p13 = scmp.lt.s32.totalorder %s6865_s10, %s6865_s10 }
 0x108   :  { %p6872_p0 = por %p6871_p13, %p6870_p12 }
 0x10a   :  { %p6873_p1 = pnand %p6872_p0, %p6866_p11 }
 0x10c   :  { %6876 = shalt.err (!%p6873_p1)
}
 0x10d   :  { %378 = dma.hbm_to_vmem [thread:$0]  %s7732_s24, 256, %s373_s21, [#allocation30], %s7534_s2, %s7534_s2, %s7535_s3  }
 0x10e   :  { %s7536_s25 = smov [#allocation32]   ;;  %s7537_s15 = smov [#allocation35]  }
 0x10f   :  { %s396_s11 = sshll.u32 %s7536_s25, 4  ;;  %s420_s30 = sshll.u32 %s7537_s15, 4  ;;  %s397_s11 = int_to_ptr.vmem [resolvable:$true] %s396_s11  ;;  %s421_s30 = int_to_ptr.vmem [resolvable:$true] %s420_s30 }
 0x110   :  { %s6877_s18 = scalar_lea.hbm %s7742_s14, 128 }
 0x111   :  { %p6878_p2 = scmp.ne.s32.totalorder %s7742_s14, %s6877_s18  ;;  %p6881_p3 = scmp.lt.u32.totalorder %s6877_s18, %s7742_s14 }
 0x113   :  { %p6883_p4 = pnand %p6881_p3, %p6878_p2 }
 0x115   :  { %6886 = shalt.err (!%p6883_p4)
}
 0x116   :  { %s6887_s20 = scalar_lea.vmem %s397_s11, 128  ;;  %p6892_p6 = scmp.lt.s32.totalorder %s397_s11, %s397_s11 }
 0x117   :  { %p6888_p5 = scmp.ne.s32.totalorder %s397_s11, %s6887_s20  ;;  %p6893_p7 = scmp.lt.s32.totalorder %s6887_s20, %s6887_s20 }
 0x119   :  { %p6894_p8 = por %p6893_p7, %p6892_p6 }
 0x11b   :  { %p6895_p9 = pnand %p6894_p8, %p6888_p5 }
 0x11d   :  { %6898 = shalt.err (!%p6895_p9)
}
 0x11e   :  { %402 = dma.hbm_to_vmem [thread:$0]  %s7742_s14, 128, %s397_s11, [#allocation33], %s7525_s16, %s7525_s16, %s7526_s13  }
 0x11f   :  { %s6899_s24 = scalar_lea.hbm %s7752_s4, 128 }
 0x120   :  { %p6900_p10 = scmp.ne.s32.totalorder %s7752_s4, %s6899_s24  ;;  %p6903_p11 = scmp.lt.u32.totalorder %s6899_s24, %s7752_s4 }
 0x122   :  { %p6905_p12 = pnand %p6903_p11, %p6900_p10 }
 0x124   :  { %6908 = shalt.err (!%p6905_p12)
}
 0x125   :  { %s6909_s22 = scalar_lea.vmem %s421_s30, 128  ;;  %p6914_p0 = scmp.lt.s32.totalorder %s421_s30, %s421_s30 }
 0x126   :  { %p6910_p13 = scmp.ne.s32.totalorder %s421_s30, %s6909_s22  ;;  %p6915_p1 = scmp.lt.s32.totalorder %s6909_s22, %s6909_s22 }
 0x128   :  { %p6916_p2 = por %p6915_p1, %p6914_p0 }
 0x12a   :  { %p6917_p3 = pnand %p6916_p2, %p6910_p13 }
 0x12c   :  { %6920 = shalt.err (!%p6917_p3)
}
 0x12d   :  { %426 = dma.hbm_to_vmem [thread:$0]  %s7752_s4, 128, %s421_s30, [#allocation36], %s7525_s16, %s7525_s16, %s7526_s13  }
 0x12e   :  { %s7538_s14 = smov [#allocation38]   ;;  %s7539_s26 = smov [#allocation41]  }
 0x12f   :  { %s456_s23 = sshll.u32 %s7538_s14, 4  ;;  %s490_s6 = sshll.u32 %s7539_s26, 4  ;;  %s457_s23 = int_to_ptr.vmem [resolvable:$true] %s456_s23  ;;  %s491_s6 = int_to_ptr.vmem [resolvable:$true] %s490_s6 }
 0x130   :  { %s6921_s0 = scalar_lea.hbm %s7792_s19, 128 }
 0x131   :  { %p6922_p4 = scmp.ne.s32.totalorder %s7792_s19, %s6921_s0  ;;  %p6925_p5 = scmp.lt.u32.totalorder %s6921_s0, %s7792_s19 }
 0x133   :  { %p6927_p6 = pnand %p6925_p5, %p6922_p4 }
 0x135   :  { %6930 = shalt.err (!%p6927_p6)
}
 0x136   :  { %s6931_s28 = scalar_lea.vmem %s457_s23, 128  ;;  %p6936_p8 = scmp.lt.s32.totalorder %s457_s23, %s457_s23 }
 0x137   :  { %p6932_p7 = scmp.ne.s32.totalorder %s457_s23, %s6931_s28  ;;  %p6937_p9 = scmp.lt.s32.totalorder %s6931_s28, %s6931_s28 }
 0x139   :  { %p6938_p10 = por %p6937_p9, %p6936_p8 }
 0x13b   :  { %p6939_p11 = pnand %p6938_p10, %p6932_p7 }
 0x13d   :  { %6942 = shalt.err (!%p6939_p11)
}
 0x13e   :  { %462 = dma.hbm_to_vmem [thread:$0]  %s7792_s19, 128, %s457_s23, [#allocation39], %s7525_s16, %s7525_s16, %s7526_s13  }
 0x13f   :  { %s6943_s4 = scalar_lea.hbm %s7827_s5, 64 }
 0x140   :  { %p6944_p12 = scmp.ne.s32.totalorder %s7827_s5, %s6943_s4  ;;  %p6947_p13 = scmp.lt.u32.totalorder %s6943_s4, %s7827_s5 }
 0x142   :  { %p6949_p0 = pnand %p6947_p13, %p6944_p12 }
 0x144   :  { %6952 = shalt.err (!%p6949_p0)
}
 0x145   :  { %s6953_s21 = scalar_lea.vmem %s491_s6, 64  ;;  %p6958_p2 = scmp.lt.s32.totalorder %s491_s6, %s491_s6 }
 0x146   :  { %p6954_p1 = scmp.ne.s32.totalorder %s491_s6, %s6953_s21  ;;  %p6959_p3 = scmp.lt.s32.totalorder %s6953_s21, %s6953_s21 }
 0x148   :  { %p6960_p4 = por %p6959_p3, %p6958_p2 }
 0x14a   :  { %p6961_p5 = pnand %p6960_p4, %p6954_p1 }
 0x14c   :  { %6964 = shalt.err (!%p6961_p5)
}
 0x14d   :  { %s7540_s1 = smov 32   ;;  %s7541_s8 = smov 2  }
 0x14e   :  { %496 = dma.hbm_to_vmem [thread:$0]  %s7827_s5, 64, %s491_s6, [#allocation42], %s7540_s1, %s7540_s1, %s7541_s8  }
 0x14f   :  { %s7542_s19 = smov [#allocation44]   ;;  %s7543_s10 = smov [#allocation2]  }
 0x150   :  { %s514_s7 = sshll.u32 %s7542_s19, 4  ;;  %s153_s25 = sshll.u32 %s7543_s10, 4  ;;  %s515_s7 = int_to_ptr.vmem [resolvable:$true] %s514_s7  ;;  %s154_s25 = int_to_ptr.vmem [resolvable:$true] %s153_s25 }
 0x151   :  { %s6965_s11 = scalar_lea.hbm %s7837_s27, 64 }
 0x152   :  { %p6966_p6 = scmp.ne.s32.totalorder %s7837_s27, %s6965_s11  ;;  %p6969_p7 = scmp.lt.u32.totalorder %s6965_s11, %s7837_s27 }
 0x154   :  { %p6971_p8 = pnand %p6969_p7, %p6966_p6 }
 0x156   :  { %6974 = shalt.err (!%p6971_p8)
}
 0x157   :  { %s6975_s15 = scalar_lea.vmem %s515_s7, 64  ;;  %p6980_p10 = scmp.lt.s32.totalorder %s515_s7, %s515_s7 }
 0x158   :  { %p6976_p9 = scmp.ne.s32.totalorder %s515_s7, %s6975_s15  ;;  %p6981_p11 = scmp.lt.s32.totalorder %s6975_s15, %s6975_s15 }
 0x15a   :  { %p6982_p12 = por %p6981_p11, %p6980_p10 }
 0x15c   :  { %p6983_p13 = pnand %p6982_p12, %p6976_p9 }
 0x15e   :  { %6986 = shalt.err (!%p6983_p13)
}
 0x15f   :  { %s8740_s5 = sld [smem:[#allocation73_spill]] }
 0x160   :  { %520 = dma.hbm_to_vmem [thread:$0]  %s7837_s27, 64, %s515_s7, [#allocation45], %s7540_s1, %s7540_s1, %s7541_s8  }
 0x165   :  { %s6987_s30 = scalar_lea.hbm %s8740_s5, 64 }
 0x166   :  { %p6988_p0 = scmp.ne.s32.totalorder %s8740_s5, %s6987_s30  ;;  %p6991_p1 = scmp.lt.u32.totalorder %s6987_s30, %s8740_s5 }
 0x168   :  { %p6993_p2 = pnand %p6991_p1, %p6988_p0 }
 0x16a   :  { %6996 = shalt.err (!%p6993_p2)
}
 0x16b   :  { %s6997_s18 = scalar_lea.vmem %s154_s25, 64  ;;  %p7002_p4 = scmp.lt.s32.totalorder %s154_s25, %s154_s25 }
 0x16c   :  { %p6998_p3 = scmp.ne.s32.totalorder %s154_s25, %s6997_s18  ;;  %p7003_p5 = scmp.lt.s32.totalorder %s6997_s18, %s6997_s18 }
 0x16e   :  { %p7004_p6 = por %p7003_p5, %p7002_p4 }
 0x170   :  { %p7005_p7 = pnand %p7004_p6, %p6998_p3 }
 0x172   :  { %7008 = shalt.err (!%p7005_p7)
}
 0x173   :  { %s8741_s20 = sld [smem:[#allocation74_spill]]  ;;  %s7544_s24 = smov [#allocation7]  }
 0x174   :  { %156 = dma.hbm_to_vmem [thread:$0]  %s8740_s5, 64, %s154_s25, [#allocation3]  }
 0x175   :  { %s173_s27 = sshll.u32 %s7544_s24, 4  ;;  %s7545_s22 = smov [#allocation10]   ;;  %s174_s27 = int_to_ptr.vmem [resolvable:$true] %s173_s27 }
 0x176   :  { %s197_s14 = sshll.u32 %s7545_s22, 4  ;;  %s198_s14 = int_to_ptr.vmem [resolvable:$true] %s197_s14 }
 0x179   :  { %s7009_s23 = scalar_lea.hbm %s8741_s20, 64 }
 0x17a   :  { %p7010_p8 = scmp.ne.s32.totalorder %s8741_s20, %s7009_s23  ;;  %p7013_p9 = scmp.lt.u32.totalorder %s7009_s23, %s8741_s20 }
 0x17c   :  { %p7015_p10 = pnand %p7013_p9, %p7010_p8 }
 0x17e   :  { %7018 = shalt.err (!%p7015_p10)
}
 0x17f   :  { %s7019_s26 = scalar_lea.vmem %s174_s27, 64  ;;  %p7024_p12 = scmp.lt.s32.totalorder %s174_s27, %s174_s27 }
 0x180   :  { %p7020_p11 = scmp.ne.s32.totalorder %s174_s27, %s7019_s26  ;;  %p7025_p13 = scmp.lt.s32.totalorder %s7019_s26, %s7019_s26 }
 0x182   :  { %p7026_p0 = por %p7025_p13, %p7024_p12 }
 0x184   :  { %p7027_p1 = pnand %p7026_p0, %p7020_p11 }
 0x186   :  { %7030 = shalt.err (!%p7027_p1)
}
 0x187   :  { %s8742_s6 = sld [smem:[#allocation76_spill]] }
 0x188   :  { %176 = dma.hbm_to_vmem [thread:$0]  %s8741_s20, 64, %s174_s27, [#allocation6]  }
 0x18d   :  { %s7031_s0 = scalar_lea.hbm %s8742_s6, 64 }
 0x18e   :  { %p7032_p2 = scmp.ne.s32.totalorder %s8742_s6, %s7031_s0  ;;  %p7035_p3 = scmp.lt.u32.totalorder %s7031_s0, %s8742_s6 }
 0x190   :  { %p7037_p4 = pnand %p7035_p3, %p7032_p2 }
 0x192   :  { %7040 = shalt.err (!%p7037_p4)
}
 0x193   :  { %s7041_s28 = scalar_lea.vmem %s198_s14, 64  ;;  %p7046_p6 = scmp.lt.s32.totalorder %s198_s14, %s198_s14 }
 0x194   :  { %p7042_p5 = scmp.ne.s32.totalorder %s198_s14, %s7041_s28  ;;  %p7047_p7 = scmp.lt.s32.totalorder %s7041_s28, %s7041_s28 }
 0x196   :  { %p7048_p8 = por %p7047_p7, %p7046_p6 }
 0x198   :  { %p7049_p9 = pnand %p7048_p8, %p7042_p5 }
 0x19a   :  { %7052 = shalt.err (!%p7049_p9)
}
 0x19b   :  { %s8743_s4 = sld [smem:[#allocation79_spill]]  ;;  %s7546_s21 = smov [#allocation13]  }
 0x19c   :  { %200 = dma.hbm_to_vmem [thread:$0]  %s8742_s6, 64, %s198_s14, [#allocation9]  }
 0x19d   :  { %s220_s19 = sshll.u32 %s7546_s21, 4  ;;  %s7547_s7 = smov [#allocation16]   ;;  %s221_s19 = int_to_ptr.vmem [resolvable:$true] %s220_s19 }
 0x19e   :  { %s248_s10 = sshll.u32 %s7547_s7, 4  ;;  %s249_s10 = int_to_ptr.vmem [resolvable:$true] %s248_s10 }
 0x1a1   :  { %s7053_s25 = scalar_lea.hbm %s8743_s4, 256 }
 0x1a2   :  { %p7054_p10 = scmp.ne.s32.totalorder %s8743_s4, %s7053_s25  ;;  %p7057_p11 = scmp.lt.u32.totalorder %s7053_s25, %s8743_s4 }
 0x1a4   :  { %p7059_p12 = pnand %p7057_p11, %p7054_p10 }
 0x1a6   :  { %7062 = shalt.err (!%p7059_p12)
}
 0x1a7   :  { %s7063_s11 = scalar_lea.vmem %s221_s19, 256  ;;  %p7068_p0 = scmp.lt.s32.totalorder %s221_s19, %s221_s19 }
 0x1a8   :  { %p7064_p13 = scmp.ne.s32.totalorder %s221_s19, %s7063_s11  ;;  %p7069_p1 = scmp.lt.s32.totalorder %s7063_s11, %s7063_s11 }
 0x1aa   :  { %p7070_p2 = por %p7069_p1, %p7068_p0 }
 0x1ac   :  { %p7071_p3 = pnand %p7070_p2, %p7064_p13 }
 0x1ae   :  { %7074 = shalt.err (!%p7071_p3)
}
 0x1af   :  { %s8744_s15 = sld [smem:[#allocation82_spill]] }
 0x1b0   :  { %226 = dma.hbm_to_vmem [thread:$0]  %s8743_s4, 256, %s221_s19, [#allocation12], %s7525_s16, %s7525_s16, %s7526_s13  }
 0x1b5   :  { %s7075_s5 = scalar_lea.hbm %s8744_s15, 128 }
 0x1b6   :  { %p7076_p4 = scmp.ne.s32.totalorder %s8744_s15, %s7075_s5  ;;  %p7079_p5 = scmp.lt.u32.totalorder %s7075_s5, %s8744_s15 }
 0x1b8   :  { %p7081_p6 = pnand %p7079_p5, %p7076_p4 }
 0x1ba   :  { %7084 = shalt.err (!%p7081_p6)
}
 0x1bb   :  { %s7085_s30 = scalar_lea.vmem %s249_s10, 128  ;;  %p7090_p8 = scmp.lt.s32.totalorder %s249_s10, %s249_s10 }
 0x1bc   :  { %p7086_p7 = scmp.ne.s32.totalorder %s249_s10, %s7085_s30  ;;  %p7091_p9 = scmp.lt.s32.totalorder %s7085_s30, %s7085_s30 }
 0x1be   :  { %p7092_p10 = por %p7091_p9, %p7090_p8 }
 0x1c0   :  { %p7093_p11 = pnand %p7092_p10, %p7086_p7 }
 0x1c2   :  { %7096 = shalt.err (!%p7093_p11)
}
 0x1c3   :  { %s8745_s18 = sld [smem:[#allocation84_spill]]  ;;  %s7548_s20 = smov [#allocation19]  }
 0x1c4   :  { %254 = dma.hbm_to_vmem [thread:$0]  %s8744_s15, 128, %s249_s10, [#allocation15], %s7525_s16, %s7525_s16, %s7526_s13  }
 0x1c5   :  { %s274_s24 = sshll.u32 %s7548_s20, 4  ;;  %s7549_s27 = smov [#allocation22]   ;;  %s275_s24 = int_to_ptr.vmem [resolvable:$true] %s274_s24 }
 0x1c6   :  { %s302_s22 = sshll.u32 %s7549_s27, 4  ;;  %s303_s22 = int_to_ptr.vmem [resolvable:$true] %s302_s22 }
 0x1c9   :  { %s7097_s14 = scalar_lea.hbm %s8745_s18, 1024 }
 0x1ca   :  { %p7098_p12 = scmp.ne.s32.totalorder %s8745_s18, %s7097_s14  ;;  %p7101_p13 = scmp.lt.u32.totalorder %s7097_s14, %s8745_s18 }
 0x1cc   :  { %p7103_p0 = pnand %p7101_p13, %p7098_p12 }
 0x1ce   :  { %7106 = shalt.err (!%p7103_p0)
}
 0x1cf   :  { %s7107_s23 = scalar_lea.vmem %s275_s24, 1024  ;;  %p7112_p2 = scmp.lt.s32.totalorder %s275_s24, %s275_s24 }
 0x1d0   :  { %p7108_p1 = scmp.ne.s32.totalorder %s275_s24, %s7107_s23  ;;  %p7113_p3 = scmp.lt.s32.totalorder %s7107_s23, %s7107_s23 }
 0x1d2   :  { %p7114_p4 = por %p7113_p3, %p7112_p2 }
 0x1d4   :  { %p7115_p5 = pnand %p7114_p4, %p7108_p1 }
 0x1d6   :  { %7118 = shalt.err (!%p7115_p5)
}
 0x1d7   :  { %s8746_s26 = sld [smem:[#allocation87_spill]] }
 0x1d8   :  { %280 = dma.hbm_to_vmem [thread:$0]  %s8745_s18, 1024, %s275_s24, [#allocation18], %s7525_s16, %s7525_s16, %s7526_s13  }
 0x1dd   :  { %s7119_s6 = scalar_lea.hbm %s8746_s26, 128 }
 0x1de   :  { %p7120_p6 = scmp.ne.s32.totalorder %s8746_s26, %s7119_s6  ;;  %p7123_p7 = scmp.lt.u32.totalorder %s7119_s6, %s8746_s26 }
 0x1e0   :  { %p7125_p8 = pnand %p7123_p7, %p7120_p6 }
 0x1e2   :  { %7128 = shalt.err (!%p7125_p8)
}
 0x1e3   :  { %s7129_s0 = scalar_lea.vmem %s303_s22, 128  ;;  %p7134_p10 = scmp.lt.s32.totalorder %s303_s22, %s303_s22 }
 0x1e4   :  { %p7130_p9 = scmp.ne.s32.totalorder %s303_s22, %s7129_s0  ;;  %p7135_p11 = scmp.lt.s32.totalorder %s7129_s0, %s7129_s0 }
 0x1e6   :  { %p7136_p12 = por %p7135_p11, %p7134_p10 }
 0x1e8   :  { %p7137_p13 = pnand %p7136_p12, %p7130_p9 }
 0x1ea   :  { %7140 = shalt.err (!%p7137_p13)
}
 0x1eb   :  { %s8747_s28 = sld [smem:[#allocation93_spill]]  ;;  %s7550_s4 = smov [#allocation25]  }
 0x1ec   :  { %308 = dma.hbm_to_vmem [thread:$0]  %s8746_s26, 128, %s303_s22, [#allocation21], %s7525_s16, %s7525_s16, %s7526_s13  }
 0x1ed   :  { %s336_s21 = sshll.u32 %s7550_s4, 4  ;;  %s7551_s19 = smov [#allocation28]   ;;  %s337_s21 = int_to_ptr.vmem [resolvable:$true] %s336_s21 }
 0x1ee   :  { %s360_s7 = sshll.u32 %s7551_s19, 4  ;;  %s361_s7 = int_to_ptr.vmem [resolvable:$true] %s360_s7 }
 0x1f1   :  { %s7141_s10 = scalar_lea.hbm %s8747_s28, 256 }
 0x1f2   :  { %p7142_p0 = scmp.ne.s32.totalorder %s8747_s28, %s7141_s10  ;;  %p7145_p1 = scmp.lt.u32.totalorder %s7141_s10, %s8747_s28 }
 0x1f4   :  { %p7147_p2 = pnand %p7145_p1, %p7142_p0 }
 0x1f6   :  { %7150 = shalt.err (!%p7147_p2)
}
 0x1f7   :  { %s7151_s25 = scalar_lea.vmem %s337_s21, 256  ;;  %p7156_p4 = scmp.lt.s32.totalorder %s337_s21, %s337_s21 }
 0x1f8   :  { %p7152_p3 = scmp.ne.s32.totalorder %s337_s21, %s7151_s25  ;;  %p7157_p5 = scmp.lt.s32.totalorder %s7151_s25, %s7151_s25 }
 0x1fa   :  { %p7158_p6 = por %p7157_p5, %p7156_p4 }
 0x1fc   :  { %p7159_p7 = pnand %p7158_p6, %p7152_p3 }
 0x1fe   :  { %7162 = shalt.err (!%p7159_p7)
}
 0x1ff   :  { %s8748_s11 = sld [smem:[#allocation94_spill]] }
 0x200   :  { %342 = dma.hbm_to_vmem [thread:$0]  %s8747_s28, 256, %s337_s21, [#allocation24], %s7534_s2, %s7534_s2, %s7535_s3  }
 0x205   :  { %s7163_s15 = scalar_lea.hbm %s8748_s11, 256 }
 0x206   :  { %p7164_p8 = scmp.ne.s32.totalorder %s8748_s11, %s7163_s15  ;;  %p7167_p9 = scmp.lt.u32.totalorder %s7163_s15, %s8748_s11 }
 0x208   :  { %p7169_p10 = pnand %p7167_p9, %p7164_p8 }
 0x20a   :  { %7172 = shalt.err (!%p7169_p10)
}
 0x20b   :  { %s7173_s5 = scalar_lea.vmem %s361_s7, 256  ;;  %p7178_p12 = scmp.lt.s32.totalorder %s361_s7, %s361_s7 }
 0x20c   :  { %p7174_p11 = scmp.ne.s32.totalorder %s361_s7, %s7173_s5  ;;  %p7179_p13 = scmp.lt.s32.totalorder %s7173_s5, %s7173_s5 }
 0x20e   :  { %p7180_p0 = por %p7179_p13, %p7178_p12 }
 0x210   :  { %p7181_p1 = pnand %p7180_p0, %p7174_p11 }
 0x212   :  { %7184 = shalt.err (!%p7181_p1)
}
 0x213   :  { %s8749_s30 = sld [smem:[#allocation95_spill]]  ;;  %s7552_s18 = smov [#allocation31]  }
 0x214   :  { %366 = dma.hbm_to_vmem [thread:$0]  %s8748_s11, 256, %s361_s7, [#allocation27], %s7534_s2, %s7534_s2, %s7535_s3  }
 0x215   :  { %s384_s20 = sshll.u32 %s7552_s18, 4  ;;  %s385_s20 = int_to_ptr.vmem [resolvable:$true] %s384_s20 }
 0x219   :  { %s7185_s24 = scalar_lea.hbm %s8749_s30, 32 }
 0x21a   :  { %p7186_p2 = scmp.ne.s32.totalorder %s8749_s30, %s7185_s24  ;;  %p7189_p3 = scmp.lt.u32.totalorder %s7185_s24, %s8749_s30 }
 0x21c   :  { %p7191_p4 = pnand %p7189_p3, %p7186_p2 }
 0x21e   :  { %7194 = shalt.err (!%p7191_p4)
}
 0x21f   :  { %s7195_s27 = scalar_lea.vmem %s385_s20, 32  ;;  %p7200_p6 = scmp.lt.s32.totalorder %s385_s20, %s385_s20 }
 0x220   :  { %p7196_p5 = scmp.ne.s32.totalorder %s385_s20, %s7195_s27  ;;  %p7201_p7 = scmp.lt.s32.totalorder %s7195_s27, %s7195_s27 }
 0x222   :  { %p7202_p8 = por %p7201_p7, %p7200_p6 }
 0x224   :  { %p7203_p9 = pnand %p7202_p8, %p7196_p5 }
 0x226   :  { %7206 = shalt.err (!%p7203_p9)
}
 0x227   :  { %s7553_s22 = smov 16   ;;  %s8750_s14 = sld [smem:[#allocation96_spill]] }
 0x228   :  { %s7554_s2 = smov 1   ;;  %s7555_s23 = smov [#allocation34]  }
 0x229   :  { %390 = dma.hbm_to_vmem [thread:$0]  %s8749_s30, 32, %s385_s20, [#allocation30], %s7553_s22, %s7553_s22, %s7554_s2  }
 0x22a   :  { %s408_s26 = sshll.u32 %s7555_s23, 4  ;;  %s7556_s6 = smov [#allocation37]   ;;  %s409_s26 = int_to_ptr.vmem [resolvable:$true] %s408_s26 }
 0x22b   :  { %s444_s0 = sshll.u32 %s7556_s6, 4  ;;  %s8050_s0 = int_to_ptr.vmem [resolvable:$true] %s444_s0 }
 0x22d   :  { %s7207_s28 = scalar_lea.hbm %s8750_s14, 128 }
 0x22e   :  { %p7208_p10 = scmp.ne.s32.totalorder %s8750_s14, %s7207_s28  ;;  %p7211_p11 = scmp.lt.u32.totalorder %s7207_s28, %s8750_s14 }
 0x230   :  { %p7213_p12 = pnand %p7211_p11, %p7208_p10 }
 0x232   :  { %7216 = shalt.err (!%p7213_p12)
}
 0x233   :  { %s7217_s4 = scalar_lea.vmem %s409_s26, 128  ;;  %p7222_p0 = scmp.lt.s32.totalorder %s409_s26, %s409_s26 }
 0x234   :  { %p7218_p13 = scmp.ne.s32.totalorder %s409_s26, %s7217_s4  ;;  %p7223_p1 = scmp.lt.s32.totalorder %s7217_s4, %s7217_s4 }
 0x236   :  { %p7224_p2 = por %p7223_p1, %p7222_p0 }
 0x238   :  { %p7225_p3 = pnand %p7224_p2, %p7218_p13 }
 0x23a   :  { %7228 = shalt.err (!%p7225_p3)
}
 0x23b   :  { %s8751_s21 = sld [smem:[#allocation103_spill]] }
 0x23c   :  { %414 = dma.hbm_to_vmem [thread:$0]  %s8750_s14, 128, %s409_s26, [#allocation33], %s7525_s16, %s7525_s16, %s7526_s13  }
 0x241   :  { %s7229_s19 = scalar_lea.hbm %s8751_s21, 128 }
 0x242   :  { %p7230_p4 = scmp.ne.s32.totalorder %s8751_s21, %s7229_s19  ;;  %p7233_p5 = scmp.lt.u32.totalorder %s7229_s19, %s8751_s21 }
 0x244   :  { %p7235_p6 = pnand %p7233_p5, %p7230_p4 }
 0x246   :  { %7238 = shalt.err (!%p7235_p6)
}
 0x247   :  { %s7239_s7 = scalar_lea.vmem %s8050_s0, 128  ;;  %p7244_p8 = scmp.lt.s32.totalorder %s8050_s0, %s8050_s0 }
 0x248   :  { %p7240_p7 = scmp.ne.s32.totalorder %s8050_s0, %s7239_s7  ;;  %p7245_p9 = scmp.lt.s32.totalorder %s7239_s7, %s7239_s7 }
 0x24a   :  { %p7246_p10 = por %p7245_p9, %p7244_p8 }
 0x24c   :  { %p7247_p11 = pnand %p7246_p10, %p7240_p7 }
 0x24e   :  { %7250 = shalt.err (!%p7247_p11)
}
 0x24f   :  { %s8752_s10 = sld [smem:[#allocation104_spill]]  ;;  %s7557_s25 = smov [#allocation40]  }
 0x250   :  { %450 = dma.hbm_to_vmem [thread:$0]  %s8751_s21, 128, %s8050_s0, [#allocation36], %s7525_s16, %s7525_s16, %s7526_s13  }
 0x251   :  { %s468_s11 = sshll.u32 %s7557_s25, 4  ;;  %s7558_s15 = smov [#allocation43]   ;;  %s469_s11 = int_to_ptr.vmem [resolvable:$true] %s468_s11 }
 0x252   :  { %s502_s5 = sshll.u32 %s7558_s15, 4  ;;  %s8071_s5 = int_to_ptr.vmem [resolvable:$true] %s502_s5 }
 0x255   :  { %s7251_s30 = scalar_lea.hbm %s8752_s10, 128 }
 0x256   :  { %p7252_p12 = scmp.ne.s32.totalorder %s8752_s10, %s7251_s30  ;;  %p7255_p13 = scmp.lt.u32.totalorder %s7251_s30, %s8752_s10 }
 0x258   :  { %p7257_p0 = pnand %p7255_p13, %p7252_p12 }
 0x25a   :  { %7260 = shalt.err (!%p7257_p0)
}
 0x25b   :  { %s7261_s18 = scalar_lea.vmem %s469_s11, 128  ;;  %p7266_p2 = scmp.lt.s32.totalorder %s469_s11, %s469_s11 }
 0x25c   :  { %p7262_p1 = scmp.ne.s32.totalorder %s469_s11, %s7261_s18  ;;  %p7267_p3 = scmp.lt.s32.totalorder %s7261_s18, %s7261_s18 }
 0x25e   :  { %p7268_p4 = por %p7267_p3, %p7266_p2 }
 0x260   :  { %p7269_p5 = pnand %p7268_p4, %p7262_p1 }
 0x262   :  { %7272 = shalt.err (!%p7269_p5)
}
 0x263   :  { %s8753_s20 = sld [smem:[#allocation110_spill]] }
 0x264   :  { %474 = dma.hbm_to_vmem [thread:$0]  %s8752_s10, 128, %s469_s11, [#allocation39], %s7525_s16, %s7525_s16, %s7526_s13  }
 0x269   :  { %s7273_s24 = scalar_lea.hbm %s8753_s20, 64 }
 0x26a   :  { %p7274_p6 = scmp.ne.s32.totalorder %s8753_s20, %s7273_s24  ;;  %p7277_p7 = scmp.lt.u32.totalorder %s7273_s24, %s8753_s20 }
 0x26c   :  { %p7279_p8 = pnand %p7277_p7, %p7274_p6 }
 0x26e   :  { %7282 = shalt.err (!%p7279_p8)
}
 0x26f   :  { %s7283_s27 = scalar_lea.vmem %s8071_s5, 64  ;;  %p7288_p10 = scmp.lt.s32.totalorder %s8071_s5, %s8071_s5 }
 0x270   :  { %p7284_p9 = scmp.ne.s32.totalorder %s8071_s5, %s7283_s27  ;;  %p7289_p11 = scmp.lt.s32.totalorder %s7283_s27, %s7283_s27 }
 0x272   :  { %p7290_p12 = por %p7289_p11, %p7288_p10 }
 0x274   :  { %p7291_p13 = pnand %p7290_p12, %p7284_p9 }
 0x276   :  { %7294 = shalt.err (!%p7291_p13)
}
 0x277   :  { %s8754_s16 = sld [smem:[#allocation111_spill]]  ;;  %s7559_s13 = smov [#allocation46]  }
 0x278   :  { %508 = dma.hbm_to_vmem [thread:$0]  %s8753_s20, 64, %s8071_s5, [#allocation42], %s7540_s1, %s7540_s1, %s7541_s8  }
 0x279   :  { %s526_s22 = sshll.u32 %s7559_s13, 4  ;;  %s527_s22 = int_to_ptr.vmem [resolvable:$true] %s526_s22 }
 0x27d   :  { %s7295_s14 = scalar_lea.hbm %s8754_s16, 64 }
 0x27e   :  { %p7296_p0 = scmp.ne.s32.totalorder %s8754_s16, %s7295_s14  ;;  %p7299_p1 = scmp.lt.u32.totalorder %s7295_s14, %s8754_s16 }
 0x280   :  { %p7301_p2 = pnand %p7299_p1, %p7296_p0 }
 0x282   :  { %7304 = shalt.err (!%p7301_p2)
}
 0x283   :  { %s7305_s2 = scalar_lea.vmem %s527_s22, 64  ;;  %p7310_p4 = scmp.lt.s32.totalorder %s527_s22, %s527_s22 }
 0x284   :  { %p7306_p3 = scmp.ne.s32.totalorder %s527_s22, %s7305_s2  ;;  %p7311_p5 = scmp.lt.s32.totalorder %s7305_s2, %s7305_s2 }
 0x286   :  { %p7312_p6 = por %p7311_p5, %p7310_p4 }
 0x288   :  { %p7313_p7 = pnand %p7312_p6, %p7306_p3 }
 0x28a   :  { %7316 = shalt.err (!%p7313_p7)
}
 0x28b   :  { %532 = dma.hbm_to_vmem [thread:$0]  %s8754_s16, 64, %s527_s22, [#allocation45], %s7540_s1, %s7540_s1, %s7541_s8  }
 0x28c   :  { %7427 = dma.done.wait [#allocation3], 64  }
 0x28d   :  { %7428 = vsyncadd [#allocation3], 4294967232 }
 0x28e   :  { %7429 = dma.done.wait [#allocation6], 128  }
 0x28f   :  { %7430 = vsyncadd [#allocation6], 4294967168 }
 0x290   :  { %7431 = dma.done.wait [#allocation9], 6208  }
 0x291   :  { %7432 = vsyncadd [#allocation9], 4294961088 }
 0x292   :  { %7433 = dma.done.wait [#allocation12], 320  }
 0x293   :  { %7434 = vsyncadd [#allocation12], 4294966976 }
 0x294   :  { %7435 = dma.done.wait [#allocation15], 384  }
 0x295   :  { %7436 = vsyncadd [#allocation15], 4294966912 }
 0x296   :  { %7437 = dma.done.wait [#allocation18], 1152  }
 0x297   :  { %7438 = vsyncadd [#allocation18], 4294966144 }
 0x298   :  { %7439 = dma.done.wait [#allocation21], 1152  }
 0x299   :  { %7440 = vsyncadd [#allocation21], 4294966144 }
 0x29a   :  { %7441 = dma.done.wait [#allocation24], 384  }
 0x29b   :  { %7442 = vsyncadd [#allocation24], 4294966912 }
 0x29c   :  { %7443 = dma.done.wait [#allocation27], 512  }
 0x29d   :  { %7444 = vsyncadd [#allocation27], 4294966784 }
 0x29e   :  { %7445 = dma.done.wait [#allocation30], 288  }
 0x29f   :  { %7446 = vsyncadd [#allocation30], 4294967008 }
 0x2a0   :  { %7447 = dma.done.wait [#allocation33], 256  }
 0x2a1   :  { %7448 = vsyncadd [#allocation33], 4294967040 }
 0x2a2   :  { %7449 = dma.done.wait [#allocation36], 256  }
 0x2a3   :  { %7450 = vsyncadd [#allocation36], 4294967040 }
 0x2a4   :  { %7451 = dma.done.wait [#allocation39], 256  }
 0x2a5   :  { %7452 = vsyncadd [#allocation39], 4294967040 }
 0x2a6   :  { %7453 = dma.done.wait [#allocation42], 128  }
 0x2a7   :  { %7454 = vsyncadd [#allocation42], 4294967168 }
 0x2a8   :  { %7455 = dma.done.wait [#allocation45], 128  }
 0x2a9   :  { %7456 = vsyncadd [#allocation45], 4294967168  ;;  %v6526_v0 = vld [vmem:[#allocation8 + $0x40] sm:$0xff]   ;;  %v6530_v4 = vld [vmem:[#allocation8 + $0x48] sm:$0xff]   ;;  %s8755_s1 = sld [smem:[#allocation72_spill]]  ;;  %v7560_v42 = vmov 0.0  }
 0x2aa   :  { %v6527_v1 = vld [vmem:[#allocation8] sm:$0xff]   ;;  %5652 = vmatprep.subr.bf16.mxu0 %v6526_v0  ;;  %v6531_v5 = vld [vmem:[#allocation8 + $0x8] sm:$0xff]   ;;  %v6534_v8 = vld [vmem:[#allocation8 + $0x50] sm:$0xff]   ;;  %vm7561_vm0 = vmmov 0   ;;  %vm1165_vm1 = vcmask 1043456   ;;  %vm1161_vm2 = vcmask 64512  }
 0x2ab   :  { %v6528_v2 = vld [vmem:[#allocation8 + $0xc0] sm:$0xff]   ;;  %5653 = vmatpush3.bf16.msra.mxu0 %v6527_v1  ;;  %v6532_v6 = vld [vmem:[#allocation8 + $0xc8] sm:$0xff]   ;;  %v6535_v9 = vld [vmem:[#allocation8 + $0x10] sm:$0xff]   ;;  %s8756_s23 = sld [smem:[#allocation75_spill]]  ;;  %s8757_s26 = sld [smem:[#allocation77_spill]]  ;;  %vm1287_vm3 = vcmask 261120  }
 0x2ac   :  { %v6529_v3 = vld [vmem:[#allocation8 + $0x80] sm:$0xff]   ;;  %5674 = vmatprep.subr.bf16.mxu1 %v6528_v2  ;;  %5654 = vmatprep.subr.bf16.mxu0 %v6530_v4  ;;  %v6533_v7 = vld [vmem:[#allocation8 + $0x88] sm:$0xff]   ;;  %v6536_v10 = vld [vmem:[#allocation8 + $0xd0] sm:$0xff]   ;;  %s8758_s6 = sld [smem:[#allocation78_spill]]  ;;  %s8759_s0 = sld [smem:[#allocation80_spill]]  ;;  %vm1394_vm4 = vcmask 125952  }
 0x2ad   :  { %5675 = vmatpush3.bf16.msra.mxu1 %v6529_v3  ;;  %v6537_v11 = vld [vmem:[#allocation8 + $0x90] sm:$0xff]   ;;  %v6538_v12 = vld [vmem:[#allocation8 + $0x58] sm:$0xff]   ;;  %v6542_v16 = vld [vmem:[#allocation8 + $0x60] sm:$0xff]   ;;  %s8760_s28 = sld [smem:[#allocation81_spill]]  ;;  %s7562_s4 = smov 120   ;;  %vm1547_vm5 = vcmask 523264  }
 0x2ae   :  { %5676 = vmatprep.subr.bf16.mxu1 %v6532_v6  ;;  %v6539_v13 = vld [vmem:[#allocation8 + $0x18] sm:$0xff]   ;;  %v6543_v17 = vld [vmem:[#allocation8 + $0x20] sm:$0xff]   ;;  %v6546_v20 = vld [vmem:[#allocation8 + $0x68] sm:$0xff]   ;;  %s8761_s21 = sld [smem:[#allocation83_spill]]  ;;  %s8762_s19 = sld [smem:[#allocation89_spill]]  ;;  %vm3135_vm6 = vcmask 1040384  }
 0x2af   :  { %5655 = vmatpush3.bf16.msra.mxu0 %v6531_v5  ;;  %v6540_v14 = vld [vmem:[#allocation8 + $0xd8] sm:$0xff]   ;;  %v6544_v18 = vld [vmem:[#allocation8 + $0xe0] sm:$0xff]   ;;  %v6547_v21 = vld [vmem:[#allocation8 + $0x28] sm:$0xff]   ;;  %s8763_s7 = sld [smem:[#allocation85_spill]]  ;;  %s8764_s10 = sld [smem:[#allocation86_spill]]  ;;  %vm3131_vm7 = vcmask 15360  }
 0x2b0   :  { %5656 = vmatprep.subr.bf16.mxu0 %v6534_v8  ;;  %v6541_v15 = vld [vmem:[#allocation8 + $0x98] sm:$0xff]   ;;  %v6545_v19 = vld [vmem:[#allocation8 + $0xa0] sm:$0xff]   ;;  %v6548_v22 = vld [vmem:[#allocation8 + $0xe8] sm:$0xff]   ;;  %s8765_s25 = sld [smem:[#allocation90_spill]]  ;;  %s8766_s11 = sld [smem:[#allocation88_spill]]  ;;  %vm3106_vm8 = vcmask 60416  }
 0x2b1   :  { %5677 = vmatpush3.bf16.msra.mxu1 %v6533_v7  ;;  %v6549_v23 = vld [vmem:[#allocation8 + $0xa8] sm:$0xff]   ;;  %v6550_v24 = vld [vmem:[#allocation8 + $0x70] sm:$0xff]   ;;  %v6554_v28 = vld [vmem:[#allocation8 + $0x78] sm:$0xff]   ;;  %s8767_s15 = sld [smem:[#allocation91_spill]]  ;;  %s8768_s5 = sld [smem:[#allocation92_spill]]  ;;  %vm3865_vm9 = vcmask 1041408  }
 0x2b2   :  { %5678 = vmatprep.subr.bf16.mxu1 %v6536_v10  ;;  %v6551_v25 = vld [vmem:[#allocation8 + $0x30] sm:$0xff]   ;;  %v6555_v29 = vld [vmem:[#allocation8 + $0x38] sm:$0xff]   ;;  %v6559_v35 = vld [vmem:[#allocation8 + $0x140] sm:$0xff]   ;;  %s7563_s30 = smov 126   ;;  %s8769_s18 = sld [smem:[#allocation98_spill]]  ;;  %vm3114_vm10 = vcmask 3072  }
 0x2b3   :  { %5657 = vmatpush3.bf16.msra.mxu0 %v6535_v9  ;;  %v6552_v26 = vld [vmem:[#allocation8 + $0xf0] sm:$0xff]   ;;  %v6556_v30 = vld [vmem:[#allocation8 + $0xf8] sm:$0xff]   ;;  %v6561_v39 = vld [vmem:[#allocation8 + $0x100] sm:$0xff]   ;;  %s8770_s20 = sld [smem:[#allocation97_spill]]  ;;  %s8771_s24 = sld [smem:[#allocation99_spill]]  ;;  %vm5218_vm11 = vcmask 11264  }
 0x2b4   :  { %5658 = vmatprep.subr.bf16.mxu0 %v6538_v12  ;;  %v6553_v27 = vld [vmem:[#allocation8 + $0xb0] sm:$0xff]   ;;  %v6558_v33 = vld [vmem:[#allocation8 + $0xb8] sm:$0xff]   ;;  %v6562_v41 = vld [vmem:[#allocation8 + $0x148] sm:$0xff]   ;;  %s8772_s27 = sld [smem:[#allocation102_spill]]  ;;  %s8773_s16 = sld [smem:[#allocation106_spill]] }
 0x2b5   :  { %5679 = vmatpush3.bf16.msra.mxu1 %v6537_v11  ;;  %v623_v31 = vld [vmem:[%s8755_s1] sm:$0xff]  ;;  %v624_v36 = vld [vmem:[%s8755_s1 + $0x8] sm:$0xff]  ;;  %v6563_v44 = vld [vmem:[#allocation8 + $0x108] sm:$0xff]   ;;  %s8774_s13 = sld [smem:[#allocation100_spill]]  ;;  %s8775_s22 = sld [smem:[#allocation101_spill]] }
 0x2b6   :  { %5680 = vmatprep.subr.bf16.mxu1 %v6540_v14  ;;  %v725_v32 = vcombine.high %v623_v31, %v623_v31  ;;  %v731_v34 = vpack.c.bf16 %v623_v31, %v623_v31  ;;  %v726_v38 = vcombine.high %v624_v36, %v624_v36  ;;  %v733_v40 = vpack.c.bf16 %v624_v36, %v624_v36  ;;  %v6564_v45 = vld [vmem:[#allocation8 + $0x150] sm:$0xff]   ;;  %v6566_v47 = vld [vmem:[#allocation8 + $0x158] sm:$0xff]   ;;  %v1153_v48 = vld [vmem:[#allocation10] sm:$0xf]  ;;  %s8776_s14 = sld [smem:[#allocation105_spill]]  ;;  %s8777_s2 = sld [smem:[#allocation107_spill]] }
 0x2b7   :  { %5659 = vmatpush3.bf16.msra.mxu0 %v6539_v13  ;;  %v6565_v46 = vld [vmem:[#allocation8 + $0x110] sm:$0xff]   ;;  %v1167_v49 = vsel %vm1165_vm1, %v1153_v48, 0  ;;  %v6567_v50 = vld [vmem:[#allocation8 + $0x118] sm:$0xff]   ;;  %v6568_v51 = vld [vmem:[#allocation8 + $0x160] sm:$0xff]  }
 0x2b8   :  { %5660 = vmatprep.subr.bf16.mxu0 %v6542_v16  ;;  %v732_v37 = vpack.c.bf16 %v725_v32, %v725_v32  ;;  %v734_v43 = vpack.c.bf16 %v726_v38, %v726_v38  ;;  %v621_v52 = vld [vmem:[#allocation2] sm:$0xf]  ;;  %v6569_v53 = vld [vmem:[#allocation8 + $0x120] sm:$0xff]   ;;  %v6570_v57 = vld [vmem:[#allocation8 + $0x168] sm:$0xff]  }
 0x2b9   :  { %5681 = vmatpush3.bf16.msra.mxu1 %v6541_v15  ;;  %v8106_v54 = vpack.c.bf16 %v621_v52, %v621_v52  ;;  %v625_v55 = vld [vmem:[%s8755_s1 + $0x10] sm:$0xff]  ;;  %v6572_v62 = vld [vmem:[#allocation8 + $0x170] sm:$0xff]   ;;  %v6574_v0 = vld [vmem:[#allocation8 + $0x178] sm:$0xff]   ;;  %s8778_s1 = sld [smem:[#allocation108_spill]] }
 0x2ba   :  { %5682 = vmatprep.subr.bf16.mxu1 %v6544_v18  ;;  %1064 = vmatprep.mubr.bf16.mxu0 %v732_v37  ;;  %v1209_v56 = vld [vmem:[#allocation11] sm:$0xf]  ;;  %v727_v58 = vcombine.high %v625_v55, %v625_v55  ;;  %v6571_v60 = vld [vmem:[#allocation8 + $0x128] sm:$0xff]   ;;  %v6573_v63 = vld [vmem:[#allocation8 + $0x130] sm:$0xff]   ;;  %v735_v2 = vpack.c.bf16 %v625_v55, %v625_v55 }
 0x2bb   :  { %5661 = vmatpush3.bf16.msra.mxu0 %v6543_v17  ;;  %1104 = vmatprep.mubr.bf16.mxu1 %v734_v43  ;;  %v1218_v59 = vsel %vm1165_vm1, %v1209_v56, 0  ;;  %v6575_v1 = vld [vmem:[#allocation8 + $0x138] sm:$0xff]   ;;  %v6577_v3 = vld [vmem:[#allocation13] sm:$0xff]   ;;  %v6578_v4 = vld [vmem:[#allocation13 + $0x8] sm:$0xff]  }
 0x2bc   :  { %5662 = vmatprep.subr.bf16.mxu0 %v6546_v20  ;;  %v736_v61 = vpack.c.bf16 %v727_v58, %v727_v58  ;;  %v5378_v6 = vld [vmem:[%s8756_s23] ss:$0 sm:$0xff]  ;;  %v6580_v43 = vld [vmem:[#allocation14 + $0x8] sm:$0xff]   ;;  %s8779_s23 = sld [smem:[#allocation109_spill]] }
 0x2bd   :  { %5683 = vmatpush3.bf16.msra.mxu1 %v6545_v19  ;;  %v5435_v52 = vld [vmem:[%s8760_s28] ss:$0 sm:$0xff] }
 0x2be   :  { %5684 = vmatprep.subr.bf16.mxu1 %v6548_v22 }
 0x2bf   :  { %5663 = vmatpush3.bf16.msra.mxu0 %v6547_v21 }
 0x2c0   :  { %5664 = vmatprep.subr.bf16.mxu0 %v6550_v24 }
 0x2c1   :  { %5685 = vmatpush3.bf16.msra.mxu1 %v6549_v23 }
 0x2c2   :  { %5686 = vmatprep.subr.bf16.mxu1 %v6552_v26  ;;  %v5427_v26 = vld [vmem:[%s8757_s26] ss:$0 sm:$0xff] }
 0x2c3   :  { %5665 = vmatpush3.bf16.msra.mxu0 %v6551_v25 }
 0x2c4   :  { %5666 = vmatprep.subr.bf16.mxu0 %v6554_v28 }
 0x2c5   :  { %5687 = vmatpush3.bf16.msra.mxu1 %v6553_v27 }
 0x2c6   :  { %5688 = vmatprep.subr.bf16.mxu1 %v6556_v30 }
 0x2c7   :  { %5667 = vmatpush3.bf16.msra.mxu0 %v6555_v29 }
 0x2c8   :  { %5696 = vmatprep.subr.bf16.mxu0 %v6559_v35 }
 0x2c9   :  { %5689 = vmatpush3.bf16.msra.mxu1 %v6558_v33  ;;  %v5429_v33 = vld [vmem:[%s8758_s6] ss:$0 sm:$0xff]  ;;  %s7565_s6 = smov [#allocation51]  }
 0x2ca   :  { %5888 = vmatprep.subr.bf16.mxu1 %v7560_v42  ;;  %1065 = vmatmul.mubr.bf16.vlgmr.msra.gmra.mrb[0].mxu0 %v731_v34 }
 0x2cb   :  { %5697 = vmatpush3.bf16.msra.mxu0 %v6561_v39  ;;  %1144 = vmatprep.mubr.bf16.mxu0 %v736_v61 }
 0x2cc   :  { %1105 = vmatmul.mubr.bf16.vlgmr.msra.gmra.mrb[0].mxu1 %v733_v40  ;;  %5698 = vmatprep.subr.bf16.mxu0 %v6562_v41  ;;  %v6579_v40 = vld [vmem:[#allocation14] sm:$0xff]  }
 0x2cd   :  { %5890 = vmatprep.mubr.msk.bf16.mxu1 %vm7561_vm0, %v7560_v42  ;;  %5889 = vmatpush3.bf16.msra.mxu1 %v1167_v49 }
 0x2ce   :  { %5894 = vmatprep.subr.bf16.mxu1 %v7560_v42 }
 0x2cf   :  { %5699 = vmatpush3.bf16.msra.mxu0 %v6563_v44  ;;  %v1403_v44 = vld [vmem:[#allocation16] sm:$0xf] }
 0x2d0   :  { %5700 = vmatprep.subr.bf16.mxu0 %v6564_v45  ;;  %v1419_v45 = vsel %vm1165_vm1, %v1403_v44, 0 }
 0x2d3   :  { %5701 = vmatpush3.bf16.msra.mxu0 %v6565_v46  ;;  %v5431_v46 = vld [vmem:[%s8759_s0] ss:$0 sm:$0xff]  ;;  %s5265_s0 = sshll.u32 %s7565_s6, 4  ;;  %s5266_s0 = int_to_ptr.vmem [resolvable:$true] %s5265_s0 }
 0x2d4   :  { %5702 = vmatprep.subr.bf16.mxu0 %v6566_v47  ;;  %5891 = vmatmul.mubr.msk.bf16.vlgmr.msra.gmra.mrb[4].mxu1 %vm1161_vm2, %v8106_v54 }
 0x2d5   :  { %5895 = vmatpush3.bf16.msra.mxu1 %v1218_v59  ;;  %5896 = vmatprep.mubr.msk.bf16.mxu1 %vm7561_vm0, %v7560_v42 }
 0x2d6   :  { %5900 = vmatprep.subr.bf16.mxu1 %v7560_v42 }
 0x2d7   :  { %5703 = vmatpush3.bf16.msra.mxu0 %v6567_v50 }
 0x2d8   :  { %5704 = vmatprep.subr.bf16.mxu0 %v6568_v51 }
 0x2db   :  { %5705 = vmatpush3.bf16.msra.mxu0 %v6569_v53 }
 0x2dc   :  { %5706 = vmatprep.subr.bf16.mxu0 %v6570_v57  ;;  %5897 = vmatmul.mubr.msk.bf16.vlgmr.msra.gmra.mrb[8].mxu1 %vm1161_vm2, %v8106_v54 }
 0x2dd   :  { %5904 = vmatprep.mubr.msk.bf16.mxu1 %vm7561_vm0, %v7560_v42  ;;  %5901 = vmatpush3.bf16.msra.mxu1 %v6577_v3  ;;  %v1461_v3 = vld [vmem:[#allocation17] sm:$0xf] }
 0x2de   :  { %5902 = vmatprep.subr.bf16.mxu1 %v7560_v42 }
 0x2df   :  { %5707 = vmatpush3.bf16.msra.mxu0 %v6571_v60  ;;  %v1397_v60 = vld [vmem:[#allocation7] sm:$0xf] }
 0x2e0   :  { %5708 = vmatprep.subr.bf16.mxu0 %v6572_v62 }
 0x2e1   :  { %5903 = vmatpush3.bf16.msra.mxu1 %v6578_v4  ;;  %v1463_v4 = vsel %vm1165_vm1, %v1461_v3, 0 }
 0x2e2   :  { %5908 = vmatprep.subr.bf16.mxu1 %v7560_v42 }
 0x2e3   :  { %5709 = vmatpush3.bf16.msra.mxu0 %v6573_v63 }
 0x2e4   :  { %5710 = vmatprep.subr.bf16.mxu0 %v6574_v0 }
 0x2e7   :  { %5711 = vmatpush3.bf16.msra.mxu0 %v6575_v1  ;;  %v6581_v1 = vld [vmem:[#allocation19] sm:$0xff]  }
 0x2e8   :  { %5916 = vmatprep.subr.bf16.mxu0 %v7560_v42 }
 0x2ea   :  { %1145 = vmatmul.mubr.bf16.vlgmr.msra.gmra.mrb[4].mxu0 %v735_v2  ;;  %v6583_v2 = vld [vmem:[#allocation19 + $0x8] sm:$0xff]  }
 0x2eb   :  { %5918 = vmatprep.mubr.msk.bf16.mxu0 %vm7561_vm0, %v7560_v42  ;;  %5917 = vmatpush3.bf16.msra.mxu0 %v1419_v45 }
 0x2ec   :  { %5922 = vmatprep.subr.bf16.mxu0 %v7560_v42 }
 0x39d   :  { %v5668_v5 = vpop.f32.mrb[0].mxu0 }
 0x39e   :  { %v5669_v7 = vpop.f32.mrb[1].mxu0 }
 0x39f   :  { %v5670_v8 = vadd.f32 %v5669_v7, %v5668_v5  ;;  %v5671_v9 = vpop.f32.mrb[2].mxu0  ;;  %v5690_v10 = vpop.f32.mrb[0].mxu1  ;;  %v6584_v7 = vld [vmem:[#allocation20 + $0x8] sm:$0xff]  }
 0x3a0   :  { %v5672_v11 = vpop.f32.mrb[3].mxu0  ;;  %v5691_v12 = vpop.f32.mrb[1].mxu1  ;;  %v6586_v9 = vld [vmem:[#allocation20 + $0x10] sm:$0xff]  }
 0x3a1   :  { %v1067_v13 = vadd.f32 %v5670_v8, %v5378_v6  ;;  %v5692_v14 = vadd.f32 %v5691_v12, %v5690_v10  ;;  %v5693_v15 = vpop.f32.mrb[2].mxu1  ;;  %v6582_v6 = vld [vmem:[#allocation20] sm:$0xff]   ;;  %v6585_v8 = vld [vmem:[#allocation19 + $0x10] sm:$0xff]   ;;  %v6587_v10 = vld [vmem:[#allocation19 + $0x18] sm:$0xff]  }
 0x3a2   :  { %v5694_v16 = vpop.f32.mrb[3].mxu1  ;;  %v6588_v11 = vld [vmem:[#allocation20 + $0x18] sm:$0xff]  }
 0x3a3   :  { %v1107_v17 = vadd.f32 %v5692_v14, %v1067_v13  ;;  %v5439_v12 = vld [vmem:[%s8761_s21] ss:$0 sm:$0xff] }
 0x3a7   :  { %v1203_v18 = vpop.f32.mrb[4].mxu1 }
 0x3a8   :  { %v5892_v19 = vpop.f32.mrb[5].mxu1  ;;  %v1204_v29 = vadd.f32 %v5427_v26, %v1203_v18 }
 0x3a9   :  { %v1206_v20 = vpop.f32.mrb[6].mxu1 }
 0x3aa   :  { %v5893_v21 = vpop.f32.mrb[7].mxu1  ;;  %v1260_v35 = vadd.f32 1.0, %v1204_v29  ;;  %v1678_v20 = vld [vmem:[#allocation22] sm:$0xf] }
 0x3ab   :  { %v1691_v21 = vsel %vm1165_vm1, %v1678_v20, 0 }
 0x3af   :  { %v1254_v22 = vpop.f32.mrb[8].mxu1 }
 0x3b0   :  { %v5898_v23 = vpop.f32.mrb[9].mxu1  ;;  %v1255_v37 = vadd.f32 %v5429_v33, %v1254_v22  ;;  %v6589_v22 = vld [vmem:[%s8762_s19] sm:$0xff]  }
 0x3b1   :  { %v1257_v24 = vpop.f32.mrb[10].mxu1  ;;  %v6591_v23 = vld [vmem:[%s8762_s19 + $0x8] sm:$0xff]  }
 0x3b2   :  { %v5899_v25 = vpop.f32.mrb[11].mxu1  ;;  %v5442_v24 = vld [vmem:[%s8763_s7] ss:$0 sm:$0xff] }
 0x3bd   :  { %v5712_v27 = vpop.f32.mrb[4].mxu0 }
 0x3be   :  { %v5713_v28 = vpop.f32.mrb[5].mxu0 }
 0x3bf   :  { %v5714_v30 = vadd.f32 %v5713_v28, %v5712_v27  ;;  %v5715_v31 = vpop.f32.mrb[6].mxu0 }
 0x3c0   :  { %v5716_v32 = vpop.f32.mrb[7].mxu0 }
 0x3c1   :  { %v1147_v34 = vadd.f32 %v5714_v30, %v1107_v17 }
 0x3c3   :  { %v1152_v36 = vmax.f32 %v1147_v34, 0.0 }
 0x3c5   :  { %v1261_v38 = vmul.f32 %v1260_v35, %v1152_v36 }
 0x3c7   :  { %v1262_v39 = vadd.f32 %v1261_v38, %v1255_v37  ;;  %v5448_v38 = vld [vmem:[%s8764_s10] ss:$0 sm:$0xff] }
 0x3c9   :  { %v1267_v41 = vpack.c.bf16 %v1262_v39, %v1262_v39 }
 0x3cb   :  { %5905 = vmatmul.mubr.msk.bf16.vlgmr.msra.gmra.mrb[12].mxu1 %vm1287_vm3, %v1267_v41 }
 0x3cc   :  { %5909 = vmatpush3.bf16.msra.mxu1 %v6579_v40  ;;  %5912 = vmatprep.mubr.msk.bf16.mxu1 %vm7561_vm0, %v7560_v42 }
 0x3cd   :  { %5910 = vmatprep.subr.bf16.mxu1 %v7560_v42 }
 0x3d0   :  { %5911 = vmatpush3.bf16.msra.mxu1 %v6580_v43  ;;  %v1733_v43 = vld [vmem:[#allocation23] sm:$0xf] }
 0x3d1   :  { %5928 = vmatprep.subr.bf16.mxu1 %v7560_v42 }
 0x3d3   :  { %5913 = vmatmul.mubr.msk.bf16.vlgmr.msra.gmra.mrb[16].mxu1 %vm1287_vm3, %v1267_v41 }
 0x3d4   :  { %5936 = vmatprep.mubr.msk.bf16.mxu1 %vm7561_vm0, %v7560_v42  ;;  %5929 = vmatpush3.bf16.msra.mxu1 %v6581_v1 }
 0x3d5   :  { %5930 = vmatprep.subr.bf16.mxu1 %v7560_v42 }
 0x3d8   :  { %5931 = vmatpush3.bf16.msra.mxu1 %v6583_v2 }
 0x3d9   :  { %5932 = vmatprep.subr.bf16.mxu1 %v7560_v42 }
 0x3dc   :  { %5933 = vmatpush3.bf16.msra.mxu1 %v6585_v8 }
 0x3dd   :  { %5934 = vmatprep.subr.bf16.mxu1 %v7560_v42 }
 0x3e0   :  { %5935 = vmatpush3.bf16.msra.mxu1 %v6587_v10 }
 0x3e1   :  { %5952 = vmatprep.subr.bf16.mxu1 %v7560_v42 }
 0x49e   :  { %v1325_v47 = vpop.f32.mrb[12].mxu1 }
 0x49f   :  { %v1326_v48 = vadd.f32 %v5431_v46, %v1325_v47  ;;  %v5906_v49 = vpop.f32.mrb[13].mxu1  ;;  %v1735_v46 = vsel %vm1165_vm1, %v1733_v43, 0  ;;  %v6590_v47 = vld [vmem:[%s8765_s25] sm:$0xff]  }
 0x4a0   :  { %v1328_v50 = vpop.f32.mrb[14].mxu1  ;;  %v6593_v49 = vld [vmem:[%s8762_s19 + $0x10] sm:$0xff]   ;;  %v5474_v43 = vld [vmem:[%s8761_s21 + $0x1] ss:$0 sm:$0xff] }
 0x4a1   :  { %v5907_v51 = vpop.f32.mrb[15].mxu1  ;;  %1395 = vst.msk [vmem:[#allocation48] sm:$0xf] %vm1394_vm4, %v1326_v48  ;;  %v6594_v50 = vld [vmem:[%s8765_s25 + $0x10] sm:$0xff]  }
 0x4a2   :  { %v6595_v51 = vld [vmem:[%s8762_s19 + $0x18] sm:$0xff]  }
 0x4a6   :  { %v1388_v53 = vpop.f32.mrb[16].mxu1 }
 0x4a7   :  { %v1389_v55 = vadd.f32 %v5435_v52, %v1388_v53  ;;  %v5914_v56 = vpop.f32.mrb[17].mxu1  ;;  %v6596_v52 = vld [vmem:[%s8765_s25 + $0x18] sm:$0xff]   ;;  %v5454_v53 = vld [vmem:[%s8766_s11] ss:$0 sm:$0xff] }
 0x4a8   :  { %v1391_v57 = vpop.f32.mrb[18].mxu1 }
 0x4a9   :  { %v1398_v58 = vmul.f32 1.442695, %v1389_v55  ;;  %v5915_v59 = vpop.f32.mrb[19].mxu1  ;;  %1396 = vst.msk [vmem:[#allocation50] sm:$0xf] %vm1394_vm4, %v1389_v55 }
 0x4ab   :  { %6645 = vpow2.f32 %v1398_v58 }
 0x4b5   :  { %v6646_v61 = vpop.eup %6645 }
 0x4b6   :  { %v1400_v62 = vmul.f32 %v6646_v61, %v1397_v60 }
 0x4b8   :  { %v8139_v63 = vadd.f32 %v1400_v62, %v1326_v48  ;;  %v6592_v48 = vld [vmem:[%s8765_s25 + $0x8] sm:$0xff]   ;;  %v5457_v62 = vld [vmem:[%s8767_s15] ss:$0 sm:$0xff] }
 0x4ba   :  { %v1404_v0 = vpack.c.bf16 %v8139_v63, %v8139_v63  ;;  %1402 = vst.msk [vmem:[#allocation51] sm:$0xf] %vm1394_vm4, %v8139_v63 }
 0x4bc   :  { %1413 = vrot.lane.b32.xlu0 %v1404_v0, %s7562_s4  ;;  %v5463_v0 = vld [vmem:[%s8768_s5] ss:$0 sm:$0xff] }
 0x52e   :  { %v1414_v5 = vpop.permute.xlu0 %1413 }
 0x52f   :  { %5919 = vmatmul.mubr.msk.bf16.vlgmr.msra.gmra.mrb[8].mxu0 %vm1161_vm2, %v1414_v5 }
 0x530   :  { %5923 = vmatpush3.bf16.msra.mxu0 %v1463_v4  ;;  %5924 = vmatprep.mubr.msk.bf16.mxu0 %vm7561_vm0, %v7560_v42 }
 0x531   :  { %5940 = vmatprep.subr.bf16.mxu0 %v7560_v42 }
 0x53b   :  { %5925 = vmatmul.mubr.msk.bf16.vlgmr.msra.gmra.mrb[8].mxu0 %vm1161_vm2, %v8106_v54 }
 0x53c   :  { %5941 = vmatpush3.bf16.msra.mxu0 %v6582_v6  ;;  %5948 = vmatprep.mubr.msk.bf16.mxu0 %vm7561_vm0, %v7560_v42 }
 0x53d   :  { %5942 = vmatprep.subr.bf16.mxu0 %v7560_v42 }
 0x540   :  { %5943 = vmatpush3.bf16.msra.mxu0 %v6584_v7 }
 0x541   :  { %5944 = vmatprep.subr.bf16.mxu0 %v7560_v42 }
 0x544   :  { %5945 = vmatpush3.bf16.msra.mxu0 %v6586_v9 }
 0x545   :  { %5946 = vmatprep.subr.bf16.mxu0 %v7560_v42 }
 0x548   :  { %5947 = vmatpush3.bf16.msra.mxu0 %v6588_v11 }
 0x549   :  { %5964 = vmatprep.subr.bf16.mxu0 %v7560_v42 }
 0x60e   :  { %v1499_v13 = vpop.f32.mrb[8].mxu0 }
 0x60f   :  { %v6332_v14 = vadd.f32 %v5439_v12, %v1499_v13  ;;  %v5926_v15 = vpop.f32.mrb[9].mxu0 }
 0x610   :  { %v1502_v16 = vpop.f32.mrb[10].mxu0  ;;  %v2107_v15 = vld [vmem:[#allocation29] sm:$0xff] }
 0x611   :  { %v1506_v17 = vmax.f32 %v6332_v14, 0.0  ;;  %v5927_v18 = vpop.f32.mrb[11].mxu0  ;;  %v1957_v16 = vld [vmem:[#allocation28] sm:$0xff] }
 0x613   :  { %v1515_v19 = vpack.c.bf16 %v1506_v17, %v1506_v17 }
 0x615   :  { %5937 = vmatmul.mubr.msk.bf16.vlgmr.msra.gmra.mrb[20].mxu1 %vm1547_vm5, %v1515_v19  ;;  %5949 = vmatmul.mubr.msk.bf16.vlgmr.msra.gmra.mrb[12].mxu0 %vm1547_vm5, %v1515_v19 }
 0x616   :  { %5954 = vmatprep.mubr.msk.bf16.mxu1 %vm7561_vm0, %v7560_v42  ;;  %5972 = vmatprep.mubr.msk.bf16.mxu0 %vm7561_vm0, %v7560_v42 }
 0x617   :  { %5953 = vmatpush3.bf16.msra.mxu1 %v1691_v21  ;;  %5965 = vmatpush3.bf16.msra.mxu0 %v6589_v22  ;;  %v2106_v22 = vld [vmem:[#allocation26] sm:$0xff] }
 0x618   :  { %5958 = vmatprep.subr.bf16.mxu1 %v7560_v42  ;;  %5966 = vmatprep.subr.bf16.mxu0 %v7560_v42 }
 0x61b   :  { %5967 = vmatpush3.bf16.msra.mxu0 %v6591_v23  ;;  %v1956_v23 = vld [vmem:[#allocation25] sm:$0xff] }
 0x61c   :  { %5968 = vmatprep.subr.bf16.mxu0 %v7560_v42 }
 0x61f   :  { %5969 = vmatpush3.bf16.msra.mxu0 %v6593_v49 }
 0x620   :  { %5970 = vmatprep.subr.bf16.mxu0 %v7560_v42 }
 0x623   :  { %5971 = vmatpush3.bf16.msra.mxu0 %v6595_v51  ;;  %v2528_v51 = vld [vmem:[#allocation22 + $0x4] sm:$0xf] }
 0x624   :  { %5988 = vmatprep.subr.mxu0 %v7560_v42 }
 0x6e8   :  { %v1585_v25 = vpop.f32.mrb[20].mxu1  ;;  %v1668_v26 = vpop.f32.mrb[12].mxu0 }
 0x6e9   :  { %v1586_v27 = vadd.f32 %v5442_v24, %v1585_v25  ;;  %v5938_v28 = vpop.f32.mrb[21].mxu1  ;;  %v5950_v29 = vpop.f32.mrb[13].mxu0  ;;  %v1669_v40 = vadd.f32 %v5448_v38, %v1668_v26  ;;  %v6597_v26 = vld [vmem:[#allocation19 + $0x20] sm:$0xff]   ;;  %v6601_v38 = vld [vmem:[#allocation19 + $0x30] sm:$0xff]  }
 0x6ea   :  { %v1588_v30 = vpop.f32.mrb[22].mxu1  ;;  %v1671_v31 = vpop.f32.mrb[14].mxu0  ;;  %v2308_v28 = vld [vmem:[#allocation17 + $0x4] sm:$0xf] }
 0x6eb   :  { %v1592_v32 = vmul.f32 0.4, %v1586_v27  ;;  %v5939_v33 = vpop.f32.mrb[23].mxu1  ;;  %v5951_v34 = vpop.f32.mrb[15].mxu0  ;;  %v6599_v27 = vld [vmem:[#allocation19 + $0x28] sm:$0xff]  }
 0x6ec   :  { %v2310_v34 = vsel %vm1165_vm1, %v2308_v28, 0 }
 0x6ed   :  { %6647 = vtanh.f32 %v1592_v32 }
 0x6f7   :  { %v6648_v35 = vpop.eup %6647 }
 0x6f8   :  { %v8177_v36 = vmul.f32 2.5, %v6648_v35  ;;  %v6598_v35 = vld [vmem:[#allocation20 + $0x20] sm:$0xff]  }
 0x6fa   :  { %v1674_v37 = vmul.f32 1.442695, %v8177_v36 }
 0x6fc   :  { %6649 = vpow2.f32 %v1674_v37  ;;  %v6600_v37 = vld [vmem:[#allocation20 + $0x28] sm:$0xff]  }
 0x706   :  { %v6650_v39 = vpop.eup %6649 }
 0x707   :  { %v1676_v41 = vmul.f32 %v6650_v39, %v8139_v63  ;;  %v6602_v39 = vld [vmem:[#allocation20 + $0x30] sm:$0xff]  }
 0x709   :  { %v8182_v44 = vadd.f32 %v1676_v41, %v1669_v40  ;;  %v6603_v40 = vld [vmem:[#allocation19 + $0x38] sm:$0xff]  }
 0x70a   :  { %v6604_v41 = vld [vmem:[#allocation20 + $0x38] sm:$0xff]  }
 0x70b   :  { %v1679_v45 = vpack.c.bf16 %v8182_v44, %v8182_v44 }
 0x70d   :  { %5955 = vmatmul.mubr.msk.bf16.vlgmr.msra.gmra.mrb[24].mxu1 %vm1161_vm2, %v1679_v45 }
 0x70e   :  { %5959 = vmatpush3.bf16.msra.mxu1 %v1735_v46  ;;  %5960 = vmatprep.mubr.msk.bf16.mxu1 %vm7561_vm0, %v7560_v42 }
 0x70f   :  { %5976 = vmatprep.subr.bf16.mxu1 %v7560_v42 }
 0x719   :  { %5961 = vmatmul.mubr.msk.bf16.vlgmr.msra.gmra.mrb[24].mxu1 %vm1161_vm2, %v8106_v54 }
 0x71a   :  { %5977 = vmatpush3.bf16.msra.mxu1 %v6590_v47  ;;  %5984 = vmatprep.mubr.msk.bf16.mxu1 %vm7561_vm0, %v7560_v42 }
 0x71b   :  { %5978 = vmatprep.subr.bf16.mxu1 %v7560_v42 }
 0x71e   :  { %5979 = vmatpush3.bf16.msra.mxu1 %v6592_v48 }
 0x71f   :  { %5980 = vmatprep.subr.bf16.mxu1 %v7560_v42 }
 0x722   :  { %5981 = vmatpush3.bf16.msra.mxu1 %v6594_v50 }
 0x723   :  { %5982 = vmatprep.subr.bf16.mxu1 %v7560_v42 }
 0x726   :  { %5983 = vmatpush3.bf16.msra.mxu1 %v6596_v52  ;;  %v2542_v52 = vsel %vm1165_vm1, %v2528_v51, 0 }
 0x727   :  { %5998 = vmatprep.subr.mxu1 %v7560_v42 }
 0x7ec   :  { %v1771_v55 = vpop.f32.mrb[24].mxu1 }
 0x7ed   :  { %v6333_v56 = vadd.f32 %v5454_v53, %v1771_v55  ;;  %v5962_v57 = vpop.f32.mrb[25].mxu1  ;;  %v6605_v53 = vld [vmem:[%s8762_s19 + $0x20] sm:$0xff]   ;;  %v6607_v55 = vld [vmem:[%s8762_s19 + $0x28] sm:$0xff]  }
 0x7ee   :  { %v1774_v58 = vpop.f32.mrb[26].mxu1 }
 0x7ef   :  { %v1778_v59 = vmax.f32 %v6333_v56, 0.0  ;;  %v5963_v60 = vpop.f32.mrb[27].mxu1  ;;  %v5478_v56 = vld [vmem:[%s8763_s7 + $0x1] ss:$0 sm:$0xff] }
 0x7f1   :  { %v1787_v61 = vpack.c.bf16 %v1778_v59, %v1778_v59 }
 0x7f3   :  { %5973 = vmatmul.mubr.msk.bf16.vlgmr.msra.gmra.mrb[16].mxu0 %vm1547_vm5, %v1787_v61  ;;  %5985 = vmatmul.mubr.msk.bf16.vlgmr.msra.gmra.mrb[28].mxu1 %vm1547_vm5, %v1787_v61 }
 0x7f4   :  { %5990 = vmatprep.mubr.msk.f32.mxu0 %vm7561_vm0, %v7560_v42  ;;  %6000 = vmatprep.mubr.msk.f32.mxu1 %vm7561_vm0, %v7560_v42 }
 0x7f5   :  { %5999 = vmatpush3.msra.mxu1 %v2107_v15  ;;  %5989 = vmatpush3.msra.mxu0 %v1957_v16  ;;  %v6606_v16 = vld [vmem:[%s8765_s25 + $0x20] sm:$0xff]  }
 0x7f6   :  { %6003 = vmatprep.subr.mxu1 %v7560_v42  ;;  %5993 = vmatprep.subr.mxu0 %v7560_v42 }
 0x8c6   :  { %v1856_v1 = vpop.f32.mrb[16].mxu0  ;;  %v1938_v2 = vpop.f32.mrb[28].mxu1 }
 0x8c7   :  { %v1857_v3 = vadd.f32 %v5457_v62, %v1856_v1  ;;  %v5974_v4 = vpop.f32.mrb[17].mxu0  ;;  %v5986_v5 = vpop.f32.mrb[29].mxu1  ;;  %v1939_v6 = vadd.f32 %v5463_v0, %v1938_v2 }
 0x8c8   :  { %v1859_v7 = vpop.f32.mrb[18].mxu0  ;;  %v1941_v8 = vpop.f32.mrb[30].mxu1 }
 0x8c9   :  { %v1862_v9 = vmul.f32 0.4, %v1857_v3  ;;  %v5975_v10 = vpop.f32.mrb[19].mxu0  ;;  %1952 = vrot.lane.b32.xlu1 %v1939_v6, %s7535_s3  ;;  %v5987_v11 = vpop.f32.mrb[31].mxu1  ;;  %v5485_v7 = vld [vmem:[%s8764_s10 + $0x1] ss:$0 sm:$0xff] }
 0x8ca   :  { %v2585_v11 = vld [vmem:[#allocation23 + $0x4] sm:$0xf] }
 0x8cb   :  { %6651 = vtanh.f32 %v1862_v9  ;;  %v2587_v15 = vsel %vm1165_vm1, %v2585_v11, 0 }
 0x8d5   :  { %v6652_v12 = vpop.eup %6651 }
 0x8d6   :  { %v8217_v13 = vmul.f32 2.5, %v6652_v12 }
 0x8d8   :  { %v1944_v14 = vmul.f32 1.442695, %v8217_v13 }
 0x8da   :  { %6653 = vpow2.f32 %v1944_v14 }
 0x8e4   :  { %v6654_v17 = vpop.eup %6653 }
 0x8e5   :  { %1947 = vrot.lane.b32.xlu0 %v6654_v17, %s7535_s3  ;;  %v6608_v17 = vld [vmem:[%s8765_s25 + $0x28] sm:$0xff]  }
 0x93b   :  { %v1953_v20 = vpop.permute.xlu1 %1952 }
 0x957   :  { %v1948_v18 = vpop.permute.xlu0 %1947 }
 0x958   :  { %v1950_v19 = vmul.f32 %v1948_v18, %v8139_v63  ;;  %v2251_v63 = vld [vmem:[#allocation16 + $0x4] sm:$0xf]  ;;  %v6609_v18 = vld [vmem:[%s8762_s19 + $0x30] sm:$0xff]  }
 0x959   :  { %v2265_v25 = vsel %vm1165_vm1, %v2251_v63, 0 }
 0x95a   :  { %v1955_v21 = vadd.f32 %v1953_v20, %v1950_v19  ;;  %v6610_v19 = vld [vmem:[%s8765_s25 + $0x30] sm:$0xff]   ;;  %v6611_v20 = vld [vmem:[%s8762_s19 + $0x38] sm:$0xff]  }
 0x95c   :  { %1959 = vrot.lane.b32.xlu1 %v1955_v21, %s7562_s4  ;;  %v6612_v21 = vld [vmem:[%s8765_s25 + $0x38] sm:$0xff]  }
 0x9ce   :  { %v1960_v24 = vpop.permute.xlu1 %1959 }
 0x9cf   :  { %5991 = vmatmul.mubr.msk.f32.vlgmr.msra.gmra.mrb[20].mxu0 %vm1161_vm2, %v1960_v24  ;;  %6001 = vmatmul.mubr.msk.f32.vlgmr.msra.gmra.mrb[32].mxu1 %vm1161_vm2, %v1960_v24 }
 0x9d0   :  { %6004 = vmatpush3.msra.mxu1 %v2106_v22  ;;  %5994 = vmatpush3.msra.mxu0 %v1956_v23  ;;  %v5492_v22 = vld [vmem:[%s8766_s11 + $0x1] ss:$0 sm:$0xff] }
 0x9d1   :  { %5995 = vmatprep.mubr.msk.f32.mxu0 %vm7561_vm0, %v7560_v42  ;;  %6005 = vmatprep.mubr.msk.f32.mxu1 %vm7561_vm0, %v7560_v42 }
 0x9d2   :  { %6008 = vmatprep.subr.bf16.mxu0 %v7560_v42  ;;  %6020 = vmatprep.subr.bf16.mxu1 %v7560_v42 }
 0x9d7   :  { %5996 = vmatmul.mubr.msk.f32.vlgmr.msra.gmra.mrb[20].mxu0 %vm1161_vm2, %v8182_v44  ;;  %6006 = vmatmul.mubr.msk.f32.vlgmr.msra.gmra.mrb[32].mxu1 %vm1161_vm2, %v8182_v44 }
 0x9d8   :  { %6009 = vmatpush3.bf16.msra.mxu0 %v2265_v25  ;;  %6010 = vmatprep.mubr.msk.bf16.mxu0 %vm7561_vm0, %v7560_v42 }
 0x9d9   :  { %6014 = vmatprep.subr.bf16.mxu0 %v7560_v42  ;;  %6028 = vmatprep.mubr.msk.bf16.mxu1 %vm7561_vm0, %v7560_v42 }
 0x9da   :  { %6021 = vmatpush3.bf16.msra.mxu1 %v6597_v26 }
 0x9db   :  { %6022 = vmatprep.subr.bf16.mxu1 %v7560_v42 }
 0x9de   :  { %6023 = vmatpush3.bf16.msra.mxu1 %v6599_v27 }
 0x9df   :  { %6024 = vmatprep.subr.bf16.mxu1 %v7560_v42 }
 0x9e2   :  { %6025 = vmatpush3.bf16.msra.mxu1 %v6601_v38 }
 0x9e3   :  { %6026 = vmatprep.subr.bf16.mxu1 %v7560_v42 }
 0x9e6   :  { %6027 = vmatpush3.bf16.msra.mxu1 %v6603_v40 }
 0x9e7   :  { %6044 = vmatprep.subr.bf16.mxu1 %v7560_v42 }
 0xaaa   :  { %v8245_v29 = vpop.f32.mrb[20].mxu0  ;;  %v8247_v30 = vpop.f32.mrb[32].mxu1 }
 0xaab   :  { %v2252_v31 = vpack.c.bf16 %v8247_v30, %v8247_v30  ;;  %v5997_v32 = vpop.f32.mrb[21].mxu0  ;;  %v6007_v33 = vpop.f32.mrb[33].mxu1 }
 0xaac   :  { %v8319_v32 = vld [vmem:[#allocation5] sm:$0xf] }
 0xaad   :  { %6011 = vmatmul.mubr.msk.bf16.vlgmr.msra.gmra.mrb[24].mxu0 %vm1161_vm2, %v2252_v31  ;;  %v2957_v31 = vld [vmem:[#allocation29 + $0x8] sm:$0xff]  ;;  %v3120_v33 = vpack.c.bf16 %v8319_v32, %v8319_v32 }
 0xaae   :  { %6015 = vmatpush3.bf16.msra.mxu0 %v2310_v34  ;;  %6016 = vmatprep.mubr.msk.bf16.mxu0 %vm7561_vm0, %v7560_v42  ;;  %v5504_v34 = vld [vmem:[%s8767_s15 + $0x1] ss:$0 sm:$0xff] }
 0xaaf   :  { %6032 = vmatprep.subr.bf16.mxu0 %v7560_v42  ;;  %3129 = vrot.lane.b32.xlu0 %v3120_v33, %s7563_s30  ;;  %v5534_v33 = vld [vmem:[%s8774_s13] ss:$0 sm:$0xff] }
 0xab9   :  { %6017 = vmatmul.mubr.msk.bf16.vlgmr.msra.gmra.mrb[24].mxu0 %vm1161_vm2, %v8106_v54 }
 0xaba   :  { %6033 = vmatpush3.bf16.msra.mxu0 %v6598_v35  ;;  %6040 = vmatprep.mubr.msk.bf16.mxu0 %vm7561_vm0, %v7560_v42 }
 0xabb   :  { %6034 = vmatprep.subr.bf16.mxu0 %v7560_v42 }
 0xabe   :  { %6035 = vmatpush3.bf16.msra.mxu0 %v6600_v37 }
 0xabf   :  { %6036 = vmatprep.subr.bf16.mxu0 %v7560_v42 }
 0xac2   :  { %6037 = vmatpush3.bf16.msra.mxu0 %v6602_v39 }
 0xac3   :  { %6038 = vmatprep.subr.bf16.mxu0 %v7560_v42 }
 0xac6   :  { %6039 = vmatpush3.bf16.msra.mxu0 %v6604_v41 }
 0xac7   :  { %6056 = vmatprep.subr.bf16.mxu0 %v7560_v42 }
 0xb8c   :  { %v2346_v44 = vpop.f32.mrb[24].mxu0 }
 0xb8d   :  { %v6334_v45 = vadd.f32 %v5474_v43, %v2346_v44  ;;  %v6018_v46 = vpop.f32.mrb[25].mxu0 }
 0xb8e   :  { %v2349_v47 = vpop.f32.mrb[26].mxu0 }
 0xb8f   :  { %v2353_v48 = vmax.f32 %v6334_v45, 0.0  ;;  %v6019_v49 = vpop.f32.mrb[27].mxu0 }
 0xb91   :  { %v2363_v50 = vpack.c.bf16 %v2353_v48, %v2353_v48 }
 0xb93   :  { %6029 = vmatmul.mubr.msk.bf16.vlgmr.msra.gmra.mrb[36].mxu1 %vm1547_vm5, %v2363_v50  ;;  %6041 = vmatmul.mubr.msk.bf16.vlgmr.msra.gmra.mrb[28].mxu0 %vm1547_vm5, %v2363_v50  ;;  %v5519_v50 = vld [vmem:[%s8768_s5 + $0x1] ss:$0 sm:$0xff] }
 0xb94   :  { %6046 = vmatprep.mubr.msk.bf16.mxu1 %vm7561_vm0, %v7560_v42  ;;  %6064 = vmatprep.mubr.msk.bf16.mxu0 %vm7561_vm0, %v7560_v42 }
 0xb95   :  { %6045 = vmatpush3.bf16.msra.mxu1 %v2542_v52  ;;  %6057 = vmatpush3.bf16.msra.mxu0 %v6605_v53 }
 0xb96   :  { %6050 = vmatprep.subr.bf16.mxu1 %v7560_v42  ;;  %6058 = vmatprep.subr.bf16.mxu0 %v7560_v42 }
 0xb99   :  { %6059 = vmatpush3.bf16.msra.mxu0 %v6607_v55 }
 0xb9a   :  { %6060 = vmatprep.subr.bf16.mxu0 %v7560_v42 }
 0xb9d   :  { %6061 = vmatpush3.bf16.msra.mxu0 %v6609_v18 }
 0xb9e   :  { %6062 = vmatprep.subr.bf16.mxu0 %v7560_v42 }
 0xba1   :  { %6063 = vmatpush3.bf16.msra.mxu0 %v6611_v20 }
 0xba2   :  { %6080 = vmatprep.subr.mxu0 %v7560_v42 }
 0xc66   :  { %v2433_v57 = vpop.f32.mrb[36].mxu1  ;;  %v2517_v58 = vpop.f32.mrb[28].mxu0 }
 0xc67   :  { %v2434_v59 = vadd.f32 %v5478_v56, %v2433_v57  ;;  %v6030_v60 = vpop.f32.mrb[37].mxu1  ;;  %v6042_v61 = vpop.f32.mrb[29].mxu0  ;;  %v2518_v9 = vadd.f32 %v5485_v7, %v2517_v58  ;;  %v2805_v56 = vld [vmem:[#allocation25 + $0x8] sm:$0xff]  ;;  %v2955_v57 = vld [vmem:[#allocation26 + $0x8] sm:$0xff]  ;;  %v3119_v58 = vld [vmem:[#allocation31] sm:$0x1] }
 0xc68   :  { %v2436_v62 = vpop.f32.mrb[38].mxu1  ;;  %v2520_v0 = vpop.f32.mrb[30].mxu0 }
 0xc69   :  { %v2439_v1 = vmul.f32 0.4, %v2434_v59  ;;  %v6031_v2 = vpop.f32.mrb[39].mxu1  ;;  %v6043_v3 = vpop.f32.mrb[31].mxu0  ;;  %v3179_v59 = vld [vmem:[#allocation32] sm:$0xf] }
 0xc6a   :  { %v3130_v60 = vpop.permute.xlu0 %3129  ;;  %v3181_v61 = vsel %vm1165_vm1, %v3179_v59, 0  ;;  %v3224_v62 = vld [vmem:[#allocation34] sm:$0xf]  ;;  %v6614_v2 = vld [vmem:[%s8769_s18 + $0x8] sm:$0xff]   ;;  %v6615_v3 = vld [vmem:[%s8769_s18 + $0x10] sm:$0xff]  }
 0xc6b   :  { %6655 = vtanh.f32 %v2439_v1  ;;  %v3229_v0 = vsel %vm1165_vm1, %v3224_v62, 0  ;;  %v6613_v1 = vld [vmem:[%s8769_s18] sm:$0xff]   ;;  %v6624_v62 = vld [vmem:[%s8773_s16 + $0x18] sm:$0xff]  }
 0xc75   :  { %v6656_v4 = vpop.eup %6655 }
 0xc76   :  { %v8280_v5 = vmul.f32 2.5, %v6656_v4  ;;  %v3272_v4 = vld [vmem:[#allocation35] sm:$0xf] }
 0xc77   :  { %v3277_v11 = vsel %vm1165_vm1, %v3272_v4, 0 }
 0xc78   :  { %v2523_v6 = vmul.f32 1.442695, %v8280_v5 }
 0xc7a   :  { %6657 = vpow2.f32 %v2523_v6 }
 0xc84   :  { %v6658_v8 = vpop.eup %6657 }
 0xc85   :  { %v2525_v10 = vmul.f32 %v6658_v8, %v8245_v29  ;;  %v2807_v29 = vld [vmem:[#allocation28 + $0x8] sm:$0xff] }
 0xc87   :  { %v8285_v12 = vadd.f32 %v2525_v10, %v2518_v9 }
 0xc89   :  { %v2529_v14 = vpack.c.bf16 %v8285_v12, %v8285_v12 }
 0xc8b   :  { %6047 = vmatmul.mubr.msk.bf16.vlgmr.msra.gmra.mrb[40].mxu1 %vm1161_vm2, %v2529_v14  ;;  %v6616_v14 = vld [vmem:[%s8769_s18 + $0x18] sm:$0xff]  }
 0xc8c   :  { %6051 = vmatpush3.bf16.msra.mxu1 %v2587_v15  ;;  %6052 = vmatprep.mubr.msk.bf16.mxu1 %vm7561_vm0, %v7560_v42  ;;  %v5529_v15 = vld [vmem:[%s8770_s20] ss:$0 sm:$0xff] }
 0xc8d   :  { %6068 = vmatprep.subr.bf16.mxu1 %v7560_v42 }
 0xc97   :  { %6053 = vmatmul.mubr.msk.bf16.vlgmr.msra.gmra.mrb[40].mxu1 %vm1161_vm2, %v8106_v54 }
 0xc98   :  { %6069 = vmatpush3.bf16.msra.mxu1 %v6606_v16  ;;  %6076 = vmatprep.mubr.msk.bf16.mxu1 %vm7561_vm0, %v7560_v42 }
 0xc99   :  { %6070 = vmatprep.subr.bf16.mxu1 %v7560_v42 }
 0xc9c   :  { %6071 = vmatpush3.bf16.msra.mxu1 %v6608_v17 }
 0xc9d   :  { %6072 = vmatprep.subr.bf16.mxu1 %v7560_v42 }
 0xca0   :  { %6073 = vmatpush3.bf16.msra.mxu1 %v6610_v19 }
 0xca1   :  { %6074 = vmatprep.subr.bf16.mxu1 %v7560_v42 }
 0xca4   :  { %6075 = vmatpush3.bf16.msra.mxu1 %v6612_v21 }
 0xca5   :  { %6090 = vmatprep.subr.mxu1 %v7560_v42 }
 0xd6a   :  { %v2623_v23 = vpop.f32.mrb[40].mxu1 }
 0xd6b   :  { %v6335_v24 = vadd.f32 %v5492_v22, %v2623_v23  ;;  %v6054_v63 = vpop.f32.mrb[41].mxu1  ;;  %v6617_v22 = vld [vmem:[%s8771_s24] sm:$0xff]  }
 0xd6c   :  { %v2626_v25 = vpop.f32.mrb[42].mxu1  ;;  %v6619_v63 = vld [vmem:[%s8771_s24 + $0x10] sm:$0xff]  }
 0xd6d   :  { %v2630_v26 = vmax.f32 %v6335_v24, 0.0  ;;  %v6055_v27 = vpop.f32.mrb[43].mxu1  ;;  %v6618_v24 = vld [vmem:[%s8771_s24 + $0x8] sm:$0xff]   ;;  %v6620_v25 = vld [vmem:[%s8771_s24 + $0x18] sm:$0xff]  }
 0xd6f   :  { %v2640_v28 = vpack.c.bf16 %v2630_v26, %v2630_v26  ;;  %v3490_v26 = vld [vmem:[%s8772_s27] sm:$0x1] }
 0xd70   :  { %v3503_v27 = vsel %vm3135_vm6, %v3490_v26, 0 }
 0xd71   :  { %6065 = vmatmul.mubr.msk.bf16.vlgmr.msra.gmra.mrb[32].mxu0 %vm1547_vm5, %v2640_v28  ;;  %6077 = vmatmul.mubr.msk.bf16.vlgmr.msra.gmra.mrb[44].mxu1 %vm1547_vm5, %v2640_v28  ;;  %v6621_v28 = vld [vmem:[%s8773_s16] sm:$0xff]  }
 0xd72   :  { %6082 = vmatprep.mubr.msk.f32.mxu0 %vm7561_vm0, %v7560_v42  ;;  %6092 = vmatprep.mubr.msk.f32.mxu1 %vm7561_vm0, %v7560_v42 }
 0xd73   :  { %6081 = vmatpush3.msra.mxu0 %v2807_v29  ;;  %6091 = vmatpush3.msra.mxu1 %v2957_v31  ;;  %v6622_v29 = vld [vmem:[%s8773_s16 + $0x8] sm:$0xff]   ;;  %v6623_v31 = vld [vmem:[%s8773_s16 + $0x10] sm:$0xff]  }
 0xd74   :  { %6085 = vmatprep.subr.mxu0 %v7560_v42  ;;  %6095 = vmatprep.subr.mxu1 %v7560_v42 }
 0xe44   :  { %v2710_v35 = vpop.f32.mrb[32].mxu0  ;;  %v2794_v37 = vpop.f32.mrb[44].mxu1 }
 0xe45   :  { %v2711_v38 = vadd.f32 %v5504_v34, %v2710_v35  ;;  %v6066_v39 = vpop.f32.mrb[33].mxu0  ;;  %v6078_v40 = vpop.f32.mrb[45].mxu1  ;;  %v2795_v52 = vadd.f32 %v5519_v50, %v2794_v37  ;;  %v5540_v50 = vld [vmem:[%s8775_s22] ss:$0 sm:$0xff] }
 0xe46   :  { %v2713_v41 = vpop.f32.mrb[34].mxu0  ;;  %v2797_v43 = vpop.f32.mrb[46].mxu1 }
 0xe47   :  { %v2716_v44 = vmul.f32 0.4, %v2711_v38  ;;  %v6067_v45 = vpop.f32.mrb[35].mxu0  ;;  %v6079_v46 = vpop.f32.mrb[47].mxu1 }
 0xe49   :  { %6659 = vtanh.f32 %v2716_v44 }
 0xe53   :  { %v6660_v47 = vpop.eup %6659 }
 0xe54   :  { %v8325_v48 = vmul.f32 2.5, %v6660_v47 }
 0xe56   :  { %v2800_v49 = vmul.f32 1.442695, %v8325_v48 }
 0xe58   :  { %6661 = vpow2.f32 %v2800_v49 }
 0xe62   :  { %v6662_v51 = vpop.eup %6661 }
 0xe63   :  { %v2802_v53 = vmul.f32 %v6662_v51, %v8247_v30  ;;  %v3137_v30 = vsel %vm3135_vm6, %v3119_v58, 0 }
 0xe65   :  { %v2803_v55 = vadd.f32 %v2802_v53, %v2795_v52 }
 0xe67   :  { %6083 = vmatmul.mubr.msk.f32.vlgmr.msra.gmra.mrb[22].mxu0 %vm1161_vm2, %v2803_v55  ;;  %6093 = vmatmul.mubr.msk.f32.vlgmr.msra.gmra.mrb[34].mxu1 %vm1161_vm2, %v2803_v55  ;;  %v3545_v55 = vld [vmem:[#allocation37] sm:$0xf] }
 0xe68   :  { %6086 = vmatpush3.msra.mxu0 %v2805_v56  ;;  %6087 = vmatprep.mubr.msk.f32.mxu0 %vm7561_vm0, %v7560_v42  ;;  %v3547_v58 = vsel %vm1165_vm1, %v3545_v55, 0  ;;  %v6629_v55 = vld [vmem:[%s8769_s18 + $0x20] sm:$0xff]  }
 0xe69   :  { %6096 = vmatpush3.msra.mxu1 %v2955_v57  ;;  %6097 = vmatprep.mubr.msk.f32.mxu1 %vm7561_vm0, %v7560_v42 }
 0xe6a   :  { %6100 = vmatprep.subr.bf16.mxu0 %v7560_v42  ;;  %6124 = vmatprep.subr.bf16.mxu1 %v7560_v42 }
 0xe6f   :  { %6088 = vmatmul.mubr.msk.f32.vlgmr.msra.gmra.mrb[22].mxu0 %vm1161_vm2, %v8285_v12  ;;  %6098 = vmatmul.mubr.msk.f32.vlgmr.msra.gmra.mrb[34].mxu1 %vm1161_vm2, %v8285_v12 }
 0xe70   :  { %6101 = vmatpush3.bf16.msra.mxu0 %v3137_v30  ;;  %6102 = vmatprep.mubr.msk.bf16.mxu0 %vm7561_vm0, %v7560_v42  ;;  %v3590_v30 = vld [vmem:[#allocation38] sm:$0xf] }
 0xe71   :  { %6106 = vmatprep.subr.bf16.mxu0 %v7560_v42  ;;  %6132 = vmatprep.mubr.msk.bf16.mxu1 %vm7561_vm0, %v7560_v42  ;;  %v3592_v59 = vsel %vm1165_vm1, %v3590_v30, 0  ;;  %v4223_v30 = vld [vmem:[#allocation32 + $0x4] sm:$0xf] }
 0xe72   :  { %6125 = vmatpush3.bf16.msra.mxu1 %v6613_v1 }
 0xe73   :  { %6103 = vmatmul.mubr.msk.bf16.vlgmr.msra.gmra.mrb[36].mxu0 %vm3131_vm7, %v3130_v60  ;;  %6126 = vmatprep.subr.bf16.mxu1 %v7560_v42  ;;  %v3635_v60 = vld [vmem:[#allocation40] sm:$0xf] }
 0xe74   :  { %6107 = vmatpush3.bf16.msra.mxu0 %v3181_v61  ;;  %6108 = vmatprep.mubr.msk.bf16.mxu0 %vm7561_vm0, %v7560_v42  ;;  %v3637_v61 = vsel %vm1165_vm1, %v3635_v60, 0 }
 0xe75   :  { %6112 = vmatprep.subr.bf16.mxu0 %v7560_v42 }
 0xe76   :  { %6127 = vmatpush3.bf16.msra.mxu1 %v6614_v2 }
 0xe77   :  { %6128 = vmatprep.subr.bf16.mxu1 %v7560_v42 }
 0xe7a   :  { %6129 = vmatpush3.bf16.msra.mxu1 %v6615_v3 }
 0xe7b   :  { %6130 = vmatprep.subr.bf16.mxu1 %v7560_v42 }
 0xe7e   :  { %6131 = vmatpush3.bf16.msra.mxu1 %v6616_v14 }
 0xe7f   :  { %6109 = vmatmul.mubr.msk.bf16.vlgmr.msra.gmra.mrb[36].mxu0 %vm1161_vm2, %v8106_v54  ;;  %6136 = vmatprep.subr.bf16.mxu1 %v7560_v42 }
 0xe80   :  { %6113 = vmatpush3.bf16.msra.mxu0 %v3229_v0  ;;  %6114 = vmatprep.mubr.msk.bf16.mxu0 %vm7561_vm0, %v7560_v42  ;;  %v5546_v0 = vld [vmem:[%s8776_s14] ss:$0 sm:$0xff] }
 0xe81   :  { %6118 = vmatprep.subr.bf16.mxu0 %v7560_v42 }
 0xf42   :  { %v8365_v6 = vpop.f32.mrb[22].mxu0  ;;  %v8367_v7 = vpop.f32.mrb[34].mxu1 }
 0xf43   :  { %v8371_v8 = vpack.c.bf16 %v8365_v6, %v8365_v6  ;;  %v6089_v9 = vpop.f32.mrb[23].mxu0  ;;  %v6099_v10 = vpop.f32.mrb[35].mxu1  ;;  %v8381_v12 = vpack.c.bf16 %v8367_v7, %v8367_v7 }
 0xf45   :  { %6115 = vmatmul.mubr.msk.bf16.vlgmr.msra.gmra.mrb[36].mxu0 %vm1161_vm2, %v8371_v8 }
 0xf46   :  { %6119 = vmatpush3.bf16.msra.mxu0 %v3277_v11  ;;  %6120 = vmatprep.mubr.msk.bf16.mxu0 %vm7561_vm0, %v7560_v42  ;;  %v6625_v11 = vld [vmem:[%s8777_s2] sm:$0xff]  }
 0xf47   :  { %6148 = vmatprep.subr.bf16.mxu0 %v7560_v42 }
 0xf51   :  { %6121 = vmatmul.mubr.msk.bf16.vlgmr.msra.gmra.mrb[36].mxu0 %vm1161_vm2, %v8381_v12 }
 0xf52   :  { %6150 = vmatprep.mubr.msk.bf16.mxu0 %vm7561_vm0, %v7560_v42  ;;  %6149 = vmatpush3.bf16.msra.mxu0 %v3503_v27 }
 0xf53   :  { %6154 = vmatprep.subr.bf16.mxu0 %v7560_v42 }
0x1024   :  { %v3313_v16 = vpop.f32.mrb[36].mxu0 }
0x1025   :  { %v6336_v17 = vadd.f32 %v5529_v15, %v3313_v16  ;;  %v6122_v18 = vpop.f32.mrb[37].mxu0  ;;  %v6626_v15 = vld [vmem:[%s8777_s2 + $0x8] sm:$0xff]   ;;  %v6627_v16 = vld [vmem:[%s8777_s2 + $0x10] sm:$0xff]  }
0x1026   :  { %v3316_v19 = vpop.f32.mrb[38].mxu0  ;;  %v5551_v18 = vld [vmem:[%s8778_s1] ss:$0 sm:$0xff] }
0x1027   :  { %v3320_v20 = vmax.f32 %v6336_v17, 0.0  ;;  %v6123_v21 = vpop.f32.mrb[39].mxu0  ;;  %v6628_v17 = vld [vmem:[%s8777_s2 + $0x18] sm:$0xff]  }
0x1029   :  { %v3329_v23 = vpack.c.bf16 %v3320_v20, %v3320_v20 }
0x102b   :  { %6133 = vmatmul.mubr.msk.bf16.vlgmr.msra.gmra.mrb[48].mxu1 %vm1547_vm5, %v3329_v23 }
0x102c   :  { %6137 = vmatpush3.bf16.msra.mxu1 %v6617_v22  ;;  %6144 = vmatprep.mubr.msk.bf16.mxu1 %vm7561_vm0, %v7560_v42 }
0x102d   :  { %6138 = vmatprep.subr.bf16.mxu1 %v7560_v42 }
0x1030   :  { %6139 = vmatpush3.bf16.msra.mxu1 %v6618_v24 }
0x1031   :  { %6140 = vmatprep.subr.bf16.mxu1 %v7560_v42 }
0x1034   :  { %6141 = vmatpush3.bf16.msra.mxu1 %v6619_v63  ;;  %v5557_v63 = vld [vmem:[%s8779_s23] ss:$0 sm:$0xff] }
0x1035   :  { %6142 = vmatprep.subr.bf16.mxu1 %v7560_v42 }
0x1038   :  { %6143 = vmatpush3.bf16.msra.mxu1 %v6620_v25 }
0x1039   :  { %6172 = vmatprep.subr.bf16.mxu1 %v7560_v42 }
0x103b   :  { %6145 = vmatmul.mubr.msk.bf16.vlgmr.msra.gmra.mrb[52].mxu1 %vm1547_vm5, %v3329_v23 }
0x103c   :  { %6180 = vmatprep.mubr.msk.bf16.mxu1 %vm7561_vm0, %v7560_v42  ;;  %6173 = vmatpush3.bf16.msra.mxu1 %v6621_v28 }
0x103d   :  { %6174 = vmatprep.subr.bf16.mxu1 %v7560_v42 }
0x1040   :  { %6175 = vmatpush3.bf16.msra.mxu1 %v6622_v29 }
0x1041   :  { %6176 = vmatprep.subr.bf16.mxu1 %v7560_v42 }
0x1044   :  { %6177 = vmatpush3.bf16.msra.mxu1 %v6623_v31 }
0x1045   :  { %6178 = vmatprep.subr.bf16.mxu1 %v7560_v42 }
0x1048   :  { %6179 = vmatpush3.bf16.msra.mxu1 %v6624_v62  ;;  %v4225_v62 = vsel %vm1165_vm1, %v4223_v30, 0 }
0x1049   :  { %6184 = vmatprep.subr.bf16.mxu1 %v7560_v42 }
0x10fe   :  { %v3398_v34 = vpop.f32.mrb[48].mxu1 }
0x10ff   :  { %v3399_v35 = vadd.f32 %v5534_v33, %v3398_v34  ;;  %v6134_v37 = vpop.f32.mrb[49].mxu1 }
0x1100   :  { %v3401_v38 = vpop.f32.mrb[50].mxu1  ;;  %v3098_v37 = vadd.f32 %v8280_v5, %v8177_v36  ;;  %v3858_v5 = vld [vmem:[#allocation41] sm:$0x3] }
0x1101   :  { %v3404_v39 = vmul.f32 0.4, %v3399_v35  ;;  %v6135_v40 = vpop.f32.mrb[51].mxu1 }
0x1102   :  { %v3107_v38 = vsel %vm3106_vm8, %v3098_v37, 0.0 }
0x1103   :  { %6663 = vtanh.f32 %v3404_v39  ;;  %v3859_v39 = vld [vmem:[#allocation44] sm:$0x3] }
0x110d   :  { %v6664_v41 = vpop.eup %6663 }
0x110e   :  { %v8414_v43 = vmul.f32 2.5, %v6664_v41  ;;  %v3480_v44 = vpop.f32.mrb[52].mxu1 }
0x110f   :  { %v6146_v45 = vpop.f32.mrb[53].mxu1  ;;  %v3481_v52 = vadd.f32 %v5540_v50, %v3480_v44 }
0x1110   :  { %v3486_v46 = vmul.f32 1.442695, %v8414_v43  ;;  %v3483_v47 = vpop.f32.mrb[54].mxu1 }
0x1111   :  { %v6147_v49 = vpop.f32.mrb[55].mxu1 }
0x1112   :  { %6665 = vpow2.f32 %v3486_v46  ;;  %v3099_v46 = vadd.f32 %v8325_v48, %v8217_v13  ;;  %v4015_v13 = vld [vmem:[#allocation43] sm:$0x3] }
0x1114   :  { %v3110_v36 = vsel %vm3106_vm8, %v3099_v46, 0.0  ;;  %v5601_v46 = vld [vmem:[%s8775_s22 + $0x1] ss:$0 sm:$0xff] }
0x111c   :  { %v6666_v51 = vpop.eup %6665 }
0x111d   :  { %v3488_v53 = vmul.f32 %v6666_v51, %v8319_v32 }
0x111f   :  { %v8419_v56 = vadd.f32 %v3488_v53, %v3481_v52  ;;  %v4166_v52 = vld [vmem:[#allocation31 + $0x1] sm:$0x1] }
0x1120   :  { %v4180_v53 = vsel %vm3135_vm6, %v4166_v52, 0 }
0x1121   :  { %v3491_v57 = vpack.c.bf16 %v8419_v56, %v8419_v56 }
0x1123   :  { %6151 = vmatmul.mubr.msk.bf16.vlgmr.msra.gmra.mrb[40].mxu0 %vm3131_vm7, %v3491_v57  ;;  %v6631_v57 = vld [vmem:[%s8769_s18 + $0x30] sm:$0xff]  }
0x1124   :  { %6155 = vmatpush3.bf16.msra.mxu0 %v3547_v58  ;;  %6156 = vmatprep.mubr.msk.bf16.mxu0 %vm7561_vm0, %v7560_v42 }
0x1125   :  { %6160 = vmatprep.subr.bf16.mxu0 %v7560_v42 }
0x112f   :  { %6157 = vmatmul.mubr.msk.bf16.vlgmr.msra.gmra.mrb[40].mxu0 %vm1161_vm2, %v8106_v54 }
0x1130   :  { %6161 = vmatpush3.bf16.msra.mxu0 %v3592_v59  ;;  %6162 = vmatprep.mubr.msk.bf16.mxu0 %vm7561_vm0, %v7560_v42 }
0x1131   :  { %6166 = vmatprep.subr.bf16.mxu0 %v7560_v42 }
0x113b   :  { %6163 = vmatmul.mubr.msk.bf16.vlgmr.msra.gmra.mrb[40].mxu0 %vm1161_vm2, %v8371_v8 }
0x113c   :  { %6167 = vmatpush3.bf16.msra.mxu0 %v3637_v61  ;;  %6168 = vmatprep.mubr.msk.bf16.mxu0 %vm7561_vm0, %v7560_v42 }
0x113d   :  { %6196 = vmatprep.subr.mxu0 %v7560_v42 }
0x1147   :  { %6169 = vmatmul.mubr.msk.bf16.vlgmr.msra.gmra.mrb[40].mxu0 %vm1161_vm2, %v8381_v12 }
0x1148   :  { %6198 = vmatprep.mubr.msk.f32.mxu0 %vm7561_vm0, %v7560_v42  ;;  %6197 = vmatpush3.msk.msra.mxu0 %vm3865_vm9, %v3859_v39 }
0x1149   :  { %6201 = vmatprep.subr.mxu0 %v7560_v42 }
0x121a   :  { %v3673_v1 = vpop.f32.mrb[40].mxu0 }
0x121b   :  { %v6337_v2 = vadd.f32 %v5546_v0, %v3673_v1  ;;  %v6170_v3 = vpop.f32.mrb[41].mxu0  ;;  %v4269_v0 = vld [vmem:[#allocation34 + $0x4] sm:$0xf] }
0x121c   :  { %v3676_v4 = vpop.f32.mrb[42].mxu0  ;;  %v4271_v1 = vsel %vm1165_vm1, %v4269_v0, 0  ;;  %v6643_v0 = vld [vmem:[%s8777_s2 + $0x30] sm:$0xff]  }
0x121d   :  { %v3680_v9 = vmax.f32 %v6337_v2, 0.0  ;;  %v6171_v10 = vpop.f32.mrb[43].mxu0  ;;  %v4315_v2 = vld [vmem:[#allocation35 + $0x4] sm:$0xf]  ;;  %v6632_v4 = vld [vmem:[%s8769_s18 + $0x38] sm:$0xff]  }
0x121e   :  { %v4317_v3 = vsel %vm1165_vm1, %v4315_v2, 0  ;;  %v4906_v2 = vld [vmem:[#allocation44 + $0x2] sm:$0x3] }
0x121f   :  { %v3689_v14 = vpack.c.bf16 %v3680_v9, %v3680_v9  ;;  %v5572_v9 = vld [vmem:[%s8770_s20 + $0x1] ss:$0 sm:$0xff] }
0x1221   :  { %6181 = vmatmul.mubr.msk.bf16.vlgmr.msra.gmra.mrb[56].mxu1 %vm1547_vm5, %v3689_v14 }
0x1222   :  { %6185 = vmatpush3.bf16.msra.mxu1 %v6625_v11  ;;  %6192 = vmatprep.mubr.msk.bf16.mxu1 %vm7561_vm0, %v7560_v42 }
0x1223   :  { %6186 = vmatprep.subr.bf16.mxu1 %v7560_v42 }
0x1226   :  { %6187 = vmatpush3.bf16.msra.mxu1 %v6626_v15 }
0x1227   :  { %6188 = vmatprep.subr.bf16.mxu1 %v7560_v42 }
0x122a   :  { %6189 = vmatpush3.bf16.msra.mxu1 %v6627_v16 }
0x122b   :  { %6190 = vmatprep.subr.bf16.mxu1 %v7560_v42 }
0x122e   :  { %6191 = vmatpush3.bf16.msra.mxu1 %v6628_v17 }
0x122f   :  { %6216 = vmatprep.subr.bf16.mxu1 %v7560_v42 }
0x1231   :  { %6193 = vmatmul.mubr.msk.bf16.vlgmr.msra.gmra.mrb[60].mxu1 %vm1547_vm5, %v3689_v14 }
0x1232   :  { %6218 = vmatprep.mubr.msk.bf16.mxu1 %vm7561_vm0, %v7560_v42  ;;  %6217 = vmatpush3.bf16.msra.mxu1 %v4180_v53  ;;  %v4684_v53 = vld [vmem:[#allocation40 + $0x4] sm:$0xf] }
0x1233   :  { %6222 = vmatprep.subr.bf16.mxu1 %v7560_v42 }
0x12f4   :  { %v3758_v19 = vpop.f32.mrb[56].mxu1 }
0x12f5   :  { %v3759_v20 = vadd.f32 %v5551_v18, %v3758_v19  ;;  %v6182_v21 = vpop.f32.mrb[57].mxu1  ;;  %v6633_v18 = vld [vmem:[%s8771_s24 + $0x20] sm:$0xff]  }
0x12f6   :  { %v3761_v22 = vpop.f32.mrb[58].mxu1  ;;  %v6635_v21 = vld [vmem:[%s8771_s24 + $0x30] sm:$0xff]  }
0x12f7   :  { %v3764_v23 = vmul.f32 0.4, %v3759_v20  ;;  %v6183_v24 = vpop.f32.mrb[59].mxu1  ;;  %v6634_v20 = vld [vmem:[%s8771_s24 + $0x28] sm:$0xff]   ;;  %v6636_v22 = vld [vmem:[%s8771_s24 + $0x38] sm:$0xff]  }
0x12f9   :  { %6667 = vtanh.f32 %v3764_v23  ;;  %v5607_v23 = vld [vmem:[%s8772_s27 + $0x1] sm:$0x1] }
0x12fa   :  { %v4549_v24 = vsel %vm3135_vm6, %v5607_v23, 0 }
0x1303   :  { %v6668_v25 = vpop.eup %6667 }
0x1304   :  { %v8463_v26 = vmul.f32 2.5, %v6668_v25  ;;  %v3840_v27 = vpop.f32.mrb[60].mxu1 }
0x1305   :  { %v3841_v28 = vadd.f32 %v5557_v63, %v3840_v27  ;;  %v6194_v29 = vpop.f32.mrb[61].mxu1  ;;  %v5586_v63 = vld [vmem:[%s8774_s13 + $0x1] ss:$0 sm:$0xff] }
0x1306   :  { %v3846_v31 = vmul.f32 1.442695, %v8463_v26  ;;  %v3843_v33 = vpop.f32.mrb[62].mxu1 }
0x1307   :  { %3854 = vrot.lane.b32.xlu0 %v3841_v28, %s7541_s8  ;;  %v6195_v34 = vpop.f32.mrb[63].mxu1 }
0x1308   :  { %6669 = vpow2.f32 %v3846_v31 }
0x1312   :  { %v6670_v35 = vpop.eup %6669 }
0x1313   :  { %3849 = vrot.lane.b32.xlu1 %v6670_v35, %s7541_s8 }
0x1326   :  { %3108 = vadd.xlane.f32.xlu0 %v3107_v38 }
0x1379   :  { %v3855_v44 = vpop.permute.xlu0 %3854 }
0x1385   :  { %v3850_v40 = vpop.permute.xlu1 %3849 }
0x1386   :  { %v3852_v41 = vmul.f32 %v3850_v40, %v8319_v32  ;;  %v4016_v32 = vld [vmem:[#allocation46] sm:$0x3] }
0x1388   :  { %v3857_v45 = vadd.f32 %v3855_v44, %v3852_v41 }
0x138a   :  { %3861 = vrot.lane.b32.xlu1 %v3857_v45, %s7563_s30 }
0x13ae   :  { %3111 = vadd.xlane.f32.xlu1 %v3110_v36 }
0x13b3   :  { %v3109_v48 = vpop.xlane.xlu0 %3108 }
0x13bf   :  { %3101 = vrot.lane.b32.xlu1 %v8367_v7, %s7535_s3  ;;  %s7564_s3 = smov [#allocation48]  }
0x13c0   :  { %s5245_s26 = sshll.u32 %s7564_s3, 4  ;;  %s5246_s26 = int_to_ptr.vmem [resolvable:$true] %s5245_s26 }
0x13c1   :  { %s7317_s28 = scalar_lea.vmem %s5246_s26, 64  ;;  %p7322_p9 = scmp.lt.s32.totalorder %s5246_s26, %s5246_s26 }
0x13c2   :  { %p7318_p8 = scmp.ne.s32.totalorder %s5246_s26, %s7317_s28  ;;  %p7323_p10 = scmp.lt.s32.totalorder %s7317_s28, %s7317_s28 }
0x13c4   :  { %p7324_p11 = por %p7323_p10, %p7322_p9 }
0x13c6   :  { %p7325_p12 = pnand %p7324_p11, %p7318_p8 }
0x13fc   :  { %v3862_v47 = vpop.permute.xlu1 %3861 }
0x13fd   :  { %6199 = vmatmul.mubr.msk.f32.vlgmr.msra.gmra.mrb[44].mxu0 %vm3131_vm7, %v3862_v47 }
0x13fe   :  { %6202 = vmatpush3.msk.msra.mxu0 %vm3865_vm9, %v3858_v5  ;;  %6203 = vmatprep.mubr.msk.f32.mxu0 %vm7561_vm0, %v7560_v42 }
0x13ff   :  { %6206 = vmatprep.subr.mxu0 %v7560_v42 }
0x1405   :  { %6204 = vmatmul.mubr.msk.f32.vlgmr.msra.gmra.mrb[44].mxu0 %vm3131_vm7, %v8419_v56 }
0x1406   :  { %6207 = vmatpush3.msk.msra.mxu0 %vm3865_vm9, %v4016_v32  ;;  %6208 = vmatprep.mubr.msk.f32.mxu0 %vm7561_vm0, %v7560_v42  ;;  %v4592_v32 = vld [vmem:[#allocation37 + $0x4] sm:$0xf] }
0x1407   :  { %6211 = vmatprep.subr.mxu0 %v7560_v42 }
0x1409   :  { %6209 = vmatmul.mubr.msk.f32.vlgmr.msra.gmra.mrb[46].mxu0 %vm3131_vm7, %v3862_v47 }
0x140a   :  { %6212 = vmatpush3.msk.msra.mxu0 %vm3865_vm9, %v4015_v13  ;;  %6213 = vmatprep.mubr.msk.f32.mxu0 %vm7561_vm0, %v7560_v42 }
0x140b   :  { %6240 = vmatprep.subr.bf16.mxu0 %v7560_v42 }
0x1411   :  { %6214 = vmatmul.mubr.msk.f32.vlgmr.msra.gmra.mrb[46].mxu0 %vm3131_vm7, %v8419_v56  ;;  %v6630_v56 = vld [vmem:[%s8769_s18 + $0x28] sm:$0xff]  }
0x1412   :  { %6248 = vmatprep.mubr.msk.bf16.mxu0 %vm7561_vm0, %v7560_v42  ;;  %6241 = vmatpush3.bf16.msra.mxu0 %v6629_v55  ;;  %v4686_v55 = vsel %vm1165_vm1, %v4684_v53, 0 }
0x1413   :  { %6242 = vmatprep.subr.bf16.mxu0 %v7560_v42 }
0x1416   :  { %6243 = vmatpush3.bf16.msra.mxu0 %v6630_v56 }
0x1417   :  { %6244 = vmatprep.subr.bf16.mxu0 %v7560_v42 }
0x141a   :  { %6245 = vmatpush3.bf16.msra.mxu0 %v6631_v57 }
0x141b   :  { %6246 = vmatprep.subr.bf16.mxu0 %v7560_v42 }
0x141e   :  { %6247 = vmatpush3.bf16.msra.mxu0 %v6632_v4 }
0x141f   :  { %6252 = vmatprep.subr.bf16.mxu0 %v7560_v42 }
0x143b   :  { %v3112_v7 = vpop.xlane.xlu1 %3111 }
0x143c   :  { %v3113_v49 = vadd.f32 %v3112_v7, %v3109_v48  ;;  %v6637_v48 = vld [vmem:[%s8773_s16 + $0x20] sm:$0xff]  }
0x143e   :  { %3115 = vst.msk [vmem:[%s7877_s9] sm:$0xf] %vm3114_vm10, %v3113_v49  ;;  %v6638_v49 = vld [vmem:[%s8773_s16 + $0x28] sm:$0xff]   ;;  %s8780_s9 = sld [smem:[#allocation113_spill]] }
0x143f   :  { %v3102_v50 = vpop.permute.xlu1 %3101 }
0x1440   :  { %v3104_v51 = vsel %vm1161_vm2, %v8365_v6, %v3102_v50  ;;  %v6639_v50 = vld [vmem:[%s8773_s16 + $0x30] sm:$0xff]  }
0x1441   :  { %3105 = vst.msk [vmem:[#allocation53] sm:$0xf] %vm1394_vm4, %v3104_v51  ;;  %v4638_v51 = vld [vmem:[#allocation38 + $0x4] sm:$0xf] }
0x1442   :  { %v4640_v52 = vsel %vm1165_vm1, %v4638_v51, 0 }
0x14d8   :  { %v8511_v6 = vpop.f32.mrb[44].mxu0 }
0x14d9   :  { %v6205_v58 = vpop.f32.mrb[45].mxu0 }
0x14e4   :  { %v8513_v59 = vpop.f32.mrb[46].mxu0 }
0x14e5   :  { %v4167_v60 = vpack.c.bf16 %v8513_v59, %v8513_v59  ;;  %v6215_v61 = vpop.f32.mrb[47].mxu0 }
0x14e6   :  { %v6641_v61 = vld [vmem:[%s8777_s2 + $0x20] sm:$0xff]  }
0x14e7   :  { %6219 = vmatmul.mubr.msk.bf16.vlgmr.msra.gmra.mrb[64].mxu1 %vm3131_vm7, %v4167_v60 }
0x14e8   :  { %6223 = vmatpush3.bf16.msra.mxu1 %v4225_v62  ;;  %6224 = vmatprep.mubr.msk.bf16.mxu1 %vm7561_vm0, %v7560_v42 }
0x14e9   :  { %6228 = vmatprep.subr.bf16.mxu1 %v7560_v42 }
0x14f3   :  { %6225 = vmatmul.mubr.msk.bf16.vlgmr.msra.gmra.mrb[64].mxu1 %vm1161_vm2, %v8106_v54 }
0x14f4   :  { %6229 = vmatpush3.bf16.msra.mxu1 %v4271_v1  ;;  %6230 = vmatprep.mubr.msk.bf16.mxu1 %vm7561_vm0, %v7560_v42  ;;  %v6644_v1 = vld [vmem:[%s8777_s2 + $0x38] sm:$0xff]  }
0x14f5   :  { %6234 = vmatprep.subr.bf16.mxu1 %v7560_v42 }
0x14ff   :  { %6231 = vmatmul.mubr.msk.bf16.vlgmr.msra.gmra.mrb[64].mxu1 %vm1161_vm2, %v8371_v8 }
0x1500   :  { %6235 = vmatpush3.bf16.msra.mxu1 %v4317_v3  ;;  %6236 = vmatprep.mubr.msk.bf16.mxu1 %vm7561_vm0, %v7560_v42  ;;  %v5623_v3 = vld [vmem:[%s8778_s1 + $0x1] ss:$0 sm:$0xff] }
0x1501   :  { %6264 = vmatprep.subr.bf16.mxu1 %v7560_v42 }
0x150b   :  { %6237 = vmatmul.mubr.msk.bf16.vlgmr.msra.gmra.mrb[64].mxu1 %vm1161_vm2, %v8381_v12 }
0x150c   :  { %6266 = vmatprep.mubr.msk.bf16.mxu1 %vm7561_vm0, %v7560_v42  ;;  %6265 = vmatpush3.bf16.msra.mxu1 %v4549_v24 }
0x150d   :  { %6270 = vmatprep.subr.bf16.mxu1 %v7560_v42 }
0x15de   :  { %v4353_v10 = vpop.f32.mrb[64].mxu1 }
0x15df   :  { %v6338_v11 = vadd.f32 %v5572_v9, %v4353_v10  ;;  %v6238_v14 = vpop.f32.mrb[65].mxu1 }
0x15e0   :  { %v4356_v15 = vpop.f32.mrb[66].mxu1 }
0x15e1   :  { %v4360_v16 = vmax.f32 %v6338_v11, 0.0  ;;  %v6239_v17 = vpop.f32.mrb[67].mxu1 }
0x15e3   :  { %v4370_v19 = vpack.c.bf16 %v4360_v16, %v4360_v16 }
0x15e5   :  { %6249 = vmatmul.mubr.msk.bf16.vlgmr.msra.gmra.mrb[48].mxu0 %vm1547_vm5, %v4370_v19 }
0x15e6   :  { %6253 = vmatpush3.bf16.msra.mxu0 %v6633_v18  ;;  %6260 = vmatprep.mubr.msk.bf16.mxu0 %vm7561_vm0, %v7560_v42 }
0x15e7   :  { %6254 = vmatprep.subr.bf16.mxu0 %v7560_v42 }
0x15ea   :  { %6255 = vmatpush3.bf16.msra.mxu0 %v6634_v20 }
0x15eb   :  { %6256 = vmatprep.subr.bf16.mxu0 %v7560_v42 }
0x15ee   :  { %6257 = vmatpush3.bf16.msra.mxu0 %v6635_v21 }
0x15ef   :  { %6258 = vmatprep.subr.bf16.mxu0 %v7560_v42 }
0x15f2   :  { %6259 = vmatpush3.bf16.msra.mxu0 %v6636_v22 }
0x15f3   :  { %6288 = vmatprep.subr.bf16.mxu0 %v7560_v42 }
0x15f5   :  { %6261 = vmatmul.mubr.msk.bf16.vlgmr.msra.gmra.mrb[52].mxu0 %vm1547_vm5, %v4370_v19 }
0x15f6   :  { %6296 = vmatprep.mubr.msk.bf16.mxu0 %vm7561_vm0, %v7560_v42  ;;  %6289 = vmatpush3.bf16.msra.mxu0 %v6637_v48 }
0x15f7   :  { %6290 = vmatprep.subr.bf16.mxu0 %v7560_v42 }
0x15fa   :  { %6291 = vmatpush3.bf16.msra.mxu0 %v6638_v49 }
0x15fb   :  { %6292 = vmatprep.subr.bf16.mxu0 %v7560_v42 }
0x15fe   :  { %6293 = vmatpush3.bf16.msra.mxu0 %v6639_v50 }
0x15ff   :  { %6294 = vmatprep.subr.bf16.mxu0 %v7560_v42 }
0x16b8   :  { %v4440_v25 = vpop.f32.mrb[48].mxu0 }
0x16b9   :  { %v4441_v27 = vadd.f32 %v5586_v63, %v4440_v25  ;;  %v6250_v28 = vpop.f32.mrb[49].mxu0  ;;  %v5638_v63 = vld [vmem:[%s8779_s23 + $0x1] ss:$0 sm:$0xff] }
0x16ba   :  { %v4443_v29 = vpop.f32.mrb[50].mxu0 }
0x16bb   :  { %v4446_v31 = vmul.f32 0.4, %v4441_v27  ;;  %v6251_v33 = vpop.f32.mrb[51].mxu0 }
0x16bd   :  { %6671 = vtanh.f32 %v4446_v31  ;;  %v4904_v31 = vld [vmem:[#allocation41 + $0x2] sm:$0x3] }
0x16c7   :  { %v6672_v34 = vpop.eup %6671 }
0x16c8   :  { %v4448_v35 = vmul.f32 2.5, %v6672_v34  ;;  %v4524_v37 = vpop.f32.mrb[52].mxu0 }
0x16c9   :  { %v6262_v38 = vpop.f32.mrb[53].mxu0  ;;  %v4525_v5 = vadd.f32 %v5601_v46, %v4524_v37 }
0x16ca   :  { %v4530_v39 = vmul.f32 1.442695, %v4448_v35  ;;  %v4527_v40 = vpop.f32.mrb[54].mxu0  ;;  %v5209_v41 = vadd.f32 %v4448_v35, %v8414_v43  ;;  %v4594_v43 = vsel %vm1165_vm1, %v4592_v32, 0 }
0x16cb   :  { %v6263_v44 = vpop.f32.mrb[55].mxu0 }
0x16cc   :  { %6673 = vpow2.f32 %v4530_v39  ;;  %v5219_v45 = vsel %vm5218_vm11, %v5209_v41, 0.0 }
0x16cd   :  { %5220 = vadd.xlane.f32.xlu0 %v5219_v45 }
0x16d6   :  { %v6674_v36 = vpop.eup %6673 }
0x16d7   :  { %v4532_v47 = vmul.f32 %v6674_v36, %v8511_v6 }
0x16d9   :  { %v8563_v13 = vadd.f32 %v4532_v47, %v4525_v5 }
0x16db   :  { %v4536_v7 = vpack.c.bf16 %v8563_v13, %v8563_v13 }
0x16dd   :  { %6267 = vmatmul.mubr.msk.bf16.vlgmr.msra.gmra.mrb[68].mxu1 %vm3131_vm7, %v4536_v7 }
0x16de   :  { %6271 = vmatpush3.bf16.msra.mxu1 %v4594_v43  ;;  %6272 = vmatprep.mubr.msk.bf16.mxu1 %vm7561_vm0, %v7560_v42 }
0x16df   :  { %6276 = vmatprep.subr.bf16.mxu1 %v7560_v42 }
0x16e9   :  { %6273 = vmatmul.mubr.msk.bf16.vlgmr.msra.gmra.mrb[68].mxu1 %vm1161_vm2, %v8106_v54  ;;  %v6640_v54 = vld [vmem:[%s8773_s16 + $0x38] sm:$0xff]  }
0x16ea   :  { %6277 = vmatpush3.bf16.msra.mxu1 %v4640_v52  ;;  %6278 = vmatprep.mubr.msk.bf16.mxu1 %vm7561_vm0, %v7560_v42 }
0x16eb   :  { %6282 = vmatprep.subr.bf16.mxu1 %v7560_v42  ;;  %6295 = vmatpush3.bf16.msra.mxu0 %v6640_v54 }
0x16ec   :  { %6300 = vmatprep.subr.bf16.mxu0 %v7560_v42 }
0x16f5   :  { %6279 = vmatmul.mubr.msk.bf16.vlgmr.msra.gmra.mrb[68].mxu1 %vm1161_vm2, %v8371_v8  ;;  %v5609_v8 = vld [vmem:[%s8776_s14 + $0x1] ss:$0 sm:$0xff] }
0x16f6   :  { %6283 = vmatpush3.bf16.msra.mxu1 %v4686_v55  ;;  %6284 = vmatprep.mubr.msk.bf16.mxu1 %vm7561_vm0, %v7560_v42 }
0x16f7   :  { %6312 = vmatprep.subr.mxu1 %v7560_v42 }
0x1701   :  { %6285 = vmatmul.mubr.msk.bf16.vlgmr.msra.gmra.mrb[68].mxu1 %vm1161_vm2, %v8381_v12  ;;  %v6642_v12 = vld [vmem:[%s8777_s2 + $0x28] sm:$0xff]  }
0x1702   :  { %6314 = vmatprep.mubr.msk.f32.mxu1 %vm7561_vm0, %v7560_v42  ;;  %6313 = vmatpush3.msk.msra.mxu1 %vm3865_vm9, %v4906_v2 }
0x1703   :  { %6317 = vmatprep.subr.mxu1 %v7560_v42 }
0x175a   :  { %v5221_v33 = vpop.xlane.xlu0 %5220 }
0x17d4   :  { %v4722_v56 = vpop.f32.mrb[68].mxu1 }
0x17d5   :  { %v6339_v57 = vadd.f32 %v5609_v8, %v4722_v56  ;;  %v6286_v6 = vpop.f32.mrb[69].mxu1 }
0x17d6   :  { %v4725_v58 = vpop.f32.mrb[70].mxu1 }
0x17d7   :  { %v4729_v30 = vmax.f32 %v6339_v57, 0.0  ;;  %v6287_v60 = vpop.f32.mrb[71].mxu1 }
0x17d9   :  { %v4739_v62 = vpack.c.bf16 %v4729_v30, %v4729_v30 }
0x17db   :  { %6297 = vmatmul.mubr.msk.bf16.vlgmr.msra.gmra.mrb[56].mxu0 %vm1547_vm5, %v4739_v62 }
0x17dc   :  { %6301 = vmatpush3.bf16.msra.mxu0 %v6641_v61  ;;  %6308 = vmatprep.mubr.msk.bf16.mxu0 %vm7561_vm0, %v7560_v42 }
0x17dd   :  { %6302 = vmatprep.subr.bf16.mxu0 %v7560_v42 }
0x17e0   :  { %6303 = vmatpush3.bf16.msra.mxu0 %v6642_v12 }
0x17e1   :  { %6304 = vmatprep.subr.bf16.mxu0 %v7560_v42 }
0x17e4   :  { %6305 = vmatpush3.bf16.msra.mxu0 %v6643_v0 }
0x17e5   :  { %6306 = vmatprep.subr.bf16.mxu0 %v7560_v42 }
0x17e8   :  { %6307 = vmatpush3.bf16.msra.mxu0 %v6644_v1 }
0x17eb   :  { %6309 = vmatmul.mubr.msk.bf16.vlgmr.msra.gmra.mrb[60].mxu0 %vm1547_vm5, %v4739_v62 }
0x18ae   :  { %v4809_v4 = vpop.f32.mrb[56].mxu0 }
0x18af   :  { %v4810_v9 = vadd.f32 %v5623_v3, %v4809_v4  ;;  %v6298_v10 = vpop.f32.mrb[57].mxu0 }
0x18b0   :  { %v4812_v11 = vpop.f32.mrb[58].mxu0 }
0x18b1   :  { %v4815_v14 = vmul.f32 0.4, %v4810_v9  ;;  %v6299_v15 = vpop.f32.mrb[59].mxu0 }
0x18b3   :  { %6675 = vtanh.f32 %v4815_v14 }
0x18bd   :  { %v6676_v16 = vpop.eup %6675 }
0x18be   :  { %v4817_v17 = vmul.f32 2.5, %v6676_v16  ;;  %v4893_v18 = vpop.f32.mrb[60].mxu0 }
0x18bf   :  { %v6310_v19 = vpop.f32.mrb[61].mxu0  ;;  %v4894_v27 = vadd.f32 %v5638_v63, %v4893_v18 }
0x18c0   :  { %v4899_v20 = vmul.f32 1.442695, %v4817_v17  ;;  %v4896_v21 = vpop.f32.mrb[62].mxu0  ;;  %v5210_v22 = vadd.f32 %v4817_v17, %v8463_v26  ;;  %v5062_v26 = vld [vmem:[#allocation46 + $0x2] sm:$0x3] }
0x18c1   :  { %v6311_v23 = vpop.f32.mrb[63].mxu0 }
0x18c2   :  { %6677 = vpow2.f32 %v4899_v20  ;;  %v5222_v24 = vsel %vm5218_vm11, %v5210_v22, 0.0 }
0x18c3   :  { %5223 = vadd.xlane.f32.xlu0 %v5222_v24 }
0x18cc   :  { %v6678_v25 = vpop.eup %6677 }
0x18cd   :  { %v4901_v28 = vmul.f32 %v6678_v25, %v8513_v59  ;;  %v5060_v59 = vld [vmem:[#allocation43 + $0x2] sm:$0x3] }
0x18cf   :  { %v4902_v29 = vadd.f32 %v4901_v28, %v4894_v27 }
0x18d1   :  { %6315 = vmatmul.mubr.msk.f32.vlgmr.msra.gmra.mrb[72].mxu1 %vm3131_vm7, %v4902_v29 }
0x18d2   :  { %6318 = vmatpush3.msk.msra.mxu1 %vm3865_vm9, %v4904_v31  ;;  %6319 = vmatprep.mubr.msk.f32.mxu1 %vm7561_vm0, %v7560_v42 }
0x18d3   :  { %6322 = vmatprep.subr.mxu1 %v7560_v42 }
0x18d9   :  { %6320 = vmatmul.mubr.msk.f32.vlgmr.msra.gmra.mrb[72].mxu1 %vm3131_vm7, %v8563_v13 }
0x18da   :  { %6323 = vmatpush3.msk.msra.mxu1 %vm3865_vm9, %v5062_v26  ;;  %6324 = vmatprep.mubr.msk.f32.mxu1 %vm7561_vm0, %v7560_v42 }
0x18db   :  { %6327 = vmatprep.subr.mxu1 %v7560_v42 }
0x18dd   :  { %6325 = vmatmul.mubr.msk.f32.vlgmr.msra.gmra.mrb[74].mxu1 %vm3131_vm7, %v4902_v29 }
0x18de   :  { %6328 = vmatpush3.msk.msra.mxu1 %vm3865_vm9, %v5060_v59  ;;  %6329 = vmatprep.mubr.msk.f32.mxu1 %vm7561_vm0, %v7560_v42 }
0x18e5   :  { %6330 = vmatmul.mubr.msk.f32.vlgmr.msra.gmra.mrb[74].mxu1 %vm3131_vm7, %v8563_v13 }
0x1950   :  { %v5224_v34 = vpop.xlane.xlu0 %5223 }
0x1951   :  { %v5225_v35 = vadd.f32 %v5224_v34, %v5221_v33 }
0x1953   :  { %5226 = vst.msk [vmem:[%s8780_s9] sm:$0xf] %vm3114_vm10, %v5225_v35 }
0x19ac   :  { %v8634_v37 = vpop.f32.mrb[72].mxu1 }
0x19ad   :  { %v6321_v38 = vpop.f32.mrb[73].mxu1 }
0x19ae   :  { %7328 = shalt.err (!%p7325_p12)
}
0x19af   :  { %s8781_s4 = sld [smem:[#allocation114_spill]] }
0x19b5   :  { %s7329_s21 = scalar_lea.hbm %s8781_s4, 64 }
0x19b6   :  { %p7330_p13 = scmp.ne.s32.totalorder %s8781_s4, %s7329_s21  ;;  %p7333_p0 = scmp.lt.u32.totalorder %s7329_s21, %s8781_s4 }
0x19b8   :  { %p7335_p1 = pnand %p7333_p0, %p7330_p13 }
0x19ba   :  { %7338 = shalt.err (!%p7335_p1)
}
0x19bb   :  { %5248 = dma.vmem_to_hbm [thread:$0]  %s5246_s26, 64, %s8781_s4, [#allocation49]  }
0x19bc   :  { %s7339_s19 = scalar_lea.vmem %s5266_s0, 64  ;;  %p7344_p3 = scmp.lt.s32.totalorder %s5266_s0, %s5266_s0 }
0x19bd   :  { %p7340_p2 = scmp.ne.s32.totalorder %s5266_s0, %s7339_s19  ;;  %p7345_p4 = scmp.lt.s32.totalorder %s7339_s19, %s7339_s19 }
0x19bf   :  { %p7346_p5 = por %p7345_p4, %p7344_p3 }
0x19c1   :  { %p7347_p6 = pnand %p7346_p5, %p7340_p2 }
0x19c3   :  { %7350 = shalt.err (!%p7347_p6)
}
0x19c4   :  { %s7351_s7 = scalar_lea.hbm %s7867_s17, 64 }
0x19c5   :  { %p7352_p7 = scmp.ne.s32.totalorder %s7867_s17, %s7351_s7  ;;  %p7355_p8 = scmp.lt.u32.totalorder %s7351_s7, %s7867_s17 }
0x19c7   :  { %p7357_p9 = pnand %p7355_p8, %p7352_p7 }
0x19c9   :  { %7360 = shalt.err (!%p7357_p9)
}
0x19ca   :  { %5268 = dma.vmem_to_hbm [thread:$0]  %s5266_s0, 64, %s7867_s17, [#allocation52]  }
0x19cb   :  { %s7566_s10 = smov [#allocation50]  }
0x19cc   :  { %s5255_s25 = sshll.u32 %s7566_s10, 4  ;;  %s5256_s25 = int_to_ptr.vmem [resolvable:$true] %s5255_s25 }
0x19cd   :  { %s7361_s11 = scalar_lea.vmem %s5256_s25, 64  ;;  %p7366_p11 = scmp.lt.s32.totalorder %s5256_s25, %s5256_s25 }
0x19ce   :  { %p7362_p10 = scmp.ne.s32.totalorder %s5256_s25, %s7361_s11  ;;  %p7367_p12 = scmp.lt.s32.totalorder %s7361_s11, %s7361_s11 }
0x19d0   :  { %p7368_p13 = por %p7367_p12, %p7366_p11 }
0x19d2   :  { %p7369_p0 = pnand %p7368_p13, %p7362_p10 }
0x19d4   :  { %7372 = shalt.err (!%p7369_p0)
}
0x19d5   :  { %s7373_s15 = scalar_lea.hbm %s7862_s12, 64 }
0x19d6   :  { %p7374_p1 = scmp.ne.s32.totalorder %s7862_s12, %s7373_s15  ;;  %p7377_p2 = scmp.lt.u32.totalorder %s7373_s15, %s7862_s12 }
0x19d8   :  { %p7379_p3 = pnand %p7377_p2, %p7374_p1 }
0x19da   :  { %7382 = shalt.err (!%p7379_p3)
}
0x19db   :  { %5258 = dma.vmem_to_hbm [thread:$0]  %s5256_s25, 64, %s7862_s12, [#allocation49]  }
0x19dc   :  { %s7567_s17 = smov [#allocation53]  }
0x19dd   :  { %s5275_s5 = sshll.u32 %s7567_s17, 4  ;;  %s5276_s5 = int_to_ptr.vmem [resolvable:$true] %s5275_s5 }
0x19de   :  { %s7383_s30 = scalar_lea.vmem %s5276_s5, 64  ;;  %p7388_p5 = scmp.lt.s32.totalorder %s5276_s5, %s5276_s5 }
0x19df   :  { %p7384_p4 = scmp.ne.s32.totalorder %s5276_s5, %s7383_s30  ;;  %p7389_p6 = scmp.lt.s32.totalorder %s7383_s30, %s7383_s30 }
0x19e1   :  { %p7390_p7 = por %p7389_p6, %p7388_p5 }
0x19e3   :  { %p7391_p8 = pnand %p7390_p7, %p7384_p4 }
0x19e5   :  { %7394 = shalt.err (!%p7391_p8)
}
0x19e6   :  { %s7395_s18 = scalar_lea.hbm %s7872_s29, 64 }
0x19e7   :  { %p7396_p9 = scmp.ne.s32.totalorder %s7872_s29, %s7395_s18  ;;  %p7399_p10 = scmp.lt.u32.totalorder %s7395_s18, %s7872_s29 }
0x19e9   :  { %p7401_p11 = pnand %p7399_p10, %p7396_p9 }
0x19eb   :  { %7404 = shalt.err (!%p7401_p11)
}
0x19ec   :  { %5278 = dma.vmem_to_hbm [thread:$0]  %s5276_s5, 64, %s7872_s29, [#allocation52]   ;;  %v5205_v42 = vpop.f32.mrb[74].mxu1  ;;  %vm5216_vm12 = vcmask 27648  }
0x19ed   :  { %5212 = vrot.lane.b32.xlu0 %v5205_v42, %s7541_s8  ;;  %v6331_v39 = vpop.f32.mrb[75].mxu1  ;;  %s7568_s12 = smov [#allocation47]  }
0x19ee   :  { %s5233_s20 = sshll.u32 %s7568_s12, 4  ;;  %s5234_s20 = int_to_ptr.vmem [resolvable:$true] %s5233_s20 }
0x19ef   :  { %s7405_s24 = scalar_lea.vmem %s5234_s20, 64  ;;  %p7410_p13 = scmp.lt.s32.totalorder %s5234_s20, %s5234_s20 }
0x19f0   :  { %p7406_p12 = scmp.ne.s32.totalorder %s5234_s20, %s7405_s24  ;;  %p7411_p0 = scmp.lt.s32.totalorder %s7405_s24, %s7405_s24 }
0x19f2   :  { %p7412_p1 = por %p7411_p0, %p7410_p13 }
0x19f4   :  { %p7413_p2 = pnand %p7412_p1, %p7406_p12 }
0x1a5f   :  { %v5213_v40 = vpop.permute.xlu0 %5212 }
0x1a60   :  { %v5215_v41 = vsel %vm3131_vm7, %v8634_v37, %v5213_v40 }
0x1a61   :  { %5217 = vst.msk [vmem:[#allocation47] sm:$0xf] %vm5216_vm12, %v5215_v41 }
0x1a62   :  { %7416 = shalt.err (!%p7413_p2)
}
0x1a63   :  { %s8782_s29 = sld [smem:[#allocation112_spill]] }
0x1a69   :  { %s7417_s8 = scalar_lea.hbm %s8782_s29, 64 }
0x1a6a   :  { %p7418_p3 = scmp.ne.s32.totalorder %s8782_s29, %s7417_s8  ;;  %p7421_p4 = scmp.lt.u32.totalorder %s7417_s8, %s8782_s29 }
0x1a6c   :  { %p7423_p5 = pnand %p7421_p4, %p7418_p3 }
0x1a6e   :  { %7426 = shalt.err (!%p7423_p5)
}
0x1a6f   :  { %5236 = dma.vmem_to_hbm [thread:$0]  %s5234_s20, 64, %s8782_s29, [#allocation4]  }
0x1a70   :  { %7457 = dma.done.wait [#allocation4], 64  }
0x1a71   :  { %7458 = vsyncadd [#allocation4], 4294967232 }
0x1a72   :  { %7459 = dma.done.wait [#allocation49], 128  }
0x1a73   :  { %7460 = vsyncadd [#allocation49], 4294967168 }
0x1a74   :  { %7461 = dma.done.wait [#allocation52], 128  }
0x1a75   :  { %7462 = vsyncadd [#allocation52], 4294967168 }
0x1a76   :  { %5300 = vsyncpa [#allocation3], 1 }
0x1a77   :  { %5301 = vsyncpa [#allocation6], 1 }
0x1a78   :  { %5302 = vsyncpa [#allocation9], 1 }
0x1a79   :  { %5303 = vsyncpa [#allocation12], 1 }
0x1a7a   :  { %5304 = vsyncpa [#allocation15], 1 }
0x1a7b   :  { %5305 = vsyncpa [#allocation18], 1 }
0x1a7c   :  { %5306 = vsyncpa [#allocation21], 1 }
0x1a7d   :  { %5307 = vsyncpa [#allocation24], 1 }
0x1a7e   :  { %5308 = vsyncpa [#allocation27], 1 }
0x1a7f   :  { %5309 = vsyncpa [#allocation30], 1 }
0x1a80   :  { %5310 = vsyncpa [#allocation33], 1 }
0x1a81   :  { %5311 = vsyncpa [#allocation36], 1 }
0x1a82   :  { %5312 = vsyncpa [#allocation39], 1 }
0x1a83   :  { %5313 = vsyncpa [#allocation42], 1 }
0x1a84   :  { %5314 = vsyncpa [#allocation45], 1 }
0x1a85   :  { %5315 = vsyncpa [#allocation4], 1 }
0x1a86   :  { %5316 = vsyncpa [#allocation49], 1 }
0x1a87   :  { %5317 = vsyncpa [#allocation52], 1 }

</bundles_post_ra>
